<compile_context>
chip_gen: v5e
topology: v5e:2x2
jax: 0.10.0
libtpu: 0.0.40
codegen_flags: <defaults>
</compile_context>

<pallas_src>
import functools
import numpy as np
import jax
import jax.numpy as jnp
from jax.experimental import pallas as pl
from jax.experimental.pallas import tpu as pltpu

BN_EPS = 1e-5


def _pick_tile(s):
    for t in (2048, 1024, 512, 256, 128):
        if s % t == 0:
            return t
    return s


# ----------------------------- Pallas kernels ------------------------------

def _mm_stats_kernel(x_ref, w_ref, y_ref, sum_ref, ssq_ref):
    """1x1 T-conv as channel matmul: y = W @ x, plus per-channel sum / sumsq
    accumulation (for the following training-mode BatchNorm)."""
    @pl.when((pl.program_id(0) == 0) & (pl.program_id(1) == 0))
    def _init():
        sum_ref[...] = jnp.zeros_like(sum_ref)
        ssq_ref[...] = jnp.zeros_like(ssq_ref)

    y = jnp.dot(w_ref[...], x_ref[...], preferred_element_type=jnp.float32)
    y_ref[...] = y
    sum_ref[...] += jnp.sum(y, axis=1, keepdims=True)
    ssq_ref[...] += jnp.sum(y * y, axis=1, keepdims=True)


def _act_mm_stats_kernel(x_ref, sc_ref, sh_ref, w_ref, y_ref, sum_ref, ssq_ref):
    """Fused: BN-apply (precomputed per-channel scale/shift) + Siren sin +
    1x1 conv matmul + BN-stat accumulation for the next BN."""
    @pl.when((pl.program_id(0) == 0) & (pl.program_id(1) == 0))
    def _init():
        sum_ref[...] = jnp.zeros_like(sum_ref)
        ssq_ref[...] = jnp.zeros_like(ssq_ref)

    # TODO(synk): Siren module is not defined in the source; assumed sin(x).
    z = jnp.sin(x_ref[...] * sc_ref[...] + sh_ref[...])
    y = jnp.dot(w_ref[...], z, preferred_element_type=jnp.float32)
    y_ref[...] = y
    sum_ref[...] += jnp.sum(y, axis=1, keepdims=True)
    ssq_ref[...] += jnp.sum(y * y, axis=1, keepdims=True)


def matmul_stats(x, w, scale=None, shift=None):
    """x: (N, Cin, S) NC(HW) slab; w: (Cout, Cin).
    Optionally fuses z = sin(x*scale + shift) on the input.
    Returns y (N, Cout, S) and per-channel (sum, sumsq), each (Cout, 1)."""
    N, Cin, S = x.shape
    Cout = w.shape[0]
    TS = _pick_tile(S)                       # lane tile (>=128 when possible)
    grid = (N, S // TS)

    x_spec = pl.BlockSpec((None, Cin, TS), lambda n, s: (n, 0, s))
    w_spec = pl.BlockSpec((Cout, Cin), lambda n, s: (0, 0))
    y_spec = pl.BlockSpec((None, Cout, TS), lambda n, s: (n, 0, s))
    stat_spec = pl.BlockSpec((Cout, 1), lambda n, s: (0, 0))
    vin_spec = pl.BlockSpec((Cin, 1), lambda n, s: (0, 0))

    if scale is None:
        kern = _mm_stats_kernel
        inputs = (x, w)
        in_specs = [x_spec, w_spec]
        trans = 0
    else:
        kern = _act_mm_stats_kernel
        inputs = (x, scale, shift, w)
        in_specs = [x_spec, vin_spec, vin_spec, w_spec]
        trans = N * Cin * S

    cost = pl.CostEstimate(
        flops=2 * N * S * Cin * Cout,
        transcendentals=trans,
        bytes_accessed=4 * (N * Cin * S + N * Cout * S + Cin * Cout))

    return pl.pallas_call(
        kern,
        out_shape=(jax.ShapeDtypeStruct((N, Cout, S), jnp.float32),
                   jax.ShapeDtypeStruct((Cout, 1), jnp.float32),
                   jax.ShapeDtypeStruct((Cout, 1), jnp.float32)),
        grid=grid,
        in_specs=in_specs,
        out_specs=[y_spec, stat_spec, stat_spec],
        compiler_params=pltpu.CompilerParams(
            dimension_semantics=("arbitrary", "arbitrary")),
        cost_estimate=cost,
    )(*inputs)


def _convT3x3_kernel(y1_ref, sc_ref, sh_ref, w_ref, m_ref,
                     y2_ref, sum_ref, ssq_ref, zbuf,
                     *, taps, shifts, n_phases, s1, pad):
    """Fused: BN1-apply + sin on the input, 3x3 ConvTranspose2d (stride 1 or 2)
    as per-tap channel matmuls on spatially shifted / boundary-masked slabs,
    and BN2-stat accumulation of the conv output. One image per grid step.

    Stride-2 output is phase-decomposed: y2 lanes are ordered (phase, h*W+w)
    with phase = 2*a + b for output position (2h+a, 2w+b). No zero-dilated
    tensor is ever materialized (in VMEM or HBM)."""
    @pl.when(pl.program_id(0) == 0)
    def _init():
        sum_ref[...] = jnp.zeros_like(sum_ref)
        ssq_ref[...] = jnp.zeros_like(ssq_ref)

    # TODO(synk): Siren module is not defined in the source; assumed sin(x).
    zbuf[...] = jnp.zeros_like(zbuf)
    zbuf[:, pad:pad + s1] = jnp.sin(y1_ref[...] * sc_ref[...] + sh_ref[...])

    # One shifted + masked slab per distinct spatial shift (<= 9).
    zs = [zbuf[:, pad + sh:pad + sh + s1] * m_ref[i:i + 1, :]
          for i, sh in enumerate(shifts)]

    accs = [None] * n_phases
    for t, (phase, si) in enumerate(taps):
        contrib = jnp.dot(w_ref[t], zs[si], preferred_element_type=jnp.float32)
        accs[phase] = contrib if accs[phase] is None else accs[phase] + contrib

    for p in range(n_phases):
        a = accs[p]
        y2_ref[:, p * s1:(p + 1) * s1] = a
        sum_ref[...] += jnp.sum(a, axis=1, keepdims=True)
        ssq_ref[...] += jnp.sum(a * a, axis=1, keepdims=True)


def convT3x3_fused(y1, scale, shift, wtaps, masks, taps, shifts, n_phases, W):
    """ConvTranspose2d(k=3, padding=1, output_padding=up-1) with fused input
    BN-apply+sin and output BN-stat accumulation.  y1: (N, Cmid, H*W)."""
    N, Cmid, S1 = y1.shape
    T = wtaps.shape[0]
    n_shifts = masks.shape[0]
    S2 = n_phases * S1
    pad = ((W + 1 + 127) // 128) * 128   # lane-aligned guard band >= max |shift|

    kern = functools.partial(_convT3x3_kernel, taps=taps, shifts=shifts,
                             n_phases=n_phases, s1=S1, pad=pad)
    cost = pl.CostEstimate(
        flops=2 * N * T * Cmid * Cmid * S1,
        transcendentals=N * Cmid * S1,
        bytes_accessed=4 * (N * Cmid * (S1 + S2) + T * Cmid * Cmid
                            + n_shifts * S1))

    return pl.pallas_call(
        kern,
        out_shape=(jax.ShapeDtypeStruct((N, Cmid, S2), jnp.float32),
                   jax.ShapeDtypeStruct((Cmid, 1), jnp.float32),
                   jax.ShapeDtypeStruct((Cmid, 1), jnp.float32)),
        grid=(N,),
        in_specs=[pl.BlockSpec((None, Cmid, S1), lambda n: (n, 0, 0)),
                  pl.BlockSpec((Cmid, 1), lambda n: (0, 0)),
                  pl.BlockSpec((Cmid, 1), lambda n: (0, 0)),
                  pl.BlockSpec((T, Cmid, Cmid), lambda n: (0, 0, 0)),
                  pl.BlockSpec((n_shifts, S1), lambda n: (0, 0))],
        out_specs=[pl.BlockSpec((None, Cmid, S2), lambda n: (n, 0, 0)),
                   pl.BlockSpec((Cmid, 1), lambda n: (0, 0)),
                   pl.BlockSpec((Cmid, 1), lambda n: (0, 0))],
        scratch_shapes=[pltpu.VMEM((Cmid, S1 + 2 * pad), jnp.float32)],
        compiler_params=pltpu.CompilerParams(
            dimension_semantics=("arbitrary",)),
        cost_estimate=cost,
    )(y1, scale, shift, wtaps, masks)


def _bn_add_shortcut_kernel(y3_ref, sd_ref, sc3_ref, sh3_ref, scs_ref, shs_ref,
                            o_ref, *, s1):
    """Final BN-apply on the main path + shortcut-BN-apply + residual add.
    The stride-`up` 1x1 shortcut only has nonzero (dense) values on phase 0
    (lanes [0, s1)); every other lane receives the BN image of a zero input,
    i.e. the per-channel shift only."""
    base = y3_ref[...] * sc3_ref[...] + sh3_ref[...] + shs_ref[...]
    o_ref[...] = base
    o_ref[:, 0:s1] = base[:, 0:s1] + sd_ref[...] * scs_ref[...]


def _bn_add_kernel(y3_ref, res_ref, sc3_ref, sh3_ref, o_ref):
    o_ref[...] = y3_ref[...] * sc3_ref[...] + sh3_ref[...] + res_ref[...]


def bn_add_shortcut(y3, sd, sc3, sh3, scs, shs):
    N, Cexp, S2 = y3.shape
    S1 = sd.shape[2]
    kern = functools.partial(_bn_add_shortcut_kernel, s1=S1)
    return pl.pallas_call(
        kern,
        out_shape=jax.ShapeDtypeStruct((N, Cexp, S2), jnp.float32),
        grid=(N,),
        in_specs=[pl.BlockSpec((None, Cexp, S2), lambda n: (n, 0, 0)),
                  pl.BlockSpec((None, Cexp, S1), lambda n: (n, 0, 0)),
                  pl.BlockSpec((Cexp, 1), lambda n: (0, 0)),
                  pl.BlockSpec((Cexp, 1), lambda n: (0, 0)),
                  pl.BlockSpec((Cexp, 1), lambda n: (0, 0)),
                  pl.BlockSpec((Cexp, 1), lambda n: (0, 0))],
        out_specs=pl.BlockSpec((None, Cexp, S2), lambda n: (n, 0, 0)),
        compiler_params=pltpu.CompilerParams(
            dimension_semantics=("parallel",)),
    )(y3, sd, sc3, sh3, scs, shs)


def bn_add_residual(y3, res, sc3, sh3):
    N, Cexp, S = y3.shape
    TS = _pick_tile(S)
    return pl.pallas_call(
        _bn_add_kernel,
        out_shape=jax.ShapeDtypeStruct((N, Cexp, S), jnp.float32),
        grid=(N, S // TS),
        in_specs=[pl.BlockSpec((None, Cexp, TS), lambda n, s: (n, 0, s)),
                  pl.BlockSpec((None, Cexp, TS), lambda n, s: (n, 0, s)),
                  pl.BlockSpec((Cexp, 1), lambda n, s: (0, 0)),
                  pl.BlockSpec((Cexp, 1), lambda n, s: (0, 0))],
        out_specs=pl.BlockSpec((None, Cexp, TS), lambda n, s: (n, 0, s)),
        compiler_params=pltpu.CompilerParams(
            dimension_semantics=("parallel", "parallel")),
    )(y3, res, sc3, sh3)


# --------------------------- parameter preparation ---------------------------

def _make_tap_plan(up, H, W):
    """Static tap metadata for ConvTranspose2d(k=3, stride=up, padding=1,
    output_padding=up-1) as per-tap channel matmuls on shifted inputs."""
    if up == 1:
        # out[oh,ow] += x[oh+dh, ow+dw] * w[:,:,kh,kw],  dh = 1-kh, dw = 1-kw
        tap_list = [(0, 1 - kh, 1 - kw, kh, kw)
                    for kh in range(3) for kw in range(3)]
        n_phases = 1
    elif up == 2:
        # output (2i+a, 2j+b) <- x[i+dh, j+dw] * w[:,:,kh,kw]
        per_parity = {0: [(1, 0)], 1: [(0, 1), (2, 0)]}   # parity -> [(k, d)]
        tap_list = []
        for a in (0, 1):
            for b in (0, 1):
                for kh, dh in per_parity[a]:
                    for kw, dw in per_parity[b]:
                        tap_list.append((2 * a + b, dh, dw, kh, kw))
        n_phases = 4
    else:
        raise NotImplementedError("upsampling must be 1 or 2")

    shift_vals, shift_idx, taps, khkw, dhdw = [], {}, [], [], []
    for phase, dh, dw, kh, kw in tap_list:
        key = (dh, dw)
        if key not in shift_idx:
            shift_idx[key] = len(shift_vals)
            shift_vals.append(dh * W + dw)
            dhdw.append(key)
        taps.append((phase, shift_idx[key]))
        khkw.append((kh, kw))

    hh, ww = np.meshgrid(np.arange(H), np.arange(W), indexing="ij")
    masks = np.stack(
        [((hh + dh >= 0) & (hh + dh < H) & (ww + dw >= 0) & (ww + dw < W))
         .reshape(-1).astype(np.float32) for dh, dw in dhdw], axis=0)
    return tuple(taps), tuple(shift_vals), n_phases, masks, khkw


def prepare_block_params(p, H, W):
    """Hoist weight transposes / squeezes, tap planning and boundary masks out
    of the forward pass (done once)."""
    up = p["upsampling"]
    taps, shifts, n_phases, masks, khkw = _make_tap_plan(up, H, W)
    prep = dict(
        upsampling=up, H=H, W=W, n_phases=n_phases, taps=taps, shifts=shifts,
        masks=jnp.asarray(masks),
        w1=jnp.transpose(p["w1_t"][:, :, 0, 0]),          # (Cout, Cin)
        w3=jnp.transpose(p["w3_t"][:, :, 0, 0]),          # (Cexp, Cout)
        wtaps=jnp.stack([jnp.transpose(p["w2_t"][:, :, kh, kw])
                         for kh, kw in khkw], axis=0),     # (T, Cout, Cin)
        g1=p["g1"], b1=p["b1"], g2=p["g2"], b2=p["b2"],
        g3=p["g3"], b3=p["b3"])
    if "ws_t" in p:
        prep["ws"] = jnp.transpose(p["ws_t"][:, :, 0, 0])  # (Cexp, Cin)
        prep["gs"], prep["bs"] = p["gs"], p["bs"]
    return prep


def prepare_layer_params(blocks, H, W):
    prepped = []
    for p in blocks:
        prepped.append(prepare_block_params(p, H, W))
        if p["upsampling"] == 2:
            H, W = 2 * H, 2 * W
    return prepped


# ------------------------------ Pallas forward ------------------------------

def _bn_scale_shift(s, q, count, gamma, beta):
    """Fold training-mode BatchNorm (batch stats, biased variance, eps=1e-5)
    into per-channel scale/shift: y = x*scale + shift."""
    mean = s / count
    var = q / count - mean * mean
    inv = jax.lax.rsqrt(var + BN_EPS)
    scale = gamma.reshape(-1, 1) * inv
    shift = beta.reshape(-1, 1) - mean * scale
    return scale, shift


def bottleneck_block_pallas(x, p):
    """x: (N, Cin, H*W) fp32 NC(HW) slab -> (N, Cexp, Ho*Wo)."""
    N, Cin, S1 = x.shape
    H, W = p["H"], p["W"]
    up = p["upsampling"]
    n_phases = p["n_phases"]
    Cexp = p["w3"].shape[0]
    S2 = n_phases * S1

    # conv_bn(k=1): 1x1 T-conv + BN1 stats
    y1, s1s, s1q = matmul_stats(x, p["w1"])
    sc1, sh1 = _bn_scale_shift(s1s, s1q, N * S1, p["g1"], p["b1"])

    # siren + conv_bn(k=3, stride=up, output_padding=up-1) + BN2 stats
    y2, s2s, s2q = convT3x3_fused(y1, sc1, sh1, p["wtaps"], p["masks"],
                                  p["taps"], p["shifts"], n_phases, W)
    sc2, sh2 = _bn_scale_shift(s2s, s2q, N * S2, p["g2"], p["b2"])

    # siren + conv_bn(k=1) + BN3 stats
    y3, s3s, s3q = matmul_stats(y2, p["w3"], scale=sc2, shift=sh2)
    sc3, sh3 = _bn_scale_shift(s3s, s3q, N * S2, p["g3"], p["b3"])

    if "ws" in p:
        # Shortcut: 1x1 stride-`up` T-conv. Only dense values are computed;
        # BN stats over the (virtually) zero-inserted full-size tensor follow
        # analytically (inserted zeros contribute nothing to sum / sumsq but
        # count towards the element count).
        sd, sss, ssq = matmul_stats(x, p["ws"])
        scs, shs = _bn_scale_shift(sss, ssq, N * S2, p["gs"], p["bs"])
        out = bn_add_shortcut(y3, sd, sc3, sh3, scs, shs)
    else:
        if up != 1:
            raise NotImplementedError(
                "identity residual with upsampling != 1 would shape-mismatch "
                "(it also fails in the reference PyTorch module)")
        out = bn_add_residual(y3, x, sc3, sh3)

    if up == 2:
        # Un-interleave phases back to spatial row-major order (one cheap
        # wrapper-side transpose per upsampling block).
        out = out.reshape(N, Cexp, 2, 2, H, W)
        out = jnp.transpose(out, (0, 1, 4, 2, 5, 3)).reshape(N, Cexp, 4 * S1)
    return out


def resnet_inverse_layer_pallas(x_nchw, prepped):
    N, C, H, W = x_nchw.shape
    x = x_nchw.astype(jnp.float32).reshape(N, C, H * W)
    for p in prepped:
        x = bottleneck_block_pallas(x, p)
        if p["upsampling"] == 2:
            H, W = 2 * H, 2 * W
    return x.reshape(N, -1, H, W)          # NCHW, like nn.ConvTranspose2d


# ------------------------------ JAX reference -------------------------------

def _convT_ref(x_nhwc, wt, stride, padding, output_padding):
    k = wt.shape[2]
    w_fwd = jnp.transpose(wt[:, :, ::-1, ::-1], (2, 3, 0, 1))
    lo = k - 1 - padding
    hi = k - 1 - padding + output_padding
    return jax.lax.conv_general_dilated(
        x_nhwc, w_fwd, window_strides=(1, 1),
        padding=((lo, hi), (lo, hi)),
        lhs_dilation=(stride, stride),
        dimension_numbers=("NHWC", "HWIO", "NHWC"),
        precision=jax.lax.Precision.HIGHEST)


def _bn_ref(x, g, b, act):
    mean = x.mean(axis=(0, 1, 2), keepdims=True)
    var = jnp.square(x - mean).mean(axis=(0, 1, 2), keepdims=True)
    y = ((x - mean) * jax.lax.rsqrt(var + BN_EPS) * g.reshape(1, 1, 1, -1)
         + b.reshape(1, 1, 1, -1))
    return jnp.sin(y) if act == "sin" else y


def bottleneck_block_ref(x, p):
    up = p["upsampling"]
    y = _convT_ref(x, p["w1_t"], 1, 0, 0)
    y = _bn_ref(y, p["g1"], p["b1"], "sin")
    y = _convT_ref(y, p["w2_t"], up, 1, up - 1)
    y = _bn_ref(y, p["g2"], p["b2"], "sin")
    y = _convT_ref(y, p["w3_t"], 1, 0, 0)
    y = _bn_ref(y, p["g3"], p["b3"], "none")
    if "ws_t" in p:
        s = _convT_ref(x, p["ws_t"], up, 0, up - 1)
        s = _bn_ref(s, p["gs"], p["bs"], "none")
    else:
        s = x
    return y + s


def resnet_inverse_layer_ref(x_nchw, blocks):
    x = jnp.transpose(x_nchw, (0, 2, 3, 1)).astype(jnp.float32)
    for p in blocks:
        x = bottleneck_block_ref(x, p)
    return jnp.transpose(x, (0, 3, 1, 2))


# ------------------------------- Params init --------------------------------

def init_block_params(key, cin, cout, upsampling, expansion=4):
    cexp = cout * expansion
    ks = jax.random.split(key, 8)

    def convT_w(k, ci, co, ksz):
        # PyTorch ConvTranspose2d weight layout: (Cin, Cout, kH, kW)
        scale = 1.0 / np.sqrt(ci * ksz * ksz)
        return scale * jax.random.normal(k, (ci, co, ksz, ksz), jnp.float32)

    def bn_params(k, c):
        k1, k2 = jax.random.split(k)
        g = 1.0 + 0.1 * jax.random.normal(k1, (c,), jnp.float32)
        b = 0.1 * jax.random.normal(k2, (c,), jnp.float32)
        return g, b

    p = {"upsampling": upsampling}
    p["w1_t"] = convT_w(ks[0], cin, cout, 1)
    p["g1"], p["b1"] = bn_params(ks[1], cout)
    p["w2_t"] = convT_w(ks[2], cout, cout, 3)
    p["g2"], p["b2"] = bn_params(ks[3], cout)
    p["w3_t"] = convT_w(ks[4], cout, cexp, 1)
    p["g3"], p["b3"] = bn_params(ks[5], cexp)
    if cin != cexp:  # should_apply_shortcut
        p["ws_t"] = convT_w(ks[6], cin, cexp, 1)
        p["gs"], p["bs"] = bn_params(ks[7], cexp)
    return p


def init_layer_params(key, in_channels, out_channels, n=1, expansion=4):
    upsampling = 2 if in_channels != out_channels else 1
    keys = jax.random.split(key, n)
    blocks = [init_block_params(keys[0], in_channels, out_channels,
                                upsampling, expansion)]
    for i in range(1, n):
        blocks.append(init_block_params(keys[i], out_channels * expansion,
                                        out_channels, 1, expansion))
    return blocks


# ---------------------------------- main -------------------------------------

if __name__ == "__main__":
    key = jax.random.PRNGKey(0)
    kx, kp = jax.random.split(key)

    # ResNetInverseLayer(in_channels=8, out_channels=4, n=2)
    N, Cin, H, W = 2, 8, 8, 8
    Cout, n_blocks, expansion = 4, 2, 4

    x = jax.random.normal(kx, (N, Cin, H, W), jnp.float32)   # NCHW
    blocks = init_layer_params(kp, Cin, Cout, n=n_blocks, expansion=expansion)
    prepped = prepare_layer_params(blocks, H, W)

    fwd = jax.jit(lambda xx: resnet_inverse_layer_pallas(xx, prepped))
    out = jax.block_until_ready(fwd(x))

    ref = jax.block_until_ready(resnet_inverse_layer_ref(x, blocks))

    assert out.shape == (N, Cout * expansion, H * 2, W * 2), out.shape
    np.testing.assert_allclose(np.asarray(out), np.asarray(ref),
                               rtol=1e-3, atol=1e-3)
    print("KERNEL_OK")
</pallas_src>

<mosaic_0001>
module attributes {stable_mosaic.version = 11 : i64} {
  func.func @_mm_stats_kernel(%arg0: i32, %arg1: i32, %arg2: memref<1x8x64xf32, #tpu.memory_space<vmem>>, %arg3: memref<4x8xf32, #tpu.memory_space<vmem>>, %arg4: memref<1x4x64xf32, #tpu.memory_space<vmem>>, %arg5: memref<4x1xf32, #tpu.memory_space<vmem>>, %arg6: memref<4x1xf32, #tpu.memory_space<vmem>>) attributes {dimension_semantics = [#tpu.dimension_semantics<arbitrary>, #tpu.dimension_semantics<arbitrary>], iteration_bounds = array<i64: 2, 1>, scalar_prefetch = 0 : i64, scratch_operands = 0 : i64, tpu.core_type = #tpu.core_type<tc>, window_params = [{transform_indices = @transform_0, window_bounds = array<i64: 1, 8, 64>}, {pipeline_mode = #tpu.pipeline_mode<synchronous>, transform_indices = @transform_1, window_bounds = array<i64: 4, 8>}, {transform_indices = @transform_2, window_bounds = array<i64: 1, 4, 64>}, {pipeline_mode = #tpu.pipeline_mode<synchronous>, transform_indices = @transform_3, window_bounds = array<i64: 4, 1>}, {pipeline_mode = #tpu.pipeline_mode<synchronous>, transform_indices = @transform_4, window_bounds = array<i64: 4, 1>}]} {
    %c0_i32 = arith.constant 0 : i32
    %0 = arith.cmpi eq, %arg0, %c0_i32 : i32
    %c0_i32_0 = arith.constant 0 : i32
    %1 = arith.cmpi eq, %arg1, %c0_i32_0 : i32
    %2 = arith.andi %0, %1 : i1
    %3 = arith.extui %2 : i1 to i32
    %c0_i32_1 = arith.constant 0 : i32
    %4 = arith.cmpi ne, %3, %c0_i32_1 : i32
    scf.if %4 {
      %cst_19 = arith.constant 0.000000e+00 : f32
      %23 = vector.broadcast %cst_19 : f32 to vector<4x1xf32>
      %c0_20 = arith.constant 0 : index
      %c0_21 = arith.constant 0 : index
      %24 = vector.load %arg5[%c0_20, %c0_21] : memref<4x1xf32, #tpu.memory_space<vmem>>, vector<4x1xf32>
      tpu.vector_store %arg5[%c0_20, %c0_21], %23 {strides = array<i32>} : memref<4x1xf32, #tpu.memory_space<vmem>>, vector<4x1xf32>,
      %cst_22 = arith.constant 0.000000e+00 : f32
      %25 = vector.broadcast %cst_22 : f32 to vector<4x1xf32>
      %c0_23 = arith.constant 0 : index
      %c0_24 = arith.constant 0 : index
      %26 = vector.load %arg6[%c0_23, %c0_24] : memref<4x1xf32, #tpu.memory_space<vmem>>, vector<4x1xf32>
      tpu.vector_store %arg6[%c0_23, %c0_24], %25 {strides = array<i32>} : memref<4x1xf32, #tpu.memory_space<vmem>>, vector<4x1xf32>,
    } else {
    }
    %c0 = arith.constant 0 : index
    %c0_2 = arith.constant 0 : index
    %5 = vector.load %arg3[%c0, %c0_2] : memref<4x8xf32, #tpu.memory_space<vmem>>, vector<4x8xf32>
    %c0_3 = arith.constant 0 : index
    %c0_4 = arith.constant 0 : index
    %c0_5 = arith.constant 0 : index
    %6 = vector.load %arg2[%c0_3, %c0_4, %c0_5] : memref<1x8x64xf32, #tpu.memory_space<vmem>>, vector<1x8x64xf32>
    %7 = vector.shape_cast %6 : vector<1x8x64xf32> to vector<8x64xf32>
    %cst = arith.constant dense<0.000000e+00> : vector<4x64xf32>
    %8 = tpu.matmul %5, %7, %cst {dimension_numbers = #tpu.dot_dimension_numbers<[1], [0], [0], [1], [0, 0, 1, 1], [], []>} : vector<4x8xf32>, vector<8x64xf32>, vector<4x64xf32> -> vector<4x64xf32>
    %c0_6 = arith.constant 0 : index
    %c0_7 = arith.constant 0 : index
    %c0_8 = arith.constant 0 : index
    %9 = vector.load %arg4[%c0_6, %c0_7, %c0_8] : memref<1x4x64xf32, #tpu.memory_space<vmem>>, vector<1x4x64xf32>
    %10 = vector.shape_cast %9 : vector<1x4x64xf32> to vector<4x64xf32>
    %11 = vector.shape_cast %8 : vector<4x64xf32> to vector<1x4x64xf32>
    tpu.vector_store %arg4[%c0_6, %c0_7, %c0_8], %11 {strides = array<i32>} : memref<1x4x64xf32, #tpu.memory_space<vmem>>, vector<1x4x64xf32>,
    %c0_9 = arith.constant 0 : index
    %c0_10 = arith.constant 0 : index
    %12 = vector.load %arg5[%c0_9, %c0_10] : memref<4x1xf32, #tpu.memory_space<vmem>>, vector<4x1xf32>
    %cst_11 = arith.constant dense<0.000000e+00> : vector<4xf32>
    %13 = vector.multi_reduction <add>, %8, %cst_11 [1] : vector<4x64xf32> to vector<4xf32>
    %14 = vector.shape_cast %13 : vector<4xf32> to vector<4x1xf32>
    %15 = arith.addf %12, %14 : vector<4x1xf32>
    %c0_12 = arith.constant 0 : index
    %c0_13 = arith.constant 0 : index
    %16 = vector.load %arg5[%c0_12, %c0_13] : memref<4x1xf32, #tpu.memory_space<vmem>>, vector<4x1xf32>
    tpu.vector_store %arg5[%c0_12, %c0_13], %15 {strides = array<i32>} : memref<4x1xf32, #tpu.memory_space<vmem>>, vector<4x1xf32>,
    %c0_14 = arith.constant 0 : index
    %c0_15 = arith.constant 0 : index
    %17 = vector.load %arg6[%c0_14, %c0_15] : memref<4x1xf32, #tpu.memory_space<vmem>>, vector<4x1xf32>
    %18 = arith.mulf %8, %8 : vector<4x64xf32>
    %cst_16 = arith.constant dense<0.000000e+00> : vector<4xf32>
    %19 = vector.multi_reduction <add>, %18, %cst_16 [1] : vector<4x64xf32> to vector<4xf32>
    %20 = vector.shape_cast %19 : vector<4xf32> to vector<4x1xf32>
    %21 = arith.addf %17, %20 : vector<4x1xf32>
    %c0_17 = arith.constant 0 : index
    %c0_18 = arith.constant 0 : index
    %22 = vector.load %arg6[%c0_17, %c0_18] : memref<4x1xf32, #tpu.memory_space<vmem>>, vector<4x1xf32>
    tpu.vector_store %arg6[%c0_17, %c0_18], %21 {strides = array<i32>} : memref<4x1xf32, #tpu.memory_space<vmem>>, vector<4x1xf32>,
    return
  }
  func.func @transform_0(%arg0: i32, %arg1: i32) -> (i32, i32, i32) {
    %c0_i32 = arith.constant 0 : i32
    %c0_i32_0 = arith.constant 0 : i32
    return %arg0, %c0_i32, %arg1 : i32, i32, i32
  }
  func.func @transform_1(%arg0: i32, %arg1: i32) -> (i32, i32) {
    %c0_i32 = arith.constant 0 : i32
    %c0_i32_0 = arith.constant 0 : i32
    %c0_i32_1 = arith.constant 0 : i32
    return %c0_i32, %c0_i32_0 : i32, i32
  }
  func.func @transform_2(%arg0: i32, %arg1: i32) -> (i32, i32, i32) {
    %c0_i32 = arith.constant 0 : i32
    %c0_i32_0 = arith.constant 0 : i32
    return %arg0, %c0_i32, %arg1 : i32, i32, i32
  }
  func.func @transform_3(%arg0: i32, %arg1: i32) -> (i32, i32) {
    %c0_i32 = arith.constant 0 : i32
    %c0_i32_0 = arith.constant 0 : i32
    %c0_i32_1 = arith.constant 0 : i32
    return %c0_i32, %c0_i32_0 : i32, i32
  }
  func.func @transform_4(%arg0: i32, %arg1: i32) -> (i32, i32) {
    %c0_i32 = arith.constant 0 : i32
    %c0_i32_0 = arith.constant 0 : i32
    %c0_i32_1 = arith.constant 0 : i32
    return %c0_i32, %c0_i32_0 : i32, i32
  }
}

module attributes {stable_mosaic.version = 11 : i64} {
  func.func @_convT3x3_kernel(%arg0: i32, %arg1: memref<1x4x64xf32, #tpu.memory_space<vmem>>, %arg2: memref<4x1xf32, #tpu.memory_space<vmem>>, %arg3: memref<4x1xf32, #tpu.memory_space<vmem>>, %arg4: memref<9x4x4xf32, #tpu.memory_space<vmem>>, %arg5: memref<4x64xf32, #tpu.memory_space<vmem>>, %arg6: memref<1x4x256xf32, #tpu.memory_space<vmem>>, %arg7: memref<4x1xf32, #tpu.memory_space<vmem>>, %arg8: memref<4x1xf32, #tpu.memory_space<vmem>>, %arg9: memref<4x320xf32, #tpu.memory_space<vmem>>) attributes {dimension_semantics = [#tpu.dimension_semantics<arbitrary>], iteration_bounds = array<i64: 2>, scalar_prefetch = 0 : i64, scratch_operands = 1 : i64, tpu.core_type = #tpu.core_type<tc>, window_params = [{transform_indices = @transform_0, window_bounds = array<i64: 1, 4, 64>}, {pipeline_mode = #tpu.pipeline_mode<synchronous>, transform_indices = @transform_1, window_bounds = array<i64: 4, 1>}, {pipeline_mode = #tpu.pipeline_mode<synchronous>, transform_indices = @transform_2, window_bounds = array<i64: 4, 1>}, {pipeline_mode = #tpu.pipeline_mode<synchronous>, transform_indices = @transform_3, window_bounds = array<i64: 9, 4, 4>}, {pipeline_mode = #tpu.pipeline_mode<synchronous>, transform_indices = @transform_4, window_bounds = array<i64: 4, 64>}, {transform_indices = @transform_5, window_bounds = array<i64: 1, 4, 256>}, {pipeline_mode = #tpu.pipeline_mode<synchronous>, transform_indices = @transform_6, window_bounds = array<i64: 4, 1>}, {pipeline_mode = #tpu.pipeline_mode<synchronous>, transform_indices = @transform_7, window_bounds = array<i64: 4, 1>}]} {
    %c0_i32 = arith.constant 0 : i32
    %0 = arith.cmpi eq, %arg0, %c0_i32 : i32
    %1 = arith.extui %0 : i1 to i32
    %c0_i32_0 = arith.constant 0 : i32
    %2 = arith.cmpi ne, %1, %c0_i32_0 : i32
    scf.if %2 {
      %cst_101 = arith.constant 0.000000e+00 : f32
      %119 = vector.broadcast %cst_101 : f32 to vector<4x1xf32>
      %c0_102 = arith.constant 0 : index
      %c0_103 = arith.constant 0 : index
      %120 = vector.load %arg7[%c0_102, %c0_103] : memref<4x1xf32, #tpu.memory_space<vmem>>, vector<4x1xf32>
      tpu.vector_store %arg7[%c0_102, %c0_103], %119 {strides = array<i32>} : memref<4x1xf32, #tpu.memory_space<vmem>>, vector<4x1xf32>,
      %cst_104 = arith.constant 0.000000e+00 : f32
      %121 = vector.broadcast %cst_104 : f32 to vector<4x1xf32>
      %c0_105 = arith.constant 0 : index
      %c0_106 = arith.constant 0 : index
      %122 = vector.load %arg8[%c0_105, %c0_106] : memref<4x1xf32, #tpu.memory_space<vmem>>, vector<4x1xf32>
      tpu.vector_store %arg8[%c0_105, %c0_106], %121 {strides = array<i32>} : memref<4x1xf32, #tpu.memory_space<vmem>>, vector<4x1xf32>,
    } else {
    }
    %cst = arith.constant 0.000000e+00 : f32
    %3 = vector.broadcast %cst : f32 to vector<4x320xf32>
    %c0 = arith.constant 0 : index
    %c0_1 = arith.constant 0 : index
    %4 = vector.load %arg9[%c0, %c0_1] : memref<4x320xf32, #tpu.memory_space<vmem>>, vector<4x320xf32>
    tpu.vector_store %arg9[%c0, %c0_1], %3 {strides = array<i32>} : memref<4x320xf32, #tpu.memory_space<vmem>>, vector<4x320xf32>,
    %c0_2 = arith.constant 0 : index
    %c0_3 = arith.constant 0 : index
    %c0_4 = arith.constant 0 : index
    %5 = vector.load %arg1[%c0_2, %c0_3, %c0_4] : memref<1x4x64xf32, #tpu.memory_space<vmem>>, vector<1x4x64xf32>
    %6 = vector.shape_cast %5 : vector<1x4x64xf32> to vector<4x64xf32>
    %c0_5 = arith.constant 0 : index
    %c0_6 = arith.constant 0 : index
    %7 = vector.load %arg2[%c0_5, %c0_6] : memref<4x1xf32, #tpu.memory_space<vmem>>, vector<4x1xf32>
    %8 = vector.broadcast %7 : vector<4x1xf32> to vector<4x64xf32>
    %9 = arith.mulf %6, %8 : vector<4x64xf32>
    %c0_7 = arith.constant 0 : index
    %c0_8 = arith.constant 0 : index
    %10 = vector.load %arg3[%c0_7, %c0_8] : memref<4x1xf32, #tpu.memory_space<vmem>>, vector<4x1xf32>
    %11 = vector.broadcast %10 : vector<4x1xf32> to vector<4x64xf32>
    %12 = arith.addf %9, %11 : vector<4x64xf32>
    %13 = math.sin %12 : vector<4x64xf32>
    %c0_9 = arith.constant 0 : index
    %c128 = arith.constant 128 : index
    %14 = vector.load %arg9[%c0_9, %c128] : memref<4x320xf32, #tpu.memory_space<vmem>>, vector<4x64xf32>
    tpu.vector_store %arg9[%c0_9, %c128], %13 {strides = array<i32>} : memref<4x320xf32, #tpu.memory_space<vmem>>, vector<4x64xf32>,
    %c0_10 = arith.constant 0 : index
    %c128_11 = arith.constant 128 : index
    %15 = vector.load %arg9[%c0_10, %c128_11] : memref<4x320xf32, #tpu.memory_space<vmem>>, vector<4x64xf32>
    %c0_12 = arith.constant 0 : index
    %c0_13 = arith.constant 0 : index
    %16 = vector.load %arg5[%c0_12, %c0_13] : memref<4x64xf32, #tpu.memory_space<vmem>>, vector<1x64xf32>
    %17 = vector.broadcast %16 : vector<1x64xf32> to vector<4x64xf32>
    %18 = arith.mulf %15, %17 : vector<4x64xf32>
    %c0_14 = arith.constant 0 : index
    %c129 = arith.constant 129 : index
    %19 = vector.load %arg9[%c0_14, %c129] : memref<4x320xf32, #tpu.memory_space<vmem>>, vector<4x64xf32>
    %c1 = arith.constant 1 : index
    %c0_15 = arith.constant 0 : index
    %20 = vector.load %arg5[%c1, %c0_15] : memref<4x64xf32, #tpu.memory_space<vmem>>, vector<1x64xf32>
    %21 = vector.broadcast %20 : vector<1x64xf32> to vector<4x64xf32>
    %22 = arith.mulf %19, %21 : vector<4x64xf32>
    %c0_16 = arith.constant 0 : index
    %c136 = arith.constant 136 : index
    %23 = vector.load %arg9[%c0_16, %c136] : memref<4x320xf32, #tpu.memory_space<vmem>>, vector<4x64xf32>
    %c2 = arith.constant 2 : index
    %c0_17 = arith.constant 0 : index
    %24 = vector.load %arg5[%c2, %c0_17] : memref<4x64xf32, #tpu.memory_space<vmem>>, vector<1x64xf32>
    %25 = vector.broadcast %24 : vector<1x64xf32> to vector<4x64xf32>
    %26 = arith.mulf %23, %25 : vector<4x64xf32>
    %c0_18 = arith.constant 0 : index
    %c137 = arith.constant 137 : index
    %27 = vector.load %arg9[%c0_18, %c137] : memref<4x320xf32, #tpu.memory_space<vmem>>, vector<4x64xf32>
    %c3 = arith.constant 3 : index
    %c0_19 = arith.constant 0 : index
    %28 = vector.load %arg5[%c3, %c0_19] : memref<4x64xf32, #tpu.memory_space<vmem>>, vector<1x64xf32>
    %29 = vector.broadcast %28 : vector<1x64xf32> to vector<4x64xf32>
    %30 = arith.mulf %27, %29 : vector<4x64xf32>
    %c0_20 = arith.constant 0 : index
    %c0_21 = arith.constant 0 : index
    %c0_22 = arith.constant 0 : index
    %31 = vector.load %arg4[%c0_20, %c0_21, %c0_22] : memref<9x4x4xf32, #tpu.memory_space<vmem>>, vector<1x4x4xf32>
    %32 = vector.shape_cast %31 : vector<1x4x4xf32> to vector<4x4xf32>
    %cst_23 = arith.constant dense<0.000000e+00> : vector<4x64xf32>
    %33 = tpu.matmul %32, %18, %cst_23 {dimension_numbers = #tpu.dot_dimension_numbers<[1], [0], [0], [1], [0, 0, 1, 1], [], []>} : vector<4x4xf32>, vector<4x64xf32>, vector<4x64xf32> -> vector<4x64xf32>
    %c1_24 = arith.constant 1 : index
    %c0_25 = arith.constant 0 : index
    %c0_26 = arith.constant 0 : index
    %34 = vector.load %arg4[%c1_24, %c0_25, %c0_26] : memref<9x4x4xf32, #tpu.memory_space<vmem>>, vector<1x4x4xf32>
    %35 = vector.shape_cast %34 : vector<1x4x4xf32> to vector<4x4xf32>
    %cst_27 = arith.constant dense<0.000000e+00> : vector<4x64xf32>
    %36 = tpu.matmul %35, %22, %cst_27 {dimension_numbers = #tpu.dot_dimension_numbers<[1], [0], [0], [1], [0, 0, 1, 1], [], []>} : vector<4x4xf32>, vector<4x64xf32>, vector<4x64xf32> -> vector<4x64xf32>
    %c2_28 = arith.constant 2 : index
    %c0_29 = arith.constant 0 : index
    %c0_30 = arith.constant 0 : index
    %37 = vector.load %arg4[%c2_28, %c0_29, %c0_30] : memref<9x4x4xf32, #tpu.memory_space<vmem>>, vector<1x4x4xf32>
    %38 = vector.shape_cast %37 : vector<1x4x4xf32> to vector<4x4xf32>
    %cst_31 = arith.constant dense<0.000000e+00> : vector<4x64xf32>
    %39 = tpu.matmul %38, %18, %cst_31 {dimension_numbers = #tpu.dot_dimension_numbers<[1], [0], [0], [1], [0, 0, 1, 1], [], []>} : vector<4x4xf32>, vector<4x64xf32>, vector<4x64xf32> -> vector<4x64xf32>
    %40 = arith.addf %36, %39 : vector<4x64xf32>
    %c3_32 = arith.constant 3 : index
    %c0_33 = arith.constant 0 : index
    %c0_34 = arith.constant 0 : index
    %41 = vector.load %arg4[%c3_32, %c0_33, %c0_34] : memref<9x4x4xf32, #tpu.memory_space<vmem>>, vector<1x4x4xf32>
    %42 = vector.shape_cast %41 : vector<1x4x4xf32> to vector<4x4xf32>
    %cst_35 = arith.constant dense<0.000000e+00> : vector<4x64xf32>
    %43 = tpu.matmul %42, %26, %cst_35 {dimension_numbers = #tpu.dot_dimension_numbers<[1], [0], [0], [1], [0, 0, 1, 1], [], []>} : vector<4x4xf32>, vector<4x64xf32>, vector<4x64xf32> -> vector<4x64xf32>
    %c4 = arith.constant 4 : index
    %c0_36 = arith.constant 0 : index
    %c0_37 = arith.constant 0 : index
    %44 = vector.load %arg4[%c4, %c0_36, %c0_37] : memref<9x4x4xf32, #tpu.memory_space<vmem>>, vector<1x4x4xf32>
    %45 = vector.shape_cast %44 : vector<1x4x4xf32> to vector<4x4xf32>
    %cst_38 = arith.constant dense<0.000000e+00> : vector<4x64xf32>
    %46 = tpu.matmul %45, %18, %cst_38 {dimension_numbers = #tpu.dot_dimension_numbers<[1], [0], [0], [1], [0, 0, 1, 1], [], []>} : vector<4x4xf32>, vector<4x64xf32>, vector<4x64xf32> -> vector<4x64xf32>
    %47 = arith.addf %43, %46 : vector<4x64xf32>
    %c5 = arith.constant 5 : index
    %c0_39 = arith.constant 0 : index
    %c0_40 = arith.constant 0 : index
    %48 = vector.load %arg4[%c5, %c0_39, %c0_40] : memref<9x4x4xf32, #tpu.memory_space<vmem>>, vector<1x4x4xf32>
    %49 = vector.shape_cast %48 : vector<1x4x4xf32> to vector<4x4xf32>
    %cst_41 = arith.constant dense<0.000000e+00> : vector<4x64xf32>
    %50 = tpu.matmul %49, %30, %cst_41 {dimension_numbers = #tpu.dot_dimension_numbers<[1], [0], [0], [1], [0, 0, 1, 1], [], []>} : vector<4x4xf32>, vector<4x64xf32>, vector<4x64xf32> -> vector<4x64xf32>
    %c6 = arith.constant 6 : index
    %c0_42 = arith.constant 0 : index
    %c0_43 = arith.constant 0 : index
    %51 = vector.load %arg4[%c6, %c0_42, %c0_43] : memref<9x4x4xf32, #tpu.memory_space<vmem>>, vector<1x4x4xf32>
    %52 = vector.shape_cast %51 : vector<1x4x4xf32> to vector<4x4xf32>
    %cst_44 = arith.constant dense<0.000000e+00> : vector<4x64xf32>
    %53 = tpu.matmul %52, %26, %cst_44 {dimension_numbers = #tpu.dot_dimension_numbers<[1], [0], [0], [1], [0, 0, 1, 1], [], []>} : vector<4x4xf32>, vector<4x64xf32>, vector<4x64xf32> -> vector<4x64xf32>
    %54 = arith.addf %50, %53 : vector<4x64xf32>
    %c7 = arith.constant 7 : index
    %c0_45 = arith.constant 0 : index
    %c0_46 = arith.constant 0 : index
    %55 = vector.load %arg4[%c7, %c0_45, %c0_46] : memref<9x4x4xf32, #tpu.memory_space<vmem>>, vector<1x4x4xf32>
    %56 = vector.shape_cast %55 : vector<1x4x4xf32> to vector<4x4xf32>
    %cst_47 = arith.constant dense<0.000000e+00> : vector<4x64xf32>
    %57 = tpu.matmul %56, %22, %cst_47 {dimension_numbers = #tpu.dot_dimension_numbers<[1], [0], [0], [1], [0, 0, 1, 1], [], []>} : vector<4x4xf32>, vector<4x64xf32>, vector<4x64xf32> -> vector<4x64xf32>
    %58 = arith.addf %54, %57 : vector<4x64xf32>
    %c8 = arith.constant 8 : index
    %c0_48 = arith.constant 0 : index
    %c0_49 = arith.constant 0 : index
    %59 = vector.load %arg4[%c8, %c0_48, %c0_49] : memref<9x4x4xf32, #tpu.memory_space<vmem>>, vector<1x4x4xf32>
    %60 = vector.shape_cast %59 : vector<1x4x4xf32> to vector<4x4xf32>
    %cst_50 = arith.constant dense<0.000000e+00> : vector<4x64xf32>
    %61 = tpu.matmul %60, %18, %cst_50 {dimension_numbers = #tpu.dot_dimension_numbers<[1], [0], [0], [1], [0, 0, 1, 1], [], []>} : vector<4x4xf32>, vector<4x64xf32>, vector<4x64xf32> -> vector<4x64xf32>
    %62 = arith.addf %58, %61 : vector<4x64xf32>
    %c0_51 = arith.constant 0 : index
    %c0_52 = arith.constant 0 : index
    %c0_53 = arith.constant 0 : index
    %63 = vector.load %arg6[%c0_51, %c0_52, %c0_53] : memref<1x4x256xf32, #tpu.memory_space<vmem>>, vector<1x4x64xf32>
    %64 = vector.shape_cast %63 : vector<1x4x64xf32> to vector<4x64xf32>
    %65 = vector.shape_cast %33 : vector<4x64xf32> to vector<1x4x64xf32>
    tpu.vector_store %arg6[%c0_51, %c0_52, %c0_53], %65 {strides = array<i32>} : memref<1x4x256xf32, #tpu.memory_space<vmem>>, vector<1x4x64xf32>,
    %c0_54 = arith.constant 0 : index
    %c0_55 = arith.constant 0 : index
    %66 = vector.load %arg7[%c0_54, %c0_55] : memref<4x1xf32, #tpu.memory_space<vmem>>, vector<4x1xf32>
    %cst_56 = arith.constant dense<0.000000e+00> : vector<4xf32>
    %67 = vector.multi_reduction <add>, %33, %cst_56 [1] : vector<4x64xf32> to vector<4xf32>
    %68 = vector.shape_cast %67 : vector<4xf32> to vector<4x1xf32>
    %69 = arith.addf %66, %68 : vector<4x1xf32>
    %c0_57 = arith.constant 0 : index
    %c0_58 = arith.constant 0 : index
    %70 = vector.load %arg7[%c0_57, %c0_58] : memref<4x1xf32, #tpu.memory_space<vmem>>, vector<4x1xf32>
    tpu.vector_store %arg7[%c0_57, %c0_58], %69 {strides = array<i32>} : memref<4x1xf32, #tpu.memory_space<vmem>>, vector<4x1xf32>,
    %c0_59 = arith.constant 0 : index
    %c0_60 = arith.constant 0 : index
    %71 = vector.load %arg8[%c0_59, %c0_60] : memref<4x1xf32, #tpu.memory_space<vmem>>, vector<4x1xf32>
    %72 = arith.mulf %33, %33 : vector<4x64xf32>
    %cst_61 = arith.constant dense<0.000000e+00> : vector<4xf32>
    %73 = vector.multi_reduction <add>, %72, %cst_61 [1] : vector<4x64xf32> to vector<4xf32>
    %74 = vector.shape_cast %73 : vector<4xf32> to vector<4x1xf32>
    %75 = arith.addf %71, %74 : vector<4x1xf32>
    %c0_62 = arith.constant 0 : index
    %c0_63 = arith.constant 0 : index
    %76 = vector.load %arg8[%c0_62, %c0_63] : memref<4x1xf32, #tpu.memory_space<vmem>>, vector<4x1xf32>
    tpu.vector_store %arg8[%c0_62, %c0_63], %75 {strides = array<i32>} : memref<4x1xf32, #tpu.memory_space<vmem>>, vector<4x1xf32>,
    %c0_64 = arith.constant 0 : index
    %c0_65 = arith.constant 0 : index
    %c64 = arith.constant 64 : index
    %77 = vector.load %arg6[%c0_64, %c0_65, %c64] : memref<1x4x256xf32, #tpu.memory_space<vmem>>, vector<1x4x64xf32>
    %78 = vector.shape_cast %77 : vector<1x4x64xf32> to vector<4x64xf32>
    %79 = vector.shape_cast %40 : vector<4x64xf32> to vector<1x4x64xf32>
    tpu.vector_store %arg6[%c0_64, %c0_65, %c64], %79 {strides = array<i32>} : memref<1x4x256xf32, #tpu.memory_space<vmem>>, vector<1x4x64xf32>,
    %c0_66 = arith.constant 0 : index
    %c0_67 = arith.constant 0 : index
    %80 = vector.load %arg7[%c0_66, %c0_67] : memref<4x1xf32, #tpu.memory_space<vmem>>, vector<4x1xf32>
    %cst_68 = arith.constant dense<0.000000e+00> : vector<4xf32>
    %81 = vector.multi_reduction <add>, %40, %cst_68 [1] : vector<4x64xf32> to vector<4xf32>
    %82 = vector.shape_cast %81 : vector<4xf32> to vector<4x1xf32>
    %83 = arith.addf %80, %82 : vector<4x1xf32>
    %c0_69 = arith.constant 0 : index
    %c0_70 = arith.constant 0 : index
    %84 = vector.load %arg7[%c0_69, %c0_70] : memref<4x1xf32, #tpu.memory_space<vmem>>, vector<4x1xf32>
    tpu.vector_store %arg7[%c0_69, %c0_70], %83 {strides = array<i32>} : memref<4x1xf32, #tpu.memory_space<vmem>>, vector<4x1xf32>,
    %c0_71 = arith.constant 0 : index
    %c0_72 = arith.constant 0 : index
    %85 = vector.load %arg8[%c0_71, %c0_72] : memref<4x1xf32, #tpu.memory_space<vmem>>, vector<4x1xf32>
    %86 = arith.mulf %40, %40 : vector<4x64xf32>
    %cst_73 = arith.constant dense<0.000000e+00> : vector<4xf32>
    %87 = vector.multi_reduction <add>, %86, %cst_73 [1] : vector<4x64xf32> to vector<4xf32>
    %88 = vector.shape_cast %87 : vector<4xf32> to vector<4x1xf32>
    %89 = arith.addf %85, %88 : vector<4x1xf32>
    %c0_74 = arith.constant 0 : index
    %c0_75 = arith.constant 0 : index
    %90 = vector.load %arg8[%c0_74, %c0_75] : memref<4x1xf32, #tpu.memory_space<vmem>>, vector<4x1xf32>
    tpu.vector_store %arg8[%c0_74, %c0_75], %89 {strides = array<i32>} : memref<4x1xf32, #tpu.memory_space<vmem>>, vector<4x1xf32>,
    %c0_76 = arith.constant 0 : index
    %c0_77 = arith.constant 0 : index
    %c128_78 = arith.constant 128 : index
    %91 = vector.load %arg6[%c0_76, %c0_77, %c128_78] : memref<1x4x256xf32, #tpu.memory_space<vmem>>, vector<1x4x64xf32>
    %92 = vector.shape_cast %91 : vector<1x4x64xf32> to vector<4x64xf32>
    %93 = vector.shape_cast %47 : vector<4x64xf32> to vector<1x4x64xf32>
    tpu.vector_store %arg6[%c0_76, %c0_77, %c128_78], %93 {strides = array<i32>} : memref<1x4x256xf32, #tpu.memory_space<vmem>>, vector<1x4x64xf32>,
    %c0_79 = arith.constant 0 : index
    %c0_80 = arith.constant 0 : index
    %94 = vector.load %arg7[%c0_79, %c0_80] : memref<4x1xf32, #tpu.memory_space<vmem>>, vector<4x1xf32>
    %cst_81 = arith.constant dense<0.000000e+00> : vector<4xf32>
    %95 = vector.multi_reduction <add>, %47, %cst_81 [1] : vector<4x64xf32> to vector<4xf32>
    %96 = vector.shape_cast %95 : vector<4xf32> to vector<4x1xf32>
    %97 = arith.addf %94, %96 : vector<4x1xf32>
    %c0_82 = arith.constant 0 : index
    %c0_83 = arith.constant 0 : index
    %98 = vector.load %arg7[%c0_82, %c0_83] : memref<4x1xf32, #tpu.memory_space<vmem>>, vector<4x1xf32>
    tpu.vector_store %arg7[%c0_82, %c0_83], %97 {strides = array<i32>} : memref<4x1xf32, #tpu.memory_space<vmem>>, vector<4x1xf32>,
    %c0_84 = arith.constant 0 : index
    %c0_85 = arith.constant 0 : index
    %99 = vector.load %arg8[%c0_84, %c0_85] : memref<4x1xf32, #tpu.memory_space<vmem>>, vector<4x1xf32>
    %100 = arith.mulf %47, %47 : vector<4x64xf32>
    %cst_86 = arith.constant dense<0.000000e+00> : vector<4xf32>
    %101 = vector.multi_reduction <add>, %100, %cst_86 [1] : vector<4x64xf32> to vector<4xf32>
    %102 = vector.shape_cast %101 : vector<4xf32> to vector<4x1xf32>
    %103 = arith.addf %99, %102 : vector<4x1xf32>
    %c0_87 = arith.constant 0 : index
    %c0_88 = arith.constant 0 : index
    %104 = vector.load %arg8[%c0_87, %c0_88] : memref<4x1xf32, #tpu.memory_space<vmem>>, vector<4x1xf32>
    tpu.vector_store %arg8[%c0_87, %c0_88], %103 {strides = array<i32>} : memref<4x1xf32, #tpu.memory_space<vmem>>, vector<4x1xf32>,
    %c0_89 = arith.constant 0 : index
    %c0_90 = arith.constant 0 : index
    %c192 = arith.constant 192 : index
    %105 = vector.load %arg6[%c0_89, %c0_90, %c192] : memref<1x4x256xf32, #tpu.memory_space<vmem>>, vector<1x4x64xf32>
    %106 = vector.shape_cast %105 : vector<1x4x64xf32> to vector<4x64xf32>
    %107 = vector.shape_cast %62 : vector<4x64xf32> to vector<1x4x64xf32>
    tpu.vector_store %arg6[%c0_89, %c0_90, %c192], %107 {strides = array<i32>} : memref<1x4x256xf32, #tpu.memory_space<vmem>>, vector<1x4x64xf32>,
    %c0_91 = arith.constant 0 : index
    %c0_92 = arith.constant 0 : index
    %108 = vector.load %arg7[%c0_91, %c0_92] : memref<4x1xf32, #tpu.memory_space<vmem>>, vector<4x1xf32>
    %cst_93 = arith.constant dense<0.000000e+00> : vector<4xf32>
    %109 = vector.multi_reduction <add>, %62, %cst_93 [1] : vector<4x64xf32> to vector<4xf32>
    %110 = vector.shape_cast %109 : vector<4xf32> to vector<4x1xf32>
    %111 = arith.addf %108, %110 : vector<4x1xf32>
    %c0_94 = arith.constant 0 : index
    %c0_95 = arith.constant 0 : index
    %112 = vector.load %arg7[%c0_94, %c0_95] : memref<4x1xf32, #tpu.memory_space<vmem>>, vector<4x1xf32>
    tpu.vector_store %arg7[%c0_94, %c0_95], %111 {strides = array<i32>} : memref<4x1xf32, #tpu.memory_space<vmem>>, vector<4x1xf32>,
    %c0_96 = arith.constant 0 : index
    %c0_97 = arith.constant 0 : index
    %113 = vector.load %arg8[%c0_96, %c0_97] : memref<4x1xf32, #tpu.memory_space<vmem>>, vector<4x1xf32>
    %114 = arith.mulf %62, %62 : vector<4x64xf32>
    %cst_98 = arith.constant dense<0.000000e+00> : vector<4xf32>
    %115 = vector.multi_reduction <add>, %114, %cst_98 [1] : vector<4x64xf32> to vector<4xf32>
    %116 = vector.shape_cast %115 : vector<4xf32> to vector<4x1xf32>
    %117 = arith.addf %113, %116 : vector<4x1xf32>
    %c0_99 = arith.constant 0 : index
    %c0_100 = arith.constant 0 : index
    %118 = vector.load %arg8[%c0_99, %c0_100] : memref<4x1xf32, #tpu.memory_space<vmem>>, vector<4x1xf32>
    tpu.vector_store %arg8[%c0_99, %c0_100], %117 {strides = array<i32>} : memref<4x1xf32, #tpu.memory_space<vmem>>, vector<4x1xf32>,
    return
  }
  func.func @transform_0(%arg0: i32) -> (i32, i32, i32) {
    %c0_i32 = arith.constant 0 : i32
    %c0_i32_0 = arith.constant 0 : i32
    %c0_i32_1 = arith.constant 0 : i32
    return %arg0, %c0_i32, %c0_i32_0 : i32, i32, i32
  }
  func.func @transform_1(%arg0: i32) -> (i32, i32) {
    %c0_i32 = arith.constant 0 : i32
    %c0_i32_0 = arith.constant 0 : i32
    %c0_i32_1 = arith.constant 0 : i32
    return %c0_i32, %c0_i32_0 : i32, i32
  }
  func.func @transform_2(%arg0: i32) -> (i32, i32) {
    %c0_i32 = arith.constant 0 : i32
    %c0_i32_0 = arith.constant 0 : i32
    %c0_i32_1 = arith.constant 0 : i32
    return %c0_i32, %c0_i32_0 : i32, i32
  }
  func.func @transform_3(%arg0: i32) -> (i32, i32, i32) {
    %c0_i32 = arith.constant 0 : i32
    %c0_i32_0 = arith.constant 0 : i32
    %c0_i32_1 = arith.constant 0 : i32
    %c0_i32_2 = arith.constant 0 : i32
    return %c0_i32, %c0_i32_0, %c0_i32_1 : i32, i32, i32
  }
  func.func @transform_4(%arg0: i32) -> (i32, i32) {
    %c0_i32 = arith.constant 0 : i32
    %c0_i32_0 = arith.constant 0 : i32
    %c0_i32_1 = arith.constant 0 : i32
    return %c0_i32, %c0_i32_0 : i32, i32
  }
  func.func @transform_5(%arg0: i32) -> (i32, i32, i32) {
    %c0_i32 = arith.constant 0 : i32
    %c0_i32_0 = arith.constant 0 : i32
    %c0_i32_1 = arith.constant 0 : i32
    return %arg0, %c0_i32, %c0_i32_0 : i32, i32, i32
  }
  func.func @transform_6(%arg0: i32) -> (i32, i32) {
    %c0_i32 = arith.constant 0 : i32
    %c0_i32_0 = arith.constant 0 : i32
    %c0_i32_1 = arith.constant 0 : i32
    return %c0_i32, %c0_i32_0 : i32, i32
  }
  func.func @transform_7(%arg0: i32) -> (i32, i32) {
    %c0_i32 = arith.constant 0 : i32
    %c0_i32_0 = arith.constant 0 : i32
    %c0_i32_1 = arith.constant 0 : i32
    return %c0_i32, %c0_i32_0 : i32, i32
  }
}

module attributes {stable_mosaic.version = 11 : i64} {
  func.func @_mm_stats_kernel(%arg0: i32, %arg1: i32, %arg2: memref<1x8x64xf32, #tpu.memory_space<vmem>>, %arg3: memref<16x8xf32, #tpu.memory_space<vmem>>, %arg4: memref<1x16x64xf32, #tpu.memory_space<vmem>>, %arg5: memref<16x1xf32, #tpu.memory_space<vmem>>, %arg6: memref<16x1xf32, #tpu.memory_space<vmem>>) attributes {dimension_semantics = [#tpu.dimension_semantics<arbitrary>, #tpu.dimension_semantics<arbitrary>], iteration_bounds = array<i64: 2, 1>, scalar_prefetch = 0 : i64, scratch_operands = 0 : i64, tpu.core_type = #tpu.core_type<tc>, window_params = [{transform_indices = @transform_0, window_bounds = array<i64: 1, 8, 64>}, {pipeline_mode = #tpu.pipeline_mode<synchronous>, transform_indices = @transform_1, window_bounds = array<i64: 16, 8>}, {transform_indices = @transform_2, window_bounds = array<i64: 1, 16, 64>}, {pipeline_mode = #tpu.pipeline_mode<synchronous>, transform_indices = @transform_3, window_bounds = array<i64: 16, 1>}, {pipeline_mode = #tpu.pipeline_mode<synchronous>, transform_indices = @transform_4, window_bounds = array<i64: 16, 1>}]} {
    %c0_i32 = arith.constant 0 : i32
    %0 = arith.cmpi eq, %arg0, %c0_i32 : i32
    %c0_i32_0 = arith.constant 0 : i32
    %1 = arith.cmpi eq, %arg1, %c0_i32_0 : i32
    %2 = arith.andi %0, %1 : i1
    %3 = arith.extui %2 : i1 to i32
    %c0_i32_1 = arith.constant 0 : i32
    %4 = arith.cmpi ne, %3, %c0_i32_1 : i32
    scf.if %4 {
      %cst_19 = arith.constant 0.000000e+00 : f32
      %23 = vector.broadcast %cst_19 : f32 to vector<16x1xf32>
      %c0_20 = arith.constant 0 : index
      %c0_21 = arith.constant 0 : index
      %24 = vector.load %arg5[%c0_20, %c0_21] : memref<16x1xf32, #tpu.memory_space<vmem>>, vector<16x1xf32>
      tpu.vector_store %arg5[%c0_20, %c0_21], %23 {strides = array<i32>} : memref<16x1xf32, #tpu.memory_space<vmem>>, vector<16x1xf32>,
      %cst_22 = arith.constant 0.000000e+00 : f32
      %25 = vector.broadcast %cst_22 : f32 to vector<16x1xf32>
      %c0_23 = arith.constant 0 : index
      %c0_24 = arith.constant 0 : index
      %26 = vector.load %arg6[%c0_23, %c0_24] : memref<16x1xf32, #tpu.memory_space<vmem>>, vector<16x1xf32>
      tpu.vector_store %arg6[%c0_23, %c0_24], %25 {strides = array<i32>} : memref<16x1xf32, #tpu.memory_space<vmem>>, vector<16x1xf32>,
    } else {
    }
    %c0 = arith.constant 0 : index
    %c0_2 = arith.constant 0 : index
    %5 = vector.load %arg3[%c0, %c0_2] : memref<16x8xf32, #tpu.memory_space<vmem>>, vector<16x8xf32>
    %c0_3 = arith.constant 0 : index
    %c0_4 = arith.constant 0 : index
    %c0_5 = arith.constant 0 : index
    %6 = vector.load %arg2[%c0_3, %c0_4, %c0_5] : memref<1x8x64xf32, #tpu.memory_space<vmem>>, vector<1x8x64xf32>
    %7 = vector.shape_cast %6 : vector<1x8x64xf32> to vector<8x64xf32>
    %cst = arith.constant dense<0.000000e+00> : vector<16x64xf32>
    %8 = tpu.matmul %5, %7, %cst {dimension_numbers = #tpu.dot_dimension_numbers<[1], [0], [0], [1], [0, 0, 1, 1], [], []>} : vector<16x8xf32>, vector<8x64xf32>, vector<16x64xf32> -> vector<16x64xf32>
    %c0_6 = arith.constant 0 : index
    %c0_7 = arith.constant 0 : index
    %c0_8 = arith.constant 0 : index
    %9 = vector.load %arg4[%c0_6, %c0_7, %c0_8] : memref<1x16x64xf32, #tpu.memory_space<vmem>>, vector<1x16x64xf32>
    %10 = vector.shape_cast %9 : vector<1x16x64xf32> to vector<16x64xf32>
    %11 = vector.shape_cast %8 : vector<16x64xf32> to vector<1x16x64xf32>
    tpu.vector_store %arg4[%c0_6, %c0_7, %c0_8], %11 {strides = array<i32>} : memref<1x16x64xf32, #tpu.memory_space<vmem>>, vector<1x16x64xf32>,
    %c0_9 = arith.constant 0 : index
    %c0_10 = arith.constant 0 : index
    %12 = vector.load %arg5[%c0_9, %c0_10] : memref<16x1xf32, #tpu.memory_space<vmem>>, vector<16x1xf32>
    %cst_11 = arith.constant dense<0.000000e+00> : vector<16xf32>
    %13 = vector.multi_reduction <add>, %8, %cst_11 [1] : vector<16x64xf32> to vector<16xf32>
    %14 = vector.shape_cast %13 : vector<16xf32> to vector<16x1xf32>
    %15 = arith.addf %12, %14 : vector<16x1xf32>
    %c0_12 = arith.constant 0 : index
    %c0_13 = arith.constant 0 : index
    %16 = vector.load %arg5[%c0_12, %c0_13] : memref<16x1xf32, #tpu.memory_space<vmem>>, vector<16x1xf32>
    tpu.vector_store %arg5[%c0_12, %c0_13], %15 {strides = array<i32>} : memref<16x1xf32, #tpu.memory_space<vmem>>, vector<16x1xf32>,
    %c0_14 = arith.constant 0 : index
    %c0_15 = arith.constant 0 : index
    %17 = vector.load %arg6[%c0_14, %c0_15] : memref<16x1xf32, #tpu.memory_space<vmem>>, vector<16x1xf32>
    %18 = arith.mulf %8, %8 : vector<16x64xf32>
    %cst_16 = arith.constant dense<0.000000e+00> : vector<16xf32>
    %19 = vector.multi_reduction <add>, %18, %cst_16 [1] : vector<16x64xf32> to vector<16xf32>
    %20 = vector.shape_cast %19 : vector<16xf32> to vector<16x1xf32>
    %21 = arith.addf %17, %20 : vector<16x1xf32>
    %c0_17 = arith.constant 0 : index
    %c0_18 = arith.constant 0 : index
    %22 = vector.load %arg6[%c0_17, %c0_18] : memref<16x1xf32, #tpu.memory_space<vmem>>, vector<16x1xf32>
    tpu.vector_store %arg6[%c0_17, %c0_18], %21 {strides = array<i32>} : memref<16x1xf32, #tpu.memory_space<vmem>>, vector<16x1xf32>,
    return
  }
  func.func @transform_0(%arg0: i32, %arg1: i32) -> (i32, i32, i32) {
    %c0_i32 = arith.constant 0 : i32
    %c0_i32_0 = arith.constant 0 : i32
    return %arg0, %c0_i32, %arg1 : i32, i32, i32
  }
  func.func @transform_1(%arg0: i32, %arg1: i32) -> (i32, i32) {
    %c0_i32 = arith.constant 0 : i32
    %c0_i32_0 = arith.constant 0 : i32
    %c0_i32_1 = arith.constant 0 : i32
    return %c0_i32, %c0_i32_0 : i32, i32
  }
  func.func @transform_2(%arg0: i32, %arg1: i32) -> (i32, i32, i32) {
    %c0_i32 = arith.constant 0 : i32
    %c0_i32_0 = arith.constant 0 : i32
    return %arg0, %c0_i32, %arg1 : i32, i32, i32
  }
  func.func @transform_3(%arg0: i32, %arg1: i32) -> (i32, i32) {
    %c0_i32 = arith.constant 0 : i32
    %c0_i32_0 = arith.constant 0 : i32
    %c0_i32_1 = arith.constant 0 : i32
    return %c0_i32, %c0_i32_0 : i32, i32
  }
  func.func @transform_4(%arg0: i32, %arg1: i32) -> (i32, i32) {
    %c0_i32 = arith.constant 0 : i32
    %c0_i32_0 = arith.constant 0 : i32
    %c0_i32_1 = arith.constant 0 : i32
    return %c0_i32, %c0_i32_0 : i32, i32
  }
}

module attributes {stable_mosaic.version = 11 : i64} {
  func.func @_act_mm_stats_kernel(%arg0: i32, %arg1: i32, %arg2: memref<1x4x256xf32, #tpu.memory_space<vmem>>, %arg3: memref<4x1xf32, #tpu.memory_space<vmem>>, %arg4: memref<4x1xf32, #tpu.memory_space<vmem>>, %arg5: memref<16x4xf32, #tpu.memory_space<vmem>>, %arg6: memref<1x16x256xf32, #tpu.memory_space<vmem>>, %arg7: memref<16x1xf32, #tpu.memory_space<vmem>>, %arg8: memref<16x1xf32, #tpu.memory_space<vmem>>) attributes {dimension_semantics = [#tpu.dimension_semantics<arbitrary>, #tpu.dimension_semantics<arbitrary>], iteration_bounds = array<i64: 2, 1>, scalar_prefetch = 0 : i64, scratch_operands = 0 : i64, tpu.core_type = #tpu.core_type<tc>, window_params = [{transform_indices = @transform_0, window_bounds = array<i64: 1, 4, 256>}, {pipeline_mode = #tpu.pipeline_mode<synchronous>, transform_indices = @transform_1, window_bounds = array<i64: 4, 1>}, {pipeline_mode = #tpu.pipeline_mode<synchronous>, transform_indices = @transform_2, window_bounds = array<i64: 4, 1>}, {pipeline_mode = #tpu.pipeline_mode<synchronous>, transform_indices = @transform_3, window_bounds = array<i64: 16, 4>}, {transform_indices = @transform_4, window_bounds = array<i64: 1, 16, 256>}, {pipeline_mode = #tpu.pipeline_mode<synchronous>, transform_indices = @transform_5, window_bounds = array<i64: 16, 1>}, {pipeline_mode = #tpu.pipeline_mode<synchronous>, transform_indices = @transform_6, window_bounds = array<i64: 16, 1>}]} {
    %c0_i32 = arith.constant 0 : i32
    %0 = arith.cmpi eq, %arg0, %c0_i32 : i32
    %c0_i32_0 = arith.constant 0 : i32
    %1 = arith.cmpi eq, %arg1, %c0_i32_0 : i32
    %2 = arith.andi %0, %1 : i1
    %3 = arith.extui %2 : i1 to i32
    %c0_i32_1 = arith.constant 0 : i32
    %4 = arith.cmpi ne, %3, %c0_i32_1 : i32
    scf.if %4 {
      %cst_23 = arith.constant 0.000000e+00 : f32
      %30 = vector.broadcast %cst_23 : f32 to vector<16x1xf32>
      %c0_24 = arith.constant 0 : index
      %c0_25 = arith.constant 0 : index
      %31 = vector.load %arg7[%c0_24, %c0_25] : memref<16x1xf32, #tpu.memory_space<vmem>>, vector<16x1xf32>
      tpu.vector_store %arg7[%c0_24, %c0_25], %30 {strides = array<i32>} : memref<16x1xf32, #tpu.memory_space<vmem>>, vector<16x1xf32>,
      %cst_26 = arith.constant 0.000000e+00 : f32
      %32 = vector.broadcast %cst_26 : f32 to vector<16x1xf32>
      %c0_27 = arith.constant 0 : index
      %c0_28 = arith.constant 0 : index
      %33 = vector.load %arg8[%c0_27, %c0_28] : memref<16x1xf32, #tpu.memory_space<vmem>>, vector<16x1xf32>
      tpu.vector_store %arg8[%c0_27, %c0_28], %32 {strides = array<i32>} : memref<16x1xf32, #tpu.memory_space<vmem>>, vector<16x1xf32>,
    } else {
    }
    %c0 = arith.constant 0 : index
    %c0_2 = arith.constant 0 : index
    %c0_3 = arith.constant 0 : index
    %5 = vector.load %arg2[%c0, %c0_2, %c0_3] : memref<1x4x256xf32, #tpu.memory_space<vmem>>, vector<1x4x256xf32>
    %6 = vector.shape_cast %5 : vector<1x4x256xf32> to vector<4x256xf32>
    %c0_4 = arith.constant 0 : index
    %c0_5 = arith.constant 0 : index
    %7 = vector.load %arg3[%c0_4, %c0_5] : memref<4x1xf32, #tpu.memory_space<vmem>>, vector<4x1xf32>
    %8 = vector.broadcast %7 : vector<4x1xf32> to vector<4x256xf32>
    %9 = arith.mulf %6, %8 : vector<4x256xf32>
    %c0_6 = arith.constant 0 : index
    %c0_7 = arith.constant 0 : index
    %10 = vector.load %arg4[%c0_6, %c0_7] : memref<4x1xf32, #tpu.memory_space<vmem>>, vector<4x1xf32>
    %11 = vector.broadcast %10 : vector<4x1xf32> to vector<4x256xf32>
    %12 = arith.addf %9, %11 : vector<4x256xf32>
    %13 = math.sin %12 : vector<4x256xf32>
    %c0_8 = arith.constant 0 : index
    %c0_9 = arith.constant 0 : index
    %14 = vector.load %arg5[%c0_8, %c0_9] : memref<16x4xf32, #tpu.memory_space<vmem>>, vector<16x4xf32>
    %cst = arith.constant dense<0.000000e+00> : vector<16x256xf32>
    %15 = tpu.matmul %14, %13, %cst {dimension_numbers = #tpu.dot_dimension_numbers<[1], [0], [0], [1], [0, 0, 1, 1], [], []>} : vector<16x4xf32>, vector<4x256xf32>, vector<16x256xf32> -> vector<16x256xf32>
    %c0_10 = arith.constant 0 : index
    %c0_11 = arith.constant 0 : index
    %c0_12 = arith.constant 0 : index
    %16 = vector.load %arg6[%c0_10, %c0_11, %c0_12] : memref<1x16x256xf32, #tpu.memory_space<vmem>>, vector<1x16x256xf32>
    %17 = vector.shape_cast %16 : vector<1x16x256xf32> to vector<16x256xf32>
    %18 = vector.shape_cast %15 : vector<16x256xf32> to vector<1x16x256xf32>
    tpu.vector_store %arg6[%c0_10, %c0_11, %c0_12], %18 {strides = array<i32>} : memref<1x16x256xf32, #tpu.memory_space<vmem>>, vector<1x16x256xf32>,
    %c0_13 = arith.constant 0 : index
    %c0_14 = arith.constant 0 : index
    %19 = vector.load %arg7[%c0_13, %c0_14] : memref<16x1xf32, #tpu.memory_space<vmem>>, vector<16x1xf32>
    %cst_15 = arith.constant dense<0.000000e+00> : vector<16xf32>
    %20 = vector.multi_reduction <add>, %15, %cst_15 [1] : vector<16x256xf32> to vector<16xf32>
    %21 = vector.shape_cast %20 : vector<16xf32> to vector<16x1xf32>
    %22 = arith.addf %19, %21 : vector<16x1xf32>
    %c0_16 = arith.constant 0 : index
    %c0_17 = arith.constant 0 : index
    %23 = vector.load %arg7[%c0_16, %c0_17] : memref<16x1xf32, #tpu.memory_space<vmem>>, vector<16x1xf32>
    tpu.vector_store %arg7[%c0_16, %c0_17], %22 {strides = array<i32>} : memref<16x1xf32, #tpu.memory_space<vmem>>, vector<16x1xf32>,
    %c0_18 = arith.constant 0 : index
    %c0_19 = arith.constant 0 : index
    %24 = vector.load %arg8[%c0_18, %c0_19] : memref<16x1xf32, #tpu.memory_space<vmem>>, vector<16x1xf32>
    %25 = arith.mulf %15, %15 : vector<16x256xf32>
    %cst_20 = arith.constant dense<0.000000e+00> : vector<16xf32>
    %26 = vector.multi_reduction <add>, %25, %cst_20 [1] : vector<16x256xf32> to vector<16xf32>
    %27 = vector.shape_cast %26 : vector<16xf32> to vector<16x1xf32>
    %28 = arith.addf %24, %27 : vector<16x1xf32>
    %c0_21 = arith.constant 0 : index
    %c0_22 = arith.constant 0 : index
    %29 = vector.load %arg8[%c0_21, %c0_22] : memref<16x1xf32, #tpu.memory_space<vmem>>, vector<16x1xf32>
    tpu.vector_store %arg8[%c0_21, %c0_22], %28 {strides = array<i32>} : memref<16x1xf32, #tpu.memory_space<vmem>>, vector<16x1xf32>,
    return
  }
  func.func @transform_0(%arg0: i32, %arg1: i32) -> (i32, i32, i32) {
    %c0_i32 = arith.constant 0 : i32
    %c0_i32_0 = arith.constant 0 : i32
    return %arg0, %c0_i32, %arg1 : i32, i32, i32
  }
  func.func @transform_1(%arg0: i32, %arg1: i32) -> (i32, i32) {
    %c0_i32 = arith.constant 0 : i32
    %c0_i32_0 = arith.constant 0 : i32
    %c0_i32_1 = arith.constant 0 : i32
    return %c0_i32, %c0_i32_0 : i32, i32
  }
  func.func @transform_2(%arg0: i32, %arg1: i32) -> (i32, i32) {
    %c0_i32 = arith.constant 0 : i32
    %c0_i32_0 = arith.constant 0 : i32
    %c0_i32_1 = arith.constant 0 : i32
    return %c0_i32, %c0_i32_0 : i32, i32
  }
  func.func @transform_3(%arg0: i32, %arg1: i32) -> (i32, i32) {
    %c0_i32 = arith.constant 0 : i32
    %c0_i32_0 = arith.constant 0 : i32
    %c0_i32_1 = arith.constant 0 : i32
    return %c0_i32, %c0_i32_0 : i32, i32
  }
  func.func @transform_4(%arg0: i32, %arg1: i32) -> (i32, i32, i32) {
    %c0_i32 = arith.constant 0 : i32
    %c0_i32_0 = arith.constant 0 : i32
    return %arg0, %c0_i32, %arg1 : i32, i32, i32
  }
  func.func @transform_5(%arg0: i32, %arg1: i32) -> (i32, i32) {
    %c0_i32 = arith.constant 0 : i32
    %c0_i32_0 = arith.constant 0 : i32
    %c0_i32_1 = arith.constant 0 : i32
    return %c0_i32, %c0_i32_0 : i32, i32
  }
  func.func @transform_6(%arg0: i32, %arg1: i32) -> (i32, i32) {
    %c0_i32 = arith.constant 0 : i32
    %c0_i32_0 = arith.constant 0 : i32
    %c0_i32_1 = arith.constant 0 : i32
    return %c0_i32, %c0_i32_0 : i32, i32
  }
}

module attributes {stable_mosaic.version = 11 : i64} {
  func.func @_bn_add_shortcut_kernel(%arg0: i32, %arg1: memref<1x16x256xf32, #tpu.memory_space<vmem>>, %arg2: memref<1x16x64xf32, #tpu.memory_space<vmem>>, %arg3: memref<16x1xf32, #tpu.memory_space<vmem>>, %arg4: memref<16x1xf32, #tpu.memory_space<vmem>>, %arg5: memref<16x1xf32, #tpu.memory_space<vmem>>, %arg6: memref<16x1xf32, #tpu.memory_space<vmem>>, %arg7: memref<1x16x256xf32, #tpu.memory_space<vmem>>) attributes {dimension_semantics = [#tpu.dimension_semantics<parallel>], iteration_bounds = array<i64: 2>, scalar_prefetch = 0 : i64, scratch_operands = 0 : i64, tpu.core_type = #tpu.core_type<tc>, window_params = [{transform_indices = @transform_0, window_bounds = array<i64: 1, 16, 256>}, {transform_indices = @transform_1, window_bounds = array<i64: 1, 16, 64>}, {pipeline_mode = #tpu.pipeline_mode<synchronous>, transform_indices = @transform_2, window_bounds = array<i64: 16, 1>}, {pipeline_mode = #tpu.pipeline_mode<synchronous>, transform_indices = @transform_3, window_bounds = array<i64: 16, 1>}, {pipeline_mode = #tpu.pipeline_mode<synchronous>, transform_indices = @transform_4, window_bounds = array<i64: 16, 1>}, {pipeline_mode = #tpu.pipeline_mode<synchronous>, transform_indices = @transform_5, window_bounds = array<i64: 16, 1>}, {transform_indices = @transform_6, window_bounds = array<i64: 1, 16, 256>}]} {
    %c0 = arith.constant 0 : index
    %c0_0 = arith.constant 0 : index
    %c0_1 = arith.constant 0 : index
    %0 = vector.load %arg1[%c0, %c0_0, %c0_1] : memref<1x16x256xf32, #tpu.memory_space<vmem>>, vector<1x16x256xf32>
    %1 = vector.shape_cast %0 : vector<1x16x256xf32> to vector<16x256xf32>
    %c0_2 = arith.constant 0 : index
    %c0_3 = arith.constant 0 : index
    %2 = vector.load %arg3[%c0_2, %c0_3] : memref<16x1xf32, #tpu.memory_space<vmem>>, vector<16x1xf32>
    %3 = vector.broadcast %2 : vector<16x1xf32> to vector<16x256xf32>
    %4 = arith.mulf %1, %3 : vector<16x256xf32>
    %c0_4 = arith.constant 0 : index
    %c0_5 = arith.constant 0 : index
    %5 = vector.load %arg4[%c0_4, %c0_5] : memref<16x1xf32, #tpu.memory_space<vmem>>, vector<16x1xf32>
    %6 = vector.broadcast %5 : vector<16x1xf32> to vector<16x256xf32>
    %7 = arith.addf %4, %6 : vector<16x256xf32>
    %c0_6 = arith.constant 0 : index
    %c0_7 = arith.constant 0 : index
    %8 = vector.load %arg6[%c0_6, %c0_7] : memref<16x1xf32, #tpu.memory_space<vmem>>, vector<16x1xf32>
    %9 = vector.broadcast %8 : vector<16x1xf32> to vector<16x256xf32>
    %10 = arith.addf %7, %9 : vector<16x256xf32>
    %c0_8 = arith.constant 0 : index
    %c0_9 = arith.constant 0 : index
    %c0_10 = arith.constant 0 : index
    %11 = vector.load %arg7[%c0_8, %c0_9, %c0_10] : memref<1x16x256xf32, #tpu.memory_space<vmem>>, vector<1x16x256xf32>
    %12 = vector.shape_cast %11 : vector<1x16x256xf32> to vector<16x256xf32>
    %13 = vector.shape_cast %10 : vector<16x256xf32> to vector<1x16x256xf32>
    tpu.vector_store %arg7[%c0_8, %c0_9, %c0_10], %13 {strides = array<i32>} : memref<1x16x256xf32, #tpu.memory_space<vmem>>, vector<1x16x256xf32>,
    %14 = vector.extract_strided_slice %10 {offsets = [0, 0], sizes = [16, 64], strides = [1, 1]} : vector<16x256xf32> to vector<16x64xf32>
    %c0_11 = arith.constant 0 : index
    %c0_12 = arith.constant 0 : index
    %c0_13 = arith.constant 0 : index
    %15 = vector.load %arg2[%c0_11, %c0_12, %c0_13] : memref<1x16x64xf32, #tpu.memory_space<vmem>>, vector<1x16x64xf32>
    %16 = vector.shape_cast %15 : vector<1x16x64xf32> to vector<16x64xf32>
    %c0_14 = arith.constant 0 : index
    %c0_15 = arith.constant 0 : index
    %17 = vector.load %arg5[%c0_14, %c0_15] : memref<16x1xf32, #tpu.memory_space<vmem>>, vector<16x1xf32>
    %18 = vector.broadcast %17 : vector<16x1xf32> to vector<16x64xf32>
    %19 = arith.mulf %16, %18 : vector<16x64xf32>
    %20 = arith.addf %14, %19 : vector<16x64xf32>
    %c0_16 = arith.constant 0 : index
    %c0_17 = arith.constant 0 : index
    %c0_18 = arith.constant 0 : index
    %21 = vector.load %arg7[%c0_16, %c0_17, %c0_18] : memref<1x16x256xf32, #tpu.memory_space<vmem>>, vector<1x16x64xf32>
    %22 = vector.shape_cast %21 : vector<1x16x64xf32> to vector<16x64xf32>
    %23 = vector.shape_cast %20 : vector<16x64xf32> to vector<1x16x64xf32>
    tpu.vector_store %arg7[%c0_16, %c0_17, %c0_18], %23 {strides = array<i32>} : memref<1x16x256xf32, #tpu.memory_space<vmem>>, vector<1x16x64xf32>,
    return
  }
  func.func @transform_0(%arg0: i32) -> (i32, i32, i32) {
    %c0_i32 = arith.constant 0 : i32
    %c0_i32_0 = arith.constant 0 : i32
    %c0_i32_1 = arith.constant 0 : i32
    return %arg0, %c0_i32, %c0_i32_0 : i32, i32, i32
  }
  func.func @transform_1(%arg0: i32) -> (i32, i32, i32) {
    %c0_i32 = arith.constant 0 : i32
    %c0_i32_0 = arith.constant 0 : i32
    %c0_i32_1 = arith.constant 0 : i32
    return %arg0, %c0_i32, %c0_i32_0 : i32, i32, i32
  }
  func.func @transform_2(%arg0: i32) -> (i32, i32) {
    %c0_i32 = arith.constant 0 : i32
    %c0_i32_0 = arith.constant 0 : i32
    %c0_i32_1 = arith.constant 0 : i32
    return %c0_i32, %c0_i32_0 : i32, i32
  }
  func.func @transform_3(%arg0: i32) -> (i32, i32) {
    %c0_i32 = arith.constant 0 : i32
    %c0_i32_0 = arith.constant 0 : i32
    %c0_i32_1 = arith.constant 0 : i32
    return %c0_i32, %c0_i32_0 : i32, i32
  }
  func.func @transform_4(%arg0: i32) -> (i32, i32) {
    %c0_i32 = arith.constant 0 : i32
    %c0_i32_0 = arith.constant 0 : i32
    %c0_i32_1 = arith.constant 0 : i32
    return %c0_i32, %c0_i32_0 : i32, i32
  }
  func.func @transform_5(%arg0: i32) -> (i32, i32) {
    %c0_i32 = arith.constant 0 : i32
    %c0_i32_0 = arith.constant 0 : i32
    %c0_i32_1 = arith.constant 0 : i32
    return %c0_i32, %c0_i32_0 : i32, i32
  }
  func.func @transform_6(%arg0: i32) -> (i32, i32, i32) {
    %c0_i32 = arith.constant 0 : i32
    %c0_i32_0 = arith.constant 0 : i32
    %c0_i32_1 = arith.constant 0 : i32
    return %arg0, %c0_i32, %c0_i32_0 : i32, i32, i32
  }
}

module attributes {stable_mosaic.version = 11 : i64} {
  func.func @_mm_stats_kernel(%arg0: i32, %arg1: i32, %arg2: memref<1x16x256xf32, #tpu.memory_space<vmem>>, %arg3: memref<4x16xf32, #tpu.memory_space<vmem>>, %arg4: memref<1x4x256xf32, #tpu.memory_space<vmem>>, %arg5: memref<4x1xf32, #tpu.memory_space<vmem>>, %arg6: memref<4x1xf32, #tpu.memory_space<vmem>>) attributes {dimension_semantics = [#tpu.dimension_semantics<arbitrary>, #tpu.dimension_semantics<arbitrary>], iteration_bounds = array<i64: 2, 1>, scalar_prefetch = 0 : i64, scratch_operands = 0 : i64, tpu.core_type = #tpu.core_type<tc>, window_params = [{transform_indices = @transform_0, window_bounds = array<i64: 1, 16, 256>}, {pipeline_mode = #tpu.pipeline_mode<synchronous>, transform_indices = @transform_1, window_bounds = array<i64: 4, 16>}, {transform_indices = @transform_2, window_bounds = array<i64: 1, 4, 256>}, {pipeline_mode = #tpu.pipeline_mode<synchronous>, transform_indices = @transform_3, window_bounds = array<i64: 4, 1>}, {pipeline_mode = #tpu.pipeline_mode<synchronous>, transform_indices = @transform_4, window_bounds = array<i64: 4, 1>}]} {
    %c0_i32 = arith.constant 0 : i32
    %0 = arith.cmpi eq, %arg0, %c0_i32 : i32
    %c0_i32_0 = arith.constant 0 : i32
    %1 = arith.cmpi eq, %arg1, %c0_i32_0 : i32
    %2 = arith.andi %0, %1 : i1
    %3 = arith.extui %2 : i1 to i32
    %c0_i32_1 = arith.constant 0 : i32
    %4 = arith.cmpi ne, %3, %c0_i32_1 : i32
    scf.if %4 {
      %cst_19 = arith.constant 0.000000e+00 : f32
      %23 = vector.broadcast %cst_19 : f32 to vector<4x1xf32>
      %c0_20 = arith.constant 0 : index
      %c0_21 = arith.constant 0 : index
      %24 = vector.load %arg5[%c0_20, %c0_21] : memref<4x1xf32, #tpu.memory_space<vmem>>, vector<4x1xf32>
      tpu.vector_store %arg5[%c0_20, %c0_21], %23 {strides = array<i32>} : memref<4x1xf32, #tpu.memory_space<vmem>>, vector<4x1xf32>,
      %cst_22 = arith.constant 0.000000e+00 : f32
      %25 = vector.broadcast %cst_22 : f32 to vector<4x1xf32>
      %c0_23 = arith.constant 0 : index
      %c0_24 = arith.constant 0 : index
      %26 = vector.load %arg6[%c0_23, %c0_24] : memref<4x1xf32, #tpu.memory_space<vmem>>, vector<4x1xf32>
      tpu.vector_store %arg6[%c0_23, %c0_24], %25 {strides = array<i32>} : memref<4x1xf32, #tpu.memory_space<vmem>>, vector<4x1xf32>,
    } else {
    }
    %c0 = arith.constant 0 : index
    %c0_2 = arith.constant 0 : index
    %5 = vector.load %arg3[%c0, %c0_2] : memref<4x16xf32, #tpu.memory_space<vmem>>, vector<4x16xf32>
    %c0_3 = arith.constant 0 : index
    %c0_4 = arith.constant 0 : index
    %c0_5 = arith.constant 0 : index
    %6 = vector.load %arg2[%c0_3, %c0_4, %c0_5] : memref<1x16x256xf32, #tpu.memory_space<vmem>>, vector<1x16x256xf32>
    %7 = vector.shape_cast %6 : vector<1x16x256xf32> to vector<16x256xf32>
    %cst = arith.constant dense<0.000000e+00> : vector<4x256xf32>
    %8 = tpu.matmul %5, %7, %cst {dimension_numbers = #tpu.dot_dimension_numbers<[1], [0], [0], [1], [0, 0, 1, 1], [], []>} : vector<4x16xf32>, vector<16x256xf32>, vector<4x256xf32> -> vector<4x256xf32>
    %c0_6 = arith.constant 0 : index
    %c0_7 = arith.constant 0 : index
    %c0_8 = arith.constant 0 : index
    %9 = vector.load %arg4[%c0_6, %c0_7, %c0_8] : memref<1x4x256xf32, #tpu.memory_space<vmem>>, vector<1x4x256xf32>
    %10 = vector.shape_cast %9 : vector<1x4x256xf32> to vector<4x256xf32>
    %11 = vector.shape_cast %8 : vector<4x256xf32> to vector<1x4x256xf32>
    tpu.vector_store %arg4[%c0_6, %c0_7, %c0_8], %11 {strides = array<i32>} : memref<1x4x256xf32, #tpu.memory_space<vmem>>, vector<1x4x256xf32>,
    %c0_9 = arith.constant 0 : index
    %c0_10 = arith.constant 0 : index
    %12 = vector.load %arg5[%c0_9, %c0_10] : memref<4x1xf32, #tpu.memory_space<vmem>>, vector<4x1xf32>
    %cst_11 = arith.constant dense<0.000000e+00> : vector<4xf32>
    %13 = vector.multi_reduction <add>, %8, %cst_11 [1] : vector<4x256xf32> to vector<4xf32>
    %14 = vector.shape_cast %13 : vector<4xf32> to vector<4x1xf32>
    %15 = arith.addf %12, %14 : vector<4x1xf32>
    %c0_12 = arith.constant 0 : index
    %c0_13 = arith.constant 0 : index
    %16 = vector.load %arg5[%c0_12, %c0_13] : memref<4x1xf32, #tpu.memory_space<vmem>>, vector<4x1xf32>
    tpu.vector_store %arg5[%c0_12, %c0_13], %15 {strides = array<i32>} : memref<4x1xf32, #tpu.memory_space<vmem>>, vector<4x1xf32>,
    %c0_14 = arith.constant 0 : index
    %c0_15 = arith.constant 0 : index
    %17 = vector.load %arg6[%c0_14, %c0_15] : memref<4x1xf32, #tpu.memory_space<vmem>>, vector<4x1xf32>
    %18 = arith.mulf %8, %8 : vector<4x256xf32>
    %cst_16 = arith.constant dense<0.000000e+00> : vector<4xf32>
    %19 = vector.multi_reduction <add>, %18, %cst_16 [1] : vector<4x256xf32> to vector<4xf32>
    %20 = vector.shape_cast %19 : vector<4xf32> to vector<4x1xf32>
    %21 = arith.addf %17, %20 : vector<4x1xf32>
    %c0_17 = arith.constant 0 : index
    %c0_18 = arith.constant 0 : index
    %22 = vector.load %arg6[%c0_17, %c0_18] : memref<4x1xf32, #tpu.memory_space<vmem>>, vector<4x1xf32>
    tpu.vector_store %arg6[%c0_17, %c0_18], %21 {strides = array<i32>} : memref<4x1xf32, #tpu.memory_space<vmem>>, vector<4x1xf32>,
    return
  }
  func.func @transform_0(%arg0: i32, %arg1: i32) -> (i32, i32, i32) {
    %c0_i32 = arith.constant 0 : i32
    %c0_i32_0 = arith.constant 0 : i32
    return %arg0, %c0_i32, %arg1 : i32, i32, i32
  }
  func.func @transform_1(%arg0: i32, %arg1: i32) -> (i32, i32) {
    %c0_i32 = arith.constant 0 : i32
    %c0_i32_0 = arith.constant 0 : i32
    %c0_i32_1 = arith.constant 0 : i32
    return %c0_i32, %c0_i32_0 : i32, i32
  }
  func.func @transform_2(%arg0: i32, %arg1: i32) -> (i32, i32, i32) {
    %c0_i32 = arith.constant 0 : i32
    %c0_i32_0 = arith.constant 0 : i32
    return %arg0, %c0_i32, %arg1 : i32, i32, i32
  }
  func.func @transform_3(%arg0: i32, %arg1: i32) -> (i32, i32) {
    %c0_i32 = arith.constant 0 : i32
    %c0_i32_0 = arith.constant 0 : i32
    %c0_i32_1 = arith.constant 0 : i32
    return %c0_i32, %c0_i32_0 : i32, i32
  }
  func.func @transform_4(%arg0: i32, %arg1: i32) -> (i32, i32) {
    %c0_i32 = arith.constant 0 : i32
    %c0_i32_0 = arith.constant 0 : i32
    %c0_i32_1 = arith.constant 0 : i32
    return %c0_i32, %c0_i32_0 : i32, i32
  }
}

module attributes {stable_mosaic.version = 11 : i64} {
  func.func @_bn_add_kernel(%arg0: i32, %arg1: i32, %arg2: memref<1x16x256xf32, #tpu.memory_space<vmem>>, %arg3: memref<1x16x256xf32, #tpu.memory_space<vmem>>, %arg4: memref<16x1xf32, #tpu.memory_space<vmem>>, %arg5: memref<16x1xf32, #tpu.memory_space<vmem>>, %arg6: memref<1x16x256xf32, #tpu.memory_space<vmem>>) attributes {dimension_semantics = [#tpu.dimension_semantics<parallel>, #tpu.dimension_semantics<parallel>], iteration_bounds = array<i64: 2, 1>, scalar_prefetch = 0 : i64, scratch_operands = 0 : i64, tpu.core_type = #tpu.core_type<tc>, window_params = [{transform_indices = @transform_0, window_bounds = array<i64: 1, 16, 256>}, {transform_indices = @transform_1, window_bounds = array<i64: 1, 16, 256>}, {pipeline_mode = #tpu.pipeline_mode<synchronous>, transform_indices = @transform_2, window_bounds = array<i64: 16, 1>}, {pipeline_mode = #tpu.pipeline_mode<synchronous>, transform_indices = @transform_3, window_bounds = array<i64: 16, 1>}, {transform_indices = @transform_4, window_bounds = array<i64: 1, 16, 256>}]} {
    %c0 = arith.constant 0 : index
    %c0_0 = arith.constant 0 : index
    %c0_1 = arith.constant 0 : index
    %0 = vector.load %arg2[%c0, %c0_0, %c0_1] : memref<1x16x256xf32, #tpu.memory_space<vmem>>, vector<1x16x256xf32>
    %1 = vector.shape_cast %0 : vector<1x16x256xf32> to vector<16x256xf32>
    %c0_2 = arith.constant 0 : index
    %c0_3 = arith.constant 0 : index
    %2 = vector.load %arg4[%c0_2, %c0_3] : memref<16x1xf32, #tpu.memory_space<vmem>>, vector<16x1xf32>
    %3 = vector.broadcast %2 : vector<16x1xf32> to vector<16x256xf32>
    %4 = arith.mulf %1, %3 : vector<16x256xf32>
    %c0_4 = arith.constant 0 : index
    %c0_5 = arith.constant 0 : index
    %5 = vector.load %arg5[%c0_4, %c0_5] : memref<16x1xf32, #tpu.memory_space<vmem>>, vector<16x1xf32>
    %6 = vector.broadcast %5 : vector<16x1xf32> to vector<16x256xf32>
    %7 = arith.addf %4, %6 : vector<16x256xf32>
    %c0_6 = arith.constant 0 : index
    %c0_7 = arith.constant 0 : index
    %c0_8 = arith.constant 0 : index
    %8 = vector.load %arg3[%c0_6, %c0_7, %c0_8] : memref<1x16x256xf32, #tpu.memory_space<vmem>>, vector<1x16x256xf32>
    %9 = vector.shape_cast %8 : vector<1x16x256xf32> to vector<16x256xf32>
    %10 = arith.addf %7, %9 : vector<16x256xf32>
    %c0_9 = arith.constant 0 : index
    %c0_10 = arith.constant 0 : index
    %c0_11 = arith.constant 0 : index
    %11 = vector.load %arg6[%c0_9, %c0_10, %c0_11] : memref<1x16x256xf32, #tpu.memory_space<vmem>>, vector<1x16x256xf32>
    %12 = vector.shape_cast %11 : vector<1x16x256xf32> to vector<16x256xf32>
    %13 = vector.shape_cast %10 : vector<16x256xf32> to vector<1x16x256xf32>
    tpu.vector_store %arg6[%c0_9, %c0_10, %c0_11], %13 {strides = array<i32>} : memref<1x16x256xf32, #tpu.memory_space<vmem>>, vector<1x16x256xf32>,
    return
  }
  func.func @transform_0(%arg0: i32, %arg1: i32) -> (i32, i32, i32) {
    %c0_i32 = arith.constant 0 : i32
    %c0_i32_0 = arith.constant 0 : i32
    return %arg0, %c0_i32, %arg1 : i32, i32, i32
  }
  func.func @transform_1(%arg0: i32, %arg1: i32) -> (i32, i32, i32) {
    %c0_i32 = arith.constant 0 : i32
    %c0_i32_0 = arith.constant 0 : i32
    return %arg0, %c0_i32, %arg1 : i32, i32, i32
  }
  func.func @transform_2(%arg0: i32, %arg1: i32) -> (i32, i32) {
    %c0_i32 = arith.constant 0 : i32
    %c0_i32_0 = arith.constant 0 : i32
    %c0_i32_1 = arith.constant 0 : i32
    return %c0_i32, %c0_i32_0 : i32, i32
  }
  func.func @transform_3(%arg0: i32, %arg1: i32) -> (i32, i32) {
    %c0_i32 = arith.constant 0 : i32
    %c0_i32_0 = arith.constant 0 : i32
    %c0_i32_1 = arith.constant 0 : i32
    return %c0_i32, %c0_i32_0 : i32, i32
  }
  func.func @transform_4(%arg0: i32, %arg1: i32) -> (i32, i32, i32) {
    %c0_i32 = arith.constant 0 : i32
    %c0_i32_0 = arith.constant 0 : i32
    return %arg0, %c0_i32, %arg1 : i32, i32, i32
  }
}

module attributes {stable_mosaic.version = 11 : i64} {
  func.func @_convT3x3_kernel(%arg0: i32, %arg1: memref<1x4x256xf32, #tpu.memory_space<vmem>>, %arg2: memref<4x1xf32, #tpu.memory_space<vmem>>, %arg3: memref<4x1xf32, #tpu.memory_space<vmem>>, %arg4: memref<9x4x4xf32, #tpu.memory_space<vmem>>, %arg5: memref<9x256xf32, #tpu.memory_space<vmem>>, %arg6: memref<1x4x256xf32, #tpu.memory_space<vmem>>, %arg7: memref<4x1xf32, #tpu.memory_space<vmem>>, %arg8: memref<4x1xf32, #tpu.memory_space<vmem>>, %arg9: memref<4x512xf32, #tpu.memory_space<vmem>>) attributes {dimension_semantics = [#tpu.dimension_semantics<arbitrary>], iteration_bounds = array<i64: 2>, scalar_prefetch = 0 : i64, scratch_operands = 1 : i64, tpu.core_type = #tpu.core_type<tc>, window_params = [{transform_indices = @transform_0, window_bounds = array<i64: 1, 4, 256>}, {pipeline_mode = #tpu.pipeline_mode<synchronous>, transform_indices = @transform_1, window_bounds = array<i64: 4, 1>}, {pipeline_mode = #tpu.pipeline_mode<synchronous>, transform_indices = @transform_2, window_bounds = array<i64: 4, 1>}, {pipeline_mode = #tpu.pipeline_mode<synchronous>, transform_indices = @transform_3, window_bounds = array<i64: 9, 4, 4>}, {pipeline_mode = #tpu.pipeline_mode<synchronous>, transform_indices = @transform_4, window_bounds = array<i64: 9, 256>}, {transform_indices = @transform_5, window_bounds = array<i64: 1, 4, 256>}, {pipeline_mode = #tpu.pipeline_mode<synchronous>, transform_indices = @transform_6, window_bounds = array<i64: 4, 1>}, {pipeline_mode = #tpu.pipeline_mode<synchronous>, transform_indices = @transform_7, window_bounds = array<i64: 4, 1>}]} {
    %c0_i32 = arith.constant 0 : i32
    %0 = arith.cmpi eq, %arg0, %c0_i32 : i32
    %1 = arith.extui %0 : i1 to i32
    %c0_i32_0 = arith.constant 0 : i32
    %2 = arith.cmpi ne, %1, %c0_i32_0 : i32
    scf.if %2 {
      %cst_79 = arith.constant 0.000000e+00 : f32
      %100 = vector.broadcast %cst_79 : f32 to vector<4x1xf32>
      %c0_80 = arith.constant 0 : index
      %c0_81 = arith.constant 0 : index
      %101 = vector.load %arg7[%c0_80, %c0_81] : memref<4x1xf32, #tpu.memory_space<vmem>>, vector<4x1xf32>
      tpu.vector_store %arg7[%c0_80, %c0_81], %100 {strides = array<i32>} : memref<4x1xf32, #tpu.memory_space<vmem>>, vector<4x1xf32>,
      %cst_82 = arith.constant 0.000000e+00 : f32
      %102 = vector.broadcast %cst_82 : f32 to vector<4x1xf32>
      %c0_83 = arith.constant 0 : index
      %c0_84 = arith.constant 0 : index
      %103 = vector.load %arg8[%c0_83, %c0_84] : memref<4x1xf32, #tpu.memory_space<vmem>>, vector<4x1xf32>
      tpu.vector_store %arg8[%c0_83, %c0_84], %102 {strides = array<i32>} : memref<4x1xf32, #tpu.memory_space<vmem>>, vector<4x1xf32>,
    } else {
    }
    %cst = arith.constant 0.000000e+00 : f32
    %3 = vector.broadcast %cst : f32 to vector<4x512xf32>
    %c0 = arith.constant 0 : index
    %c0_1 = arith.constant 0 : index
    %4 = vector.load %arg9[%c0, %c0_1] : memref<4x512xf32, #tpu.memory_space<vmem>>, vector<4x512xf32>
    tpu.vector_store %arg9[%c0, %c0_1], %3 {strides = array<i32>} : memref<4x512xf32, #tpu.memory_space<vmem>>, vector<4x512xf32>,
    %c0_2 = arith.constant 0 : index
    %c0_3 = arith.constant 0 : index
    %c0_4 = arith.constant 0 : index
    %5 = vector.load %arg1[%c0_2, %c0_3, %c0_4] : memref<1x4x256xf32, #tpu.memory_space<vmem>>, vector<1x4x256xf32>
    %6 = vector.shape_cast %5 : vector<1x4x256xf32> to vector<4x256xf32>
    %c0_5 = arith.constant 0 : index
    %c0_6 = arith.constant 0 : index
    %7 = vector.load %arg2[%c0_5, %c0_6] : memref<4x1xf32, #tpu.memory_space<vmem>>, vector<4x1xf32>
    %8 = vector.broadcast %7 : vector<4x1xf32> to vector<4x256xf32>
    %9 = arith.mulf %6, %8 : vector<4x256xf32>
    %c0_7 = arith.constant 0 : index
    %c0_8 = arith.constant 0 : index
    %10 = vector.load %arg3[%c0_7, %c0_8] : memref<4x1xf32, #tpu.memory_space<vmem>>, vector<4x1xf32>
    %11 = vector.broadcast %10 : vector<4x1xf32> to vector<4x256xf32>
    %12 = arith.addf %9, %11 : vector<4x256xf32>
    %13 = math.sin %12 : vector<4x256xf32>
    %c0_9 = arith.constant 0 : index
    %c128 = arith.constant 128 : index
    %14 = vector.load %arg9[%c0_9, %c128] : memref<4x512xf32, #tpu.memory_space<vmem>>, vector<4x256xf32>
    tpu.vector_store %arg9[%c0_9, %c128], %13 {strides = array<i32>} : memref<4x512xf32, #tpu.memory_space<vmem>>, vector<4x256xf32>,
    %c0_10 = arith.constant 0 : index
    %c145 = arith.constant 145 : index
    %15 = vector.load %arg9[%c0_10, %c145] : memref<4x512xf32, #tpu.memory_space<vmem>>, vector<4x256xf32>
    %c0_11 = arith.constant 0 : index
    %c0_12 = arith.constant 0 : index
    %16 = vector.load %arg5[%c0_11, %c0_12] : memref<9x256xf32, #tpu.memory_space<vmem>>, vector<1x256xf32>
    %17 = vector.broadcast %16 : vector<1x256xf32> to vector<4x256xf32>
    %18 = arith.mulf %15, %17 : vector<4x256xf32>
    %c0_13 = arith.constant 0 : index
    %c144 = arith.constant 144 : index
    %19 = vector.load %arg9[%c0_13, %c144] : memref<4x512xf32, #tpu.memory_space<vmem>>, vector<4x256xf32>
    %c1 = arith.constant 1 : index
    %c0_14 = arith.constant 0 : index
    %20 = vector.load %arg5[%c1, %c0_14] : memref<9x256xf32, #tpu.memory_space<vmem>>, vector<1x256xf32>
    %21 = vector.broadcast %20 : vector<1x256xf32> to vector<4x256xf32>
    %22 = arith.mulf %19, %21 : vector<4x256xf32>
    %c0_15 = arith.constant 0 : index
    %c143 = arith.constant 143 : index
    %23 = vector.load %arg9[%c0_15, %c143] : memref<4x512xf32, #tpu.memory_space<vmem>>, vector<4x256xf32>
    %c2 = arith.constant 2 : index
    %c0_16 = arith.constant 0 : index
    %24 = vector.load %arg5[%c2, %c0_16] : memref<9x256xf32, #tpu.memory_space<vmem>>, vector<1x256xf32>
    %25 = vector.broadcast %24 : vector<1x256xf32> to vector<4x256xf32>
    %26 = arith.mulf %23, %25 : vector<4x256xf32>
    %c0_17 = arith.constant 0 : index
    %c129 = arith.constant 129 : index
    %27 = vector.load %arg9[%c0_17, %c129] : memref<4x512xf32, #tpu.memory_space<vmem>>, vector<4x256xf32>
    %c3 = arith.constant 3 : index
    %c0_18 = arith.constant 0 : index
    %28 = vector.load %arg5[%c3, %c0_18] : memref<9x256xf32, #tpu.memory_space<vmem>>, vector<1x256xf32>
    %29 = vector.broadcast %28 : vector<1x256xf32> to vector<4x256xf32>
    %30 = arith.mulf %27, %29 : vector<4x256xf32>
    %c0_19 = arith.constant 0 : index
    %c128_20 = arith.constant 128 : index
    %31 = vector.load %arg9[%c0_19, %c128_20] : memref<4x512xf32, #tpu.memory_space<vmem>>, vector<4x256xf32>
    %c4 = arith.constant 4 : index
    %c0_21 = arith.constant 0 : index
    %32 = vector.load %arg5[%c4, %c0_21] : memref<9x256xf32, #tpu.memory_space<vmem>>, vector<1x256xf32>
    %33 = vector.broadcast %32 : vector<1x256xf32> to vector<4x256xf32>
    %34 = arith.mulf %31, %33 : vector<4x256xf32>
    %c0_22 = arith.constant 0 : index
    %c127 = arith.constant 127 : index
    %35 = vector.load %arg9[%c0_22, %c127] : memref<4x512xf32, #tpu.memory_space<vmem>>, vector<4x256xf32>
    %c5 = arith.constant 5 : index
    %c0_23 = arith.constant 0 : index
    %36 = vector.load %arg5[%c5, %c0_23] : memref<9x256xf32, #tpu.memory_space<vmem>>, vector<1x256xf32>
    %37 = vector.broadcast %36 : vector<1x256xf32> to vector<4x256xf32>
    %38 = arith.mulf %35, %37 : vector<4x256xf32>
    %c0_24 = arith.constant 0 : index
    %c113 = arith.constant 113 : index
    %39 = vector.load %arg9[%c0_24, %c113] : memref<4x512xf32, #tpu.memory_space<vmem>>, vector<4x256xf32>
    %c6 = arith.constant 6 : index
    %c0_25 = arith.constant 0 : index
    %40 = vector.load %arg5[%c6, %c0_25] : memref<9x256xf32, #tpu.memory_space<vmem>>, vector<1x256xf32>
    %41 = vector.broadcast %40 : vector<1x256xf32> to vector<4x256xf32>
    %42 = arith.mulf %39, %41 : vector<4x256xf32>
    %c0_26 = arith.constant 0 : index
    %c112 = arith.constant 112 : index
    %43 = vector.load %arg9[%c0_26, %c112] : memref<4x512xf32, #tpu.memory_space<vmem>>, vector<4x256xf32>
    %c7 = arith.constant 7 : index
    %c0_27 = arith.constant 0 : index
    %44 = vector.load %arg5[%c7, %c0_27] : memref<9x256xf32, #tpu.memory_space<vmem>>, vector<1x256xf32>
    %45 = vector.broadcast %44 : vector<1x256xf32> to vector<4x256xf32>
    %46 = arith.mulf %43, %45 : vector<4x256xf32>
    %c0_28 = arith.constant 0 : index
    %c111 = arith.constant 111 : index
    %47 = vector.load %arg9[%c0_28, %c111] : memref<4x512xf32, #tpu.memory_space<vmem>>, vector<4x256xf32>
    %c8 = arith.constant 8 : index
    %c0_29 = arith.constant 0 : index
    %48 = vector.load %arg5[%c8, %c0_29] : memref<9x256xf32, #tpu.memory_space<vmem>>, vector<1x256xf32>
    %49 = vector.broadcast %48 : vector<1x256xf32> to vector<4x256xf32>
    %50 = arith.mulf %47, %49 : vector<4x256xf32>
    %c0_30 = arith.constant 0 : index
    %c0_31 = arith.constant 0 : index
    %c0_32 = arith.constant 0 : index
    %51 = vector.load %arg4[%c0_30, %c0_31, %c0_32] : memref<9x4x4xf32, #tpu.memory_space<vmem>>, vector<1x4x4xf32>
    %52 = vector.shape_cast %51 : vector<1x4x4xf32> to vector<4x4xf32>
    %cst_33 = arith.constant dense<0.000000e+00> : vector<4x256xf32>
    %53 = tpu.matmul %52, %18, %cst_33 {dimension_numbers = #tpu.dot_dimension_numbers<[1], [0], [0], [1], [0, 0, 1, 1], [], []>} : vector<4x4xf32>, vector<4x256xf32>, vector<4x256xf32> -> vector<4x256xf32>
    %c1_34 = arith.constant 1 : index
    %c0_35 = arith.constant 0 : index
    %c0_36 = arith.constant 0 : index
    %54 = vector.load %arg4[%c1_34, %c0_35, %c0_36] : memref<9x4x4xf32, #tpu.memory_space<vmem>>, vector<1x4x4xf32>
    %55 = vector.shape_cast %54 : vector<1x4x4xf32> to vector<4x4xf32>
    %cst_37 = arith.constant dense<0.000000e+00> : vector<4x256xf32>
    %56 = tpu.matmul %55, %22, %cst_37 {dimension_numbers = #tpu.dot_dimension_numbers<[1], [0], [0], [1], [0, 0, 1, 1], [], []>} : vector<4x4xf32>, vector<4x256xf32>, vector<4x256xf32> -> vector<4x256xf32>
    %57 = arith.addf %53, %56 : vector<4x256xf32>
    %c2_38 = arith.constant 2 : index
    %c0_39 = arith.constant 0 : index
    %c0_40 = arith.constant 0 : index
    %58 = vector.load %arg4[%c2_38, %c0_39, %c0_40] : memref<9x4x4xf32, #tpu.memory_space<vmem>>, vector<1x4x4xf32>
    %59 = vector.shape_cast %58 : vector<1x4x4xf32> to vector<4x4xf32>
    %cst_41 = arith.constant dense<0.000000e+00> : vector<4x256xf32>
    %60 = tpu.matmul %59, %26, %cst_41 {dimension_numbers = #tpu.dot_dimension_numbers<[1], [0], [0], [1], [0, 0, 1, 1], [], []>} : vector<4x4xf32>, vector<4x256xf32>, vector<4x256xf32> -> vector<4x256xf32>
    %61 = arith.addf %57, %60 : vector<4x256xf32>
    %c3_42 = arith.constant 3 : index
    %c0_43 = arith.constant 0 : index
    %c0_44 = arith.constant 0 : index
    %62 = vector.load %arg4[%c3_42, %c0_43, %c0_44] : memref<9x4x4xf32, #tpu.memory_space<vmem>>, vector<1x4x4xf32>
    %63 = vector.shape_cast %62 : vector<1x4x4xf32> to vector<4x4xf32>
    %cst_45 = arith.constant dense<0.000000e+00> : vector<4x256xf32>
    %64 = tpu.matmul %63, %30, %cst_45 {dimension_numbers = #tpu.dot_dimension_numbers<[1], [0], [0], [1], [0, 0, 1, 1], [], []>} : vector<4x4xf32>, vector<4x256xf32>, vector<4x256xf32> -> vector<4x256xf32>
    %65 = arith.addf %61, %64 : vector<4x256xf32>
    %c4_46 = arith.constant 4 : index
    %c0_47 = arith.constant 0 : index
    %c0_48 = arith.constant 0 : index
    %66 = vector.load %arg4[%c4_46, %c0_47, %c0_48] : memref<9x4x4xf32, #tpu.memory_space<vmem>>, vector<1x4x4xf32>
    %67 = vector.shape_cast %66 : vector<1x4x4xf32> to vector<4x4xf32>
    %cst_49 = arith.constant dense<0.000000e+00> : vector<4x256xf32>
    %68 = tpu.matmul %67, %34, %cst_49 {dimension_numbers = #tpu.dot_dimension_numbers<[1], [0], [0], [1], [0, 0, 1, 1], [], []>} : vector<4x4xf32>, vector<4x256xf32>, vector<4x256xf32> -> vector<4x256xf32>
    %69 = arith.addf %65, %68 : vector<4x256xf32>
    %c5_50 = arith.constant 5 : index
    %c0_51 = arith.constant 0 : index
    %c0_52 = arith.constant 0 : index
    %70 = vector.load %arg4[%c5_50, %c0_51, %c0_52] : memref<9x4x4xf32, #tpu.memory_space<vmem>>, vector<1x4x4xf32>
    %71 = vector.shape_cast %70 : vector<1x4x4xf32> to vector<4x4xf32>
    %cst_53 = arith.constant dense<0.000000e+00> : vector<4x256xf32>
    %72 = tpu.matmul %71, %38, %cst_53 {dimension_numbers = #tpu.dot_dimension_numbers<[1], [0], [0], [1], [0, 0, 1, 1], [], []>} : vector<4x4xf32>, vector<4x256xf32>, vector<4x256xf32> -> vector<4x256xf32>
    %73 = arith.addf %69, %72 : vector<4x256xf32>
    %c6_54 = arith.constant 6 : index
    %c0_55 = arith.constant 0 : index
    %c0_56 = arith.constant 0 : index
    %74 = vector.load %arg4[%c6_54, %c0_55, %c0_56] : memref<9x4x4xf32, #tpu.memory_space<vmem>>, vector<1x4x4xf32>
    %75 = vector.shape_cast %74 : vector<1x4x4xf32> to vector<4x4xf32>
    %cst_57 = arith.constant dense<0.000000e+00> : vector<4x256xf32>
    %76 = tpu.matmul %75, %42, %cst_57 {dimension_numbers = #tpu.dot_dimension_numbers<[1], [0], [0], [1], [0, 0, 1, 1], [], []>} : vector<4x4xf32>, vector<4x256xf32>, vector<4x256xf32> -> vector<4x256xf32>
    %77 = arith.addf %73, %76 : vector<4x256xf32>
    %c7_58 = arith.constant 7 : index
    %c0_59 = arith.constant 0 : index
    %c0_60 = arith.constant 0 : index
    %78 = vector.load %arg4[%c7_58, %c0_59, %c0_60] : memref<9x4x4xf32, #tpu.memory_space<vmem>>, vector<1x4x4xf32>
    %79 = vector.shape_cast %78 : vector<1x4x4xf32> to vector<4x4xf32>
    %cst_61 = arith.constant dense<0.000000e+00> : vector<4x256xf32>
    %80 = tpu.matmul %79, %46, %cst_61 {dimension_numbers = #tpu.dot_dimension_numbers<[1], [0], [0], [1], [0, 0, 1, 1], [], []>} : vector<4x4xf32>, vector<4x256xf32>, vector<4x256xf32> -> vector<4x256xf32>
    %81 = arith.addf %77, %80 : vector<4x256xf32>
    %c8_62 = arith.constant 8 : index
    %c0_63 = arith.constant 0 : index
    %c0_64 = arith.constant 0 : index
    %82 = vector.load %arg4[%c8_62, %c0_63, %c0_64] : memref<9x4x4xf32, #tpu.memory_space<vmem>>, vector<1x4x4xf32>
    %83 = vector.shape_cast %82 : vector<1x4x4xf32> to vector<4x4xf32>
    %cst_65 = arith.constant dense<0.000000e+00> : vector<4x256xf32>
    %84 = tpu.matmul %83, %50, %cst_65 {dimension_numbers = #tpu.dot_dimension_numbers<[1], [0], [0], [1], [0, 0, 1, 1], [], []>} : vector<4x4xf32>, vector<4x256xf32>, vector<4x256xf32> -> vector<4x256xf32>
    %85 = arith.addf %81, %84 : vector<4x256xf32>
    %c0_66 = arith.constant 0 : index
    %c0_67 = arith.constant 0 : index
    %c0_68 = arith.constant 0 : index
    %86 = vector.load %arg6[%c0_66, %c0_67, %c0_68] : memref<1x4x256xf32, #tpu.memory_space<vmem>>, vector<1x4x256xf32>
    %87 = vector.shape_cast %86 : vector<1x4x256xf32> to vector<4x256xf32>
    %88 = vector.shape_cast %85 : vector<4x256xf32> to vector<1x4x256xf32>
    tpu.vector_store %arg6[%c0_66, %c0_67, %c0_68], %88 {strides = array<i32>} : memref<1x4x256xf32, #tpu.memory_space<vmem>>, vector<1x4x256xf32>,
    %c0_69 = arith.constant 0 : index
    %c0_70 = arith.constant 0 : index
    %89 = vector.load %arg7[%c0_69, %c0_70] : memref<4x1xf32, #tpu.memory_space<vmem>>, vector<4x1xf32>
    %cst_71 = arith.constant dense<0.000000e+00> : vector<4xf32>
    %90 = vector.multi_reduction <add>, %85, %cst_71 [1] : vector<4x256xf32> to vector<4xf32>
    %91 = vector.shape_cast %90 : vector<4xf32> to vector<4x1xf32>
    %92 = arith.addf %89, %91 : vector<4x1xf32>
    %c0_72 = arith.constant 0 : index
    %c0_73 = arith.constant 0 : index
    %93 = vector.load %arg7[%c0_72, %c0_73] : memref<4x1xf32, #tpu.memory_space<vmem>>, vector<4x1xf32>
    tpu.vector_store %arg7[%c0_72, %c0_73], %92 {strides = array<i32>} : memref<4x1xf32, #tpu.memory_space<vmem>>, vector<4x1xf32>,
    %c0_74 = arith.constant 0 : index
    %c0_75 = arith.constant 0 : index
    %94 = vector.load %arg8[%c0_74, %c0_75] : memref<4x1xf32, #tpu.memory_space<vmem>>, vector<4x1xf32>
    %95 = arith.mulf %85, %85 : vector<4x256xf32>
    %cst_76 = arith.constant dense<0.000000e+00> : vector<4xf32>
    %96 = vector.multi_reduction <add>, %95, %cst_76 [1] : vector<4x256xf32> to vector<4xf32>
    %97 = vector.shape_cast %96 : vector<4xf32> to vector<4x1xf32>
    %98 = arith.addf %94, %97 : vector<4x1xf32>
    %c0_77 = arith.constant 0 : index
    %c0_78 = arith.constant 0 : index
    %99 = vector.load %arg8[%c0_77, %c0_78] : memref<4x1xf32, #tpu.memory_space<vmem>>, vector<4x1xf32>
    tpu.vector_store %arg8[%c0_77, %c0_78], %98 {strides = array<i32>} : memref<4x1xf32, #tpu.memory_space<vmem>>, vector<4x1xf32>,
    return
  }
  func.func @transform_0(%arg0: i32) -> (i32, i32, i32) {
    %c0_i32 = arith.constant 0 : i32
    %c0_i32_0 = arith.constant 0 : i32
    %c0_i32_1 = arith.constant 0 : i32
    return %arg0, %c0_i32, %c0_i32_0 : i32, i32, i32
  }
  func.func @transform_1(%arg0: i32) -> (i32, i32) {
    %c0_i32 = arith.constant 0 : i32
    %c0_i32_0 = arith.constant 0 : i32
    %c0_i32_1 = arith.constant 0 : i32
    return %c0_i32, %c0_i32_0 : i32, i32
  }
  func.func @transform_2(%arg0: i32) -> (i32, i32) {
    %c0_i32 = arith.constant 0 : i32
    %c0_i32_0 = arith.constant 0 : i32
    %c0_i32_1 = arith.constant 0 : i32
    return %c0_i32, %c0_i32_0 : i32, i32
  }
  func.func @transform_3(%arg0: i32) -> (i32, i32, i32) {
    %c0_i32 = arith.constant 0 : i32
    %c0_i32_0 = arith.constant 0 : i32
    %c0_i32_1 = arith.constant 0 : i32
    %c0_i32_2 = arith.constant 0 : i32
    return %c0_i32, %c0_i32_0, %c0_i32_1 : i32, i32, i32
  }
  func.func @transform_4(%arg0: i32) -> (i32, i32) {
    %c0_i32 = arith.constant 0 : i32
    %c0_i32_0 = arith.constant 0 : i32
    %c0_i32_1 = arith.constant 0 : i32
    return %c0_i32, %c0_i32_0 : i32, i32
  }
  func.func @transform_5(%arg0: i32) -> (i32, i32, i32) {
    %c0_i32 = arith.constant 0 : i32
    %c0_i32_0 = arith.constant 0 : i32
    %c0_i32_1 = arith.constant 0 : i32
    return %arg0, %c0_i32, %c0_i32_0 : i32, i32, i32
  }
  func.func @transform_6(%arg0: i32) -> (i32, i32) {
    %c0_i32 = arith.constant 0 : i32
    %c0_i32_0 = arith.constant 0 : i32
    %c0_i32_1 = arith.constant 0 : i32
    return %c0_i32, %c0_i32_0 : i32, i32
  }
  func.func @transform_7(%arg0: i32) -> (i32, i32) {
    %c0_i32 = arith.constant 0 : i32
    %c0_i32_0 = arith.constant 0 : i32
    %c0_i32_1 = arith.constant 0 : i32
    return %c0_i32, %c0_i32_0 : i32, i32
  }
}

</mosaic_0001>

<bundles_post_ra>
// kernel: _lambda_.9
= control target key start
LH: loop header
LB: loop body
LE: loop exit
PB: predicated region body
PF: predicated region fallthrough
CT: control target
= control target key end

     0   :  { %s443_s15 = smov 0   ;;  %s445_s16 = smov 0   ;;  %s497_s0 = inlined_call_operand.vmem [shape: f32[2,8,64], index: 0, kind: input, shape index: {}]   ;;  %s498_s1 = inlined_call_operand.vmem [shape: f32[4,8], index: 1, kind: input, shape index: {}]   ;;  %s499_s2 = inlined_call_operand.vmem [shape: f32[2,4,64], index: 2, kind: output, shape index: {0}]   ;;  %s500_s3 = inlined_call_operand.vmem [shape: f32[4,1], index: 3, kind: output, shape index: {1}]   ;;  %s501_s4 = inlined_call_operand.vmem [shape: f32[4,1], index: 4, kind: output, shape index: {2}]  }
   0x1   :  { %s447_s17 = smov 0  }
   0x2 LB: > { %s27_s18 = sadd.s32 1, %s411_s16  ;;  %p360_p0 = scmp.ge.s32.totalorder %s415_s17, 1  ;;  %s415_s17 = sphi %s447_s17, %s15_s17   ;;  %s411_s16 = sphi %s445_s16, %s503_s16   ;;  %s407_s15 = sphi %s443_s15, %s502_s15  }
   0x3   : > { %p29_p1 = scmp.ge.s32.totalorder %s27_s18, 2  ;;  %p175_p2 = scmp.lt.s32.totalorder %s415_s17, 3 }
   0x5   : > { %s505_s18 = smov (%p29_p1, %s27_s18), 0  ;;  %p176_p3 = pnand %p360_p0, %p175_p2 }
   0x6   : > { %p205_p4 = scmp.lt.s32.totalorder (!%p176_p3), %s407_s15, 1  ;;  %p219_p5 = scmp.eq.s32.totalorder (!%p176_p3), %s407_s15, 0 }
   0x7   : > { %179 = sbr.rel (%p176_p3) target bundleno = 273 (0x111), region = 28 }
   0xc   : > { %s507_s15 = smov (!%p205_p4, %s407_s15), 1  ;;  %224 = sbr.rel (!%p219_p5) target bundleno = 17 (0x11), region = 32  ;;  %vm225_vm0 = vcmask (%p219_p5), 3072   ;;  %v417_v0 = vmov (%p219_p5), 0.0  }
   0xd   : > { %s361_s19 = sshll.u32 %s507_s15, 3  ;;  %s362_s20 = sshll.u32 %s507_s15, 2  ;;  %226 = vst.msk [vmem:[%s500_s3] sm:$0xf] (%p219_p5), %vm225_vm0, %v417_v0 }
   0xe   : > { %s211_s23 = scalar_lea.vmem %s497_s0, %s361_s19  ;;  %s218_s26 = scalar_lea.vmem %s499_s2, %s362_s20  ;;  %227 = vst.msk [vmem:[%s501_s4] sm:$0xf] (%p219_p5), %vm225_vm0, %v417_v0 }
  0x11 PF: > { %v229_v1 = vld [vmem:[%s211_s23] sm:$0xff]  ;;  %vm230_vm1 = vcmask 64512   ;;  %vm254_vm2 = vcmask 519168   ;;  %vm261_vm3 = vcmask 3072  }
  0x12   : > { %v228_v2 = vld [vmem:[%s498_s1] sm:$0xf]  ;;  %249 = vmatpush.msra.mxu0 %v229_v1 }
  0x13   : > { %364 = vmatmul.msk.f32.vlgmr.msra.gmra.mxu0 %vm230_vm1, %v228_v2 }
  0x14   : > { %v256_v7 = vld [vmem:[%s500_s3] sm:$0xf] }
  0x15   : > { %v263_v10 = vld [vmem:[%s501_s4] sm:$0xf] }
  0x90   : > { %v251_v3 = vpop.f32.mrf.mxu0 }
  0x91   : > { %255 = vst.msk [vmem:[%s218_s26] sm:$0xf] %vm254_vm2, %v251_v3  ;;  %v257_v4 = vsel %vm254_vm2, %v251_v3, 0.0  ;;  %v264_v5 = vmul.f32 %v251_v3, %v251_v3 }
  0x92   : > { %258 = vadd.xlane.f32.xlu0 %v257_v4 }
  0x93   : > { %v265_v6 = vsel %vm254_vm2, %v264_v5, 0.0 }
  0x9a   : > { %266 = vadd.xlane.f32.xlu0 %v265_v6 }
 0x105   : > { %v259_v8 = vpop.xlane.xlu0 %258 }
 0x106   : > { %v260_v9 = vadd.f32 %v259_v8, %v256_v7 }
 0x108   : > { %262 = vst.msk [vmem:[%s500_s3] sm:$0xf] %vm261_vm3, %v260_v9 }
 0x10d   : > { %v267_v11 = vpop.xlane.xlu0 %266 }
 0x10e   : > { %v268_v12 = vadd.f32 %v267_v11, %v263_v10 }
 0x110   : > { %269 = vst.msk [vmem:[%s501_s4] sm:$0xf] %vm261_vm3, %v268_v12 }
 0x111 PF: > { %s15_s17 = sadd.s32 1, %s415_s17   ;;  %s502_s15 = smov %s411_s16 }
 0x112   : > { %p12_p6 = scmp.ge.s32.totalorder %s15_s17, 4   ;;  %s503_s16 = smov %s505_s18 }
 0x114   :  { %14 = sbr.rel (!%p12_p6) target bundleno = 2 (0x2), region = 78 }

// kernel: _lambda_.12
= control target key start
LH: loop header
LB: loop body
LE: loop exit
PB: predicated region body
PF: predicated region fallthrough
CT: control target
= control target key end

     0   :  { %s478_s15 = smov 0   ;;  %s480_s16 = smov 0   ;;  %s553_s0 = inlined_call_operand.vmem [shape: f32[2,8,64], index: 0, kind: input, shape index: {}]   ;;  %s554_s1 = inlined_call_operand.vmem [shape: f32[16,8], index: 1, kind: input, shape index: {}]   ;;  %s555_s2 = inlined_call_operand.vmem [shape: f32[2,16,64], index: 2, kind: output, shape index: {0}]   ;;  %s556_s3 = inlined_call_operand.vmem [shape: f32[16,1], index: 3, kind: output, shape index: {1}]   ;;  %s557_s4 = inlined_call_operand.vmem [shape: f32[16,1], index: 4, kind: output, shape index: {2}]  }
   0x1   :  { %s482_s17 = smov 0  }
   0x2 LB: > { %s27_s18 = sadd.s32 1, %s446_s16  ;;  %p391_p0 = scmp.ge.s32.totalorder %s450_s17, 1  ;;  %s450_s17 = sphi %s482_s17, %s15_s17   ;;  %s446_s16 = sphi %s480_s16, %s559_s16   ;;  %s442_s15 = sphi %s478_s15, %s558_s15  }
   0x3   : > { %p29_p1 = scmp.ge.s32.totalorder %s27_s18, 2  ;;  %p175_p2 = scmp.lt.s32.totalorder %s450_s17, 3 }
   0x5   : > { %s561_s18 = smov (%p29_p1, %s27_s18), 0  ;;  %p176_p3 = pnand %p391_p0, %p175_p2 }
   0x6   : > { %p206_p4 = scmp.lt.s32.totalorder (!%p176_p3), %s442_s15, 1  ;;  %p221_p5 = scmp.eq.s32.totalorder (!%p176_p3), %s442_s15, 0 }
   0x7   : > { %179 = sbr.rel (%p176_p3) target bundleno = 275 (0x113), region = 28 }
   0xc   : > { %s563_s15 = smov (!%p206_p4, %s442_s15), 1  ;;  %226 = sbr.rel (!%p221_p5) target bundleno = 17 (0x11), region = 32  ;;  %vm227_vm0 = vcmask (%p221_p5), 7168   ;;  %v452_v0 = vmov (%p221_p5), 0.0  }
   0xd   : > { %s392_s19 = sshll.u32 %s563_s15, 3  ;;  %s400_s20 = sshll.u32 %s563_s15, 4  ;;  %228 = vst.msk [vmem:[%s556_s3] sm:$0xff] (%p221_p5), %vm227_vm0, %v452_v0 }
   0xe   : > { %s212_s23 = scalar_lea.vmem %s553_s0, %s392_s19  ;;  %s220_s26 = scalar_lea.vmem %s555_s2, %s400_s20  ;;  %229 = vst.msk [vmem:[%s556_s3 + $0x8] sm:$0xff] (%p221_p5), %vm227_vm0, %v452_v0 }
   0xf   : > { %230 = vst.msk [vmem:[%s557_s4] sm:$0xff] (%p221_p5), %vm227_vm0, %v452_v0 }
  0x10   : > { %231 = vst.msk [vmem:[%s557_s4 + $0x8] sm:$0xff] (%p221_p5), %vm227_vm0, %v452_v0 }
  0x11 PF: > { %v234_v1 = vld [vmem:[%s212_s23] sm:$0xff]  ;;  %vm235_vm1 = vcmask 64512   ;;  %v233_v3 = vld [vmem:[%s554_s1 + $0x8] sm:$0xff]  ;;  %vm265_vm2 = vcmask 523264   ;;  %vm278_vm3 = vcmask 7168  }
  0x12   : > { %v232_v2 = vld [vmem:[%s554_s1] sm:$0xff]  ;;  %257 = vmatpush.msra.mxu0 %v234_v1  ;;  %402 = vmatpush.msra.mxu1 %v234_v1 }
  0x13   : > { %396 = vmatmul.msk.f32.vlgmr.msra.gmra.mxu0 %vm235_vm1, %v232_v2  ;;  %397 = vmatmul.msk.f32.vlgmr.msra.gmra.mxu1 %vm235_vm1, %v233_v3 }
  0x14   : > { %v268_v12 = vld [vmem:[%s556_s3] sm:$0xff] }
  0x15   : > { %v269_v18 = vld [vmem:[%s556_s3 + $0x8] sm:$0xff] }
  0x16   : > { %v281_v14 = vld [vmem:[%s557_s4] sm:$0xff] }
  0x17   : > { %v282_v20 = vld [vmem:[%s557_s4 + $0x8] sm:$0xff] }
  0x90   : > { %v259_v4 = vpop.f32.mrf.mxu0  ;;  %v262_v5 = vpop.f32.mrf.mxu1 }
  0x91   : > { %266 = vst.msk [vmem:[%s220_s26] sm:$0xff] %vm265_vm2, %v259_v4  ;;  %v270_v6 = vsel %vm265_vm2, %v259_v4, 0.0  ;;  %v283_v7 = vmul.f32 %v259_v4, %v259_v4  ;;  %v284_v9 = vmul.f32 %v262_v5, %v262_v5  ;;  %v273_v10 = vsel %vm265_vm2, %v262_v5, 0.0 }
  0x92   : > { %271 = vadd.xlane.f32.xlu0 %v270_v6  ;;  %267 = vst.msk [vmem:[%s220_s26 + $0x8] sm:$0xff] %vm265_vm2, %v262_v5 }
  0x93   : > { %v285_v8 = vsel %vm265_vm2, %v283_v7, 0.0  ;;  %v288_v11 = vsel %vm265_vm2, %v284_v9, 0.0 }
  0x94   : > { %286 = vadd.xlane.f32.xlu1 %v285_v8 }
  0x9a   : > { %274 = vadd.xlane.f32.xlu0 %v273_v10 }
  0x9c   : > { %289 = vadd.xlane.f32.xlu1 %v288_v11 }
 0x105   : > { %v272_v13 = vpop.xlane.xlu0 %271 }
 0x106   : > { %v276_v15 = vadd.f32 %v272_v13, %v268_v12 }
 0x107   : > { %v287_v16 = vpop.xlane.xlu1 %286 }
 0x108   : > { %279 = vst.msk [vmem:[%s556_s3] sm:$0xff] %vm278_vm3, %v276_v15  ;;  %v291_v17 = vadd.f32 %v287_v16, %v281_v14 }
 0x10a   : > { %293 = vst.msk [vmem:[%s557_s4] sm:$0xff] %vm278_vm3, %v291_v17 }
 0x10d   : > { %v275_v19 = vpop.xlane.xlu0 %274 }
 0x10e   : > { %v277_v21 = vadd.f32 %v275_v19, %v269_v18 }
 0x10f   : > { %v290_v22 = vpop.xlane.xlu1 %289 }
 0x110   : > { %280 = vst.msk [vmem:[%s556_s3 + $0x8] sm:$0xff] %vm278_vm3, %v277_v21  ;;  %v292_v23 = vadd.f32 %v290_v22, %v282_v20 }
 0x112   : > { %294 = vst.msk [vmem:[%s557_s4 + $0x8] sm:$0xff] %vm278_vm3, %v292_v23 }
 0x113 PF: > { %s15_s17 = sadd.s32 1, %s450_s17   ;;  %s558_s15 = smov %s446_s16 }
 0x114   : > { %p12_p6 = scmp.ge.s32.totalorder %s15_s17, 4   ;;  %s559_s16 = smov %s561_s18 }
 0x116   :  { %14 = sbr.rel (!%p12_p6) target bundleno = 2 (0x2), region = 78 }

// kernel: _lambda_.10
= control target key start
LH: loop header
LB: loop body
LE: loop exit
PB: predicated region body
PF: predicated region fallthrough
CT: control target
= control target key end

     0   :  { %s1008_s24 = smov 0   ;;  %s1228_s0 = inlined_call_operand.vmem [shape: f32[2,4,64], index: 0, kind: input, shape index: {}]   ;;  %s1229_s1 = inlined_call_operand.vmem [shape: f32[4,1], index: 1, kind: input, shape index: {}]   ;;  %s1230_s2 = inlined_call_operand.vmem [shape: f32[4,1], index: 2, kind: input, shape index: {}]   ;;  %s1231_s3 = inlined_call_operand.vmem [shape: f32[9,4,4], index: 3, kind: input, shape index: {}]   ;;  %s1232_s4 = inlined_call_operand.vmem [shape: f32[4,64], index: 4, kind: input, shape index: {}]   ;;  %s1233_s5 = inlined_call_operand.vmem [shape: f32[2,4,256], index: 5, kind: output, shape index: {0}]   ;;  %s1234_s6 = inlined_call_operand.vmem [shape: f32[4,1], index: 6, kind: output, shape index: {1}]   ;;  %s1235_s7 = inlined_call_operand.vmem [shape: f32[4,1], index: 7, kind: output, shape index: {2}]  }
   0x1 LB: > { %s874_s25 = sadd.s32 4294967295, %s950_s24   ;;  %p878_p0 = scmp.ge.s32.totalorder %s950_s24, 1  ;;  %s950_s24 = sphi %s1008_s24, %s18_s24  }
   0x2   : > { %p231_p1 = scmp.lt.s32.totalorder %s950_s24, 3 }
   0x4   : > { %p232_p2 = pnand %p878_p0, %p231_p1 }
   0x5   : > { %p262_p3 = scmp.lt.s32.totalorder (!%p232_p2), %s874_s25, 1  ;;  %p882_p4 = scmp.ne.s32.totalorder (!%p232_p2), %s874_s25, 0 }
   0x6   : > { %235 = sbr.rel (%p232_p2) target bundleno = 676 (0x2a4), region = 40 }
   0xb   : > { %s263_s26 = scalar_select %p262_p3, %s874_s25, 1 }
   0xc   : > { %274 = sbr.rel (%p882_p4) target bundleno = 20 (0x14), region = 44 }
   0xd   : > { %s879_s27 = sshll.u32 %s263_s26, 2  ;;  %s914_s28 = sshll.u32 %s263_s26, 3 }
   0xe   : > { %s265_s8 = scalar_lea.vmem %s1228_s0, %s879_s27  ;;  %s1022_s11 = scalar_lea.vmem %s1233_s5, %s914_s28 }
  0x11   : > { %vm275_vm0 = vcmask 3072   ;;  %v952_v0 = vmov 0.0  }
  0x12   : > { %276 = vst.msk [vmem:[%s1234_s6] sm:$0xf] %vm275_vm0, %v952_v0 }
  0x13   : > { %277 = vst.msk [vmem:[%s1235_s7] sm:$0xf] %vm275_vm0, %v952_v0 }
  0x14 PF: > { %v282_v1 = vld [vmem:[%s1229_s1] sm:$0xf]  ;;  %v953_v2 = vmov 0   ;;  %s954_s20 = smov 1   ;;  %s955_s26 = smov 8   ;;  %v956_v6 = vmov 0.0  }
  0x15   : > { %939 = vset.pattern.permute.xlu0 %v953_v2  ;;  %v940_v3 = vld [vmem:[%s1232_s4 + $0x1] ss:$0 sm:$0xff]  ;;  %v941_v5 = vld [vmem:[%s1232_s4 + $0x2] ss:$0 sm:$0xff]  ;;  %278 = vst [vmem:[#allocation2] sm:$0xff] %v956_v6  ;;  %vm279_vm1 = vcmask 519168  }
  0x16   : > { %285 = vperm.xlu0 %939, %v282_v1   ;;  %459 = vrot.lane.b32.xlu1 %v940_v3, %s954_s20  ;;  %v289_v4 = vld [vmem:[%s1230_s2] sm:$0xf]  ;;  %s957_s29 = smov 9   ;;  %v958_v24 = vmov 683565275   ;;  %s964_s9 = smov 127  }
  0x17   : > { %v942_v7 = vld [vmem:[%s1232_s4 + $0x3] ss:$0 sm:$0xff]  ;;  %v959_v26 = vmov 2475754826   ;;  %v960_v29 = vmov 2131351028  }
  0x18   : > { %473 = vrot.lane.b32.xlu2 %v942_v7, %s957_s29  ;;  %v281_v9 = vld [vmem:[%s265_s8] sm:$0xf]  ;;  %v961_v32 = vmov 2102212464   ;;  %v962_v35 = vmov 920167782  }
  0x19   : > { %v963_v38 = vmov 1326507024   ;;  %s965_s10 = smov 120   ;;  %s966_s12 = smov 119  }
  0x1e   : > { %292 = vperm.xlu0 %939, %v289_v4   ;;  %466 = vrot.lane.b32.xlu1 %v941_v5, %s955_s26 }
  0x88   : > { %v286_v8 = vpop.permute.xlu0 %285 }
  0x89   : > { %v288_v10 = vmul.f32 %v286_v8, %v281_v9 }
  0x90   : > { %v293_v11 = vpop.permute.xlu0 %292 }
  0x91   : > { %v1046_v12 = vadd.f32 %v293_v11, %v288_v10 }
  0x93   : > { %v299_v13 = vand.u32 2139095040, %v1046_v12  ;;  %v296_v16 = vand.u32 2147483647, %v1046_v12  ;;  %vm298_vm14 = vcmp.lt.s32.totalorder %v1046_v12, 0 }
  0x95   : > { %v300_v14 = vshrl.u32 %v299_v13, 23  ;;  %v303_v18 = vand.u32 8388607, %v296_v16  ;;  %vm297_vm15 = vcmp.le.f32.partialorder %v296_v16, 0.7853982 }
  0x97   : > { %v883_v15 = vadd.s32 4294967169, %v300_v14  ;;  %v304_v22 = vor.u32 8388608, %v303_v18 }
  0x99   : > { %v306_v17 = vadd.s32 1, %v883_v15  ;;  %v1063_v45 = vshll.u32 %v304_v22, 8 }
  0x9b   : > { %vm307_vm2 = vcmp.gt.s32.totalorder %v306_v17, 0  ;;  %v345_v54 = vand.u32 65535, %v1063_v45  ;;  %v346_v55 = vshrl.u32 %v1063_v45, 16 }
  0x9c   : > { %v308_v19 = vsel %vm307_vm2, %v306_v17, 0 }
  0x9d   : > { %v310_v20 = vand.u32 31, %v308_v19  ;;  %v1054_v23 = vshrl.u32 %v308_v19, 5 }
  0x9f   : > { %v1052_v21 = vsub.s32 32, %v310_v20  ;;  %v313_v25 = vshll.u32 %v958_v24, %v310_v20  ;;  %v316_v27 = vshll.u32 %v959_v26, %v310_v20  ;;  %v319_v31 = vshll.u32 %v960_v29, %v310_v20 }
  0xa0   : > { %v322_v34 = vshll.u32 %v961_v32, %v310_v20  ;;  %v325_v37 = vshll.u32 %v962_v35, %v310_v20  ;;  %vm328_vm3 = vcmp.lt.s32.totalorder %v1054_v23, 1  ;;  %vm331_vm4 = vcmp.lt.s32.totalorder %v1054_v23, 4 }
  0xa1   : > { %v314_v28 = vshrl.u32 %v959_v26, %v1052_v21  ;;  %v317_v30 = vshrl.u32 %v960_v29, %v1052_v21  ;;  %v320_v33 = vshrl.u32 %v961_v32, %v1052_v21  ;;  %v323_v36 = vshrl.u32 %v962_v35, %v1052_v21 }
  0xa2   : > { %v326_v39 = vshrl.u32 %v963_v38, %v1052_v21  ;;  %vm330_vm5 = vcmp.lt.s32.totalorder %v1054_v23, 3  ;;  %vm329_vm6 = vcmp.lt.s32.totalorder %v1054_v23, 2  ;;  %v312_v19 = vshrl.u32 %v958_v24, %v1052_v21 }
  0xa3   : > { %v315_v40 = vor.u32 %v314_v28, %v313_v25  ;;  %v318_v41 = vor.u32 %v317_v30, %v316_v27  ;;  %v321_v42 = vor.u32 %v320_v33, %v319_v31  ;;  %v324_v43 = vor.u32 %v323_v36, %v322_v34 }
  0xa4   : > { %v327_v44 = vor.u32 %v326_v39, %v325_v37 }
  0xa5   : > { %v336_v46 = vsel %vm328_vm3, %v315_v40, %v318_v41  ;;  %v340_v47 = vsel %vm328_vm3, %v318_v41, %v321_v42  ;;  %v337_v48 = vsel %vm331_vm4, %v324_v43, 920167782  ;;  %v333_v15 = vsel %vm331_vm4, %v321_v42, 2102212464 }
  0xa6   : > { %v341_v49 = vsel %vm331_vm4, %v327_v44, 1326507024  ;;  %v338_v50 = vsel %vm330_vm5, %v321_v42, %v337_v48  ;;  %v332_v28 = vsel %vm328_vm3, %v312_v19, %v315_v40  ;;  %v334_v29 = vsel %vm330_vm5, %v318_v41, %v333_v15 }
  0xa7   : > { %v342_v51 = vsel %vm330_vm5, %v324_v43, %v341_v49  ;;  %v339_v52 = vsel %vm329_vm6, %v336_v46, %v338_v50  ;;  %v335_v21 = vsel %vm329_vm6, %v332_v28, %v334_v29  ;;  %vm439_vm4 = vweird.f32 %v1046_v12  ;;  %v460_v28 = vpop.permute.xlu1 %459  ;;  %v943_v29 = vld [vmem:[%s1232_s4] ss:$0 sm:$0xff] }
  0xa8   : > { %v343_v53 = vsel %vm329_vm6, %v340_v47, %v342_v51  ;;  %v369_v58 = vand.u32 65535, %v339_v52  ;;  %v370_v59 = vshrl.u32 %v339_v52, 16  ;;  %v389_v36 = vmul.u32 %v1063_v45, %v335_v21  ;;  %v474_v21 = vpop.permute.xlu2 %473 }
  0xa9   : > { %v347_v56 = vand.u32 65535, %v343_v53  ;;  %v348_v57 = vshrl.u32 %v343_v53, 16  ;;  %vm482_vm5 = vcmask 1043456   ;;  %vm478_vm6 = vcmask 31744  }
  0xaa   : > { %v372_v62 = vmul.u32 %v370_v59, %v345_v54  ;;  %v373_v63 = vmul.u32 %v369_v58, %v346_v55  ;;  %v371_v4 = vmul.u32 %v369_v58, %v345_v54  ;;  %v374_v8 = vmul.u32 %v370_v59, %v346_v55 }
  0xab   : > { %v350_v60 = vmul.u32 %v348_v57, %v345_v54  ;;  %v351_v61 = vmul.u32 %v347_v56, %v346_v55  ;;  %v349_v0 = vmul.u32 %v347_v56, %v345_v54  ;;  %v352_v3 = vmul.u32 %v348_v57, %v346_v55 }
  0xac   : > { %v375_v5 = vshll.u32 %v372_v62, 16  ;;  %v377_v10 = vshll.u32 %v373_v63, 16  ;;  %v376_v26 = vshrl.u32 %v372_v62, 16  ;;  %v378_v32 = vshrl.u32 %v373_v63, 16 }
  0xad   : > { %v353_v1 = vshll.u32 %v350_v60, 16  ;;  %v355_v6 = vshll.u32 %v351_v61, 16  ;;  %v354_v20 = vshrl.u32 %v350_v60, 16  ;;  %v356_v30 = vshrl.u32 %v351_v61, 16 }
  0xae   : > { %vm379_vm8 = vc.u32 %v371_v4, %v375_v5  ;;  %v381_v11 = vadd.s32 %v375_v5, %v371_v4 }
  0xaf   : > { %vm357_vm7 = vc.u32 %v349_v0, %v353_v1  ;;  %v359_v7 = vadd.s32 %v353_v1, %v349_v0  ;;  %v380_v14 = vsel %vm379_vm8, 1, %v953_v2 }
  0xb0   : > { %v358_v9 = vsel %vm357_vm7, 1, %v953_v2  ;;  %v382_v18 = vadd.s32 %v380_v14, %v374_v8  ;;  %vm383_vm10 = vc.u32 %v381_v11, %v377_v10  ;;  %v385_v35 = vadd.s32 %v381_v11, %v377_v10 }
  0xb1   : > { %v360_v13 = vadd.s32 %v358_v9, %v352_v3  ;;  %vm361_vm9 = vc.u32 %v359_v7, %v355_v6  ;;  %v384_v25 = vsel %vm383_vm10, 1, %v953_v2  ;;  %vm747_vm7 = vcmask 3072  }
  0xb2   : > { %v362_v17 = vsel %vm361_vm9, 1, %v953_v2  ;;  %v386_v27 = vadd.s32 %v384_v25, %v382_v18 }
  0xb3   : > { %v364_v22 = vadd.s32 %v362_v17, %v360_v13 }
  0xb4   : > { %v387_v33 = vadd.s32 %v386_v27, %v376_v26 }
  0xb5   : > { %v365_v31 = vadd.s32 %v364_v22, %v354_v20 }
  0xb6   : > { %v388_v24 = vadd.s32 %v387_v33, %v378_v32 }
  0xb7   : > { %v366_v34 = vadd.s32 %v365_v31, %v356_v30 }
  0xb8   : > { %v392_v2 = vadd.s32 1, %v388_v24 }
  0xb9   : > { %vm391_vm11 = vc.u32 %v366_v34, %v385_v35  ;;  %v390_v23 = vadd.s32 %v385_v35, %v366_v34 }
  0xba   : > { %v393_v37 = vsel %vm391_vm11, %v392_v2, %v388_v24 }
  0xbb   : > { %v394_v38 = vadd.s32 %v393_v37, %v389_v36 }
  0xbd   : > { %v395_v39 = vadd.s32 536870912, %v394_v38 }
  0xbf   : > { %v396_v40 = vshrl.u32 %v395_v39, 30  ;;  %v889_v39 = vld [vmem:[%s1231_s3 + $0x8] sm:$0xf] }
  0xc1   : > { %v397_v42 = vshll.u32 %v396_v40, 30  ;;  %v420_v61 = vsub.s32 4, %v396_v40 }
  0xc3   : > { %v398_v41 = vsub.s32 %v394_v38, %v397_v42  ;;  %v421_v3 = vsel %vm298_vm14, %v420_v61, %v396_v40  ;;  %v477_v38 = vld [vmem:[%s1231_s3] sm:$0xf]  ;;  %v895_v40 = vld [vmem:[%s1231_s3 + $0x10] sm:$0xf]  ;;  %v888_v42 = vld [vmem:[%s1231_s3 + $0x4] sm:$0xf] }
  0xc4   : > { %v423_v6 = vsel %vm297_vm15, 0, %v421_v3 }
  0xc5   : > { %vm399_vm12 = vcmp.lt.s32.totalorder %v398_v41, 0  ;;  %v400_v43 = vsub.s32 0, %v398_v41  ;;  %v440_v11 = vadd.s32 3, %v423_v6 }
  0xc7   : > { %v401_v44 = vsel %vm399_vm12, %v400_v43, %v398_v41  ;;  %v441_v17 = vand.u32 3, %v440_v11  ;;  %v894_v43 = vld [vmem:[%s1231_s3 + $0xc] sm:$0xf] }
  0xc8   : > { %v402_v46 = vclz %v401_v44  ;;  %v906_v44 = vld [vmem:[%s1231_s3 + $0x1c] sm:$0xf] }
  0xc9   : > { %vm443_vm0 = vcmp.eq.s32.totalorder %v441_v17, 0  ;;  %vm446_vm2 = vcmp.eq.s32.totalorder %v441_v17, 2  ;;  %vm442_vm3 = vcmp.lt.s32.totalorder %v441_v17, 2 }
  0xca   : > { %v884_v47 = vadd.s32 4294967294, %v402_v46 }
  0xcc   : > { %vm885_vm13 = vcmp.lt.s32.totalorder %v884_v47, 0 }
  0xcd   : > { %v405_v48 = vsel %vm885_vm13, 0, %v884_v47 }
  0xce   : > { %v406_v49 = vsub.s32 32, %v405_v48  ;;  %v410_v50 = vsub.s32 4294967266, %v405_v48  ;;  %v407_v51 = vshll.u32 %v398_v41, %v405_v48  ;;  %v901_v48 = vld [vmem:[%s1231_s3 + $0x18] sm:$0xf] }
  0xd0   : > { %v408_v52 = vshrl.u32 %v390_v23, %v406_v49  ;;  %v411_v53 = vadd.s32 127, %v410_v50  ;;  %v909_v23 = vld [vmem:[%s1231_s3 + $0x20] sm:$0xf]  ;;  %v900_v50 = vld [vmem:[%s1231_s3 + $0x14] sm:$0xf] }
  0xd2   : > { %v409_v45 = vor.u32 %v408_v52, %v407_v51  ;;  %v412_v54 = vshll.u32 %v411_v53, 23 }
  0xd4   : > { %v413_v55 = vor.u32 4788187, %v412_v54  ;;  %v416_v57 = vcvt.s32.f32 %v409_v45 }
  0xd6   : > { %v414_v56 = vand.u32 2147483647, %v413_v55 }
  0xd8   : > { %v417_v58 = vmul.f32 %v416_v57, %v414_v56 }
  0xda   : > { %v418_v59 = vxor.u32 2147483648, %v417_v58 }
  0xdc   : > { %v419_v60 = vsel %vm298_vm14, %v418_v59, %v417_v58 }
  0xdd   : > { %v422_v62 = vsel %vm297_vm15, %v1046_v12, %v419_v60  ;;  %v467_v12 = vpop.permute.xlu1 %466 }
  0xde   : > { %v424_v63 = vmul.f32 %v422_v62, %v422_v62 }
  0xe0   : > { %v425_v0 = vmul.f32 -0.001358992, %v424_v63  ;;  %v432_v1 = vmul.f32 -0.00019511016, %v424_v63 }
  0xe2   : > { %v426_v4 = vadd.f32 0.041655596, %v425_v0  ;;  %v433_v5 = vadd.f32 0.008332121, %v432_v1 }
  0xe4   : > { %v427_v7 = vmul.f32 %v426_v4, %v424_v63  ;;  %v434_v8 = vmul.f32 %v433_v5, %v424_v63 }
  0xe6   : > { %v428_v9 = vadd.f32 -0.4999988, %v427_v7  ;;  %v435_v10 = vadd.f32 -0.16666654, %v434_v8 }
  0xe8   : > { %v429_v13 = vmul.f32 %v428_v9, %v424_v63  ;;  %v436_v14 = vmul.f32 %v435_v10, %v424_v63 }
  0xea   : > { %v430_v15 = vadd.f32 1.0, %v429_v13  ;;  %v437_v16 = vadd.f32 1.0, %v436_v14 }
  0xec   : > { %v438_v18 = vmul.f32 %v437_v16, %v422_v62  ;;  %v447_v19 = vxor.u32 2147483648, %v430_v15 }
  0xee   : > { %v444_v20 = vxor.u32 2147483648, %v438_v18  ;;  %v448_v25 = vsel %vm446_vm2, %v447_v19, %v438_v18  ;;  %v742_v18 = vld [vmem:[%s1234_s6] sm:$0xf] }
  0xf0   : > { %v445_v22 = vsel %vm443_vm0, %v430_v15, %v444_v20  ;;  %v749_v15 = vld [vmem:[%s1235_s7] sm:$0xf] }
  0xf1   : > { %v449_v26 = vsel %vm442_vm3, %v445_v22, %v448_v25 }
  0xf2   : > { %v450_v27 = vsel %vm439_vm4, nan, %v449_v26 }
  0xf3   : > { %451 = vst.msk [vmem:[#allocation2 + $0x4] sm:$0xf] %vm279_vm1, %v450_v27 }
  0xfa   : > { %v452_v30 = vld [vmem:[#allocation2 + $0x4] sm:$0xf] }
  0xfb   : > { %v462_v31 = vmul.f32 %v460_v28, %v452_v30  ;;  %v455_v32 = vmul.f32 %v943_v29, %v452_v30  ;;  %v469_v33 = vmul.f32 %v467_v12, %v452_v30  ;;  %v476_v24 = vmul.f32 %v474_v21, %v452_v30 }
  0xfd   : > { %534 = vst [vmem:[#allocation1] ss:$2 sm:$0xff] %v462_v31  ;;  %886 = vmatpush.msk.msra.mxu0 %vm482_vm5, %v455_v32  ;;  %890 = vmatpush.msk.msra.mxu1 %vm482_vm5, %v455_v32 }
  0xfe   : > { %896 = vmatpush.msk.msra.mxu3 %vm482_vm5, %v455_v32  ;;  %887 = vmatmul.msk.f32.vlgmr.msra.gmra.mxu0 %vm478_vm6, %v477_v38 }
  0xff   : > { %891 = vmatmul.msk.f32.vlgmr.msra.gmra.mxu1 %vm478_vm6, %v889_v39  ;;  %897 = vmatmul.msk.f32.vlgmr.msra.gmra.mxu3 %vm478_vm6, %v895_v40 }
 0x104   : > { %v535_v34 = vld.sshfl [vmem:[#allocation1] sm:$0xff pattern:$0x75316420] }
 0x105   : > { %591 = vst [vmem:[#allocation1] ss:$2 sm:$0xff] %v469_v33  ;;  %536 = vrot.lane.b32.xlu2 %v535_v34, %s964_s9 }
 0x10c   : > { %v592_v35 = vld.sshfl [vmem:[#allocation1] sm:$0xff pattern:$0x75316420] }
 0x10d   : > { %593 = vrot.lane.b32.xlu0 %v592_v35, %s965_s10  ;;  %624 = vst [vmem:[#allocation1] ss:$2 sm:$0xff] %v469_v33 }
 0x114   : > { %v625_v2 = vld.sshfl [vmem:[#allocation1] sm:$0xff pattern:$0x75316420] }
 0x115   : > { %626 = vrot.lane.b32.xlu0 %v625_v2, %s965_s10  ;;  %654 = vst [vmem:[#allocation1] ss:$2 sm:$0xff] %v476_v24 }
 0x11c   : > { %v655_v36 = vld.sshfl [vmem:[#allocation1] sm:$0xff pattern:$0x75316420] }
 0x11d   : > { %656 = vrot.lane.b32.xlu1 %v655_v36, %s966_s12  ;;  %685 = vst [vmem:[#allocation1] ss:$2 sm:$0xff] %v462_v31 }
 0x124   : > { %v686_v37 = vld.sshfl [vmem:[#allocation1] sm:$0xff pattern:$0x75316420] }
 0x125   : > { %687 = vrot.lane.b32.xlu2 %v686_v37, %s964_s9  ;;  %s967_s9 = smov 64  }
 0x15f   : > { %v537_v41 = vpop.permute.xlu2 %536 }
 0x160   : > { %892 = vmatpush.msk.msra.mxu2 %vm482_vm5, %v537_v41 }
 0x161   : > { %893 = vmatmul.msk.f32.vlgmr.msra.gmra.mxu2 %vm478_vm6, %v888_v42 }
 0x17b   : > { %v503_v52 = vpop.f32.mrf.mxu0 }
 0x17c   : > { %741 = vst.msk [vmem:[%s1022_s11] sm:$0xf] %vm279_vm1, %v503_v52  ;;  %v750_v53 = vmul.f32 %v503_v52, %v503_v52  ;;  %v743_v54 = vsel %vm279_vm1, %v503_v52, 0.0  ;;  %v530_v55 = vpop.f32.mrf.mxu1 }
 0x17d   : > { %744 = vadd.xlane.f32.xlu1 %v743_v54 }
 0x17e   : > { %v751_v45 = vsel %vm279_vm1, %v750_v53, 0.0 }
 0x17f   : > { %v594_v46 = vpop.permute.xlu0 %593  ;;  %v688_v47 = vpop.permute.xlu2 %687  ;;  %752 = vadd.xlane.f32.xlu2 %v751_v45 }
 0x180   : > { %898 = vmatpush.msk.msrb.mxu0 %vm482_vm5, %v594_v46  ;;  %907 = vmatpush.msk.msrb.mxu3 %vm482_vm5, %v688_v47 }
 0x181   : > { %899 = vmatmul.msk.f32.vlgmr.msrb.gmra.mxu0 %vm478_vm6, %v894_v43  ;;  %908 = vmatmul.msk.f32.vlgmr.msrb.gmra.mxu3 %vm478_vm6, %v906_v44 }
 0x182   : > { %910 = vmatpush.msk.msra.mxu0 %vm482_vm5, %v455_v32  ;;  %v587_v61 = vpop.f32.mrf.mxu3 }
 0x187   : > { %v627_v49 = vpop.permute.xlu0 %626 }
 0x188   : > { %902 = vmatpush.msk.msrb.mxu1 %vm482_vm5, %v627_v49 }
 0x189   : > { %903 = vmatmul.msk.f32.vlgmr.msrb.gmra.mxu1 %vm478_vm6, %v901_v48  ;;  %911 = vmatmul.msk.f32.vlgmr.msra.gmra.mxu0 %vm478_vm6, %v909_v23 }
 0x18f   : > { %v657_v51 = vpop.permute.xlu1 %656 }
 0x190   : > { %904 = vmatpush.msk.msrb.mxu2 %vm482_vm5, %v657_v51 }
 0x191   : > { %905 = vmatmul.msk.f32.vlgmr.msrb.gmra.mxu2 %vm478_vm6, %v900_v50 }
 0x1e4   : > { %v560_v56 = vpop.f32.mrf.mxu2 }
 0x1e5   : > { %v561_v57 = vadd.f32 %v560_v56, %v530_v55 }
 0x1e7   : > { %v769_v58 = vmul.f32 %v561_v57, %v561_v57  ;;  %v763_v59 = vsel %vm279_vm1, %v561_v57, 0.0 }
 0x1e8   : > { %764 = vadd.xlane.f32.xlu0 %v763_v59 }
 0x1e9   : > { %v770_v60 = vsel %vm279_vm1, %v769_v58, 0.0 }
 0x1ea   : > { %771 = vadd.xlane.f32.xlu2 %v770_v60 }
 0x1f0   : > { %v745_v19 = vpop.xlane.xlu1 %744 }
 0x1f1   : > { %v746_v20 = vadd.f32 %v745_v19, %v742_v18 }
 0x1f2   : > { %v753_v16 = vpop.xlane.xlu2 %752 }
 0x1f3   : > { %v754_v17 = vadd.f32 %v753_v16, %v749_v15  ;;  %748 = vst.msk [vmem:[%s1234_s6] sm:$0xf] %vm747_vm7, %v746_v20 }
 0x1f5   : > { %755 = vst.msk [vmem:[%s1235_s7] sm:$0xf] %vm747_vm7, %v754_v17 }
 0x1fa   : > { %v762_v26 = vld [vmem:[%s1234_s6] sm:$0xf] }
 0x1fc   : > { %v768_v22 = vld [vmem:[%s1235_s7] sm:$0xf] }
 0x1fe   : > { %v617_v62 = vpop.f32.mrf.mxu0 }
 0x1ff   : > { %v618_v63 = vadd.f32 %v617_v62, %v587_v61 }
 0x201   : > { %775 = vst.msk [vmem:[%s1022_s11 + $0x4] sm:$0xf] %vm279_vm1, %v618_v63  ;;  %v783_v0 = vmul.f32 %v618_v63, %v618_v63  ;;  %v777_v1 = vsel %vm279_vm1, %v618_v63, 0.0 }
 0x202   : > { %778 = vadd.xlane.f32.xlu1 %v777_v1 }
 0x203   : > { %v784_v3 = vsel %vm279_vm1, %v783_v0, 0.0 }
 0x204   : > { %785 = vadd.xlane.f32.xlu2 %v784_v3  ;;  %v711_v6 = vpop.f32.mrf.mxu3 }
 0x206   : > { %v650_v4 = vpop.f32.mrf.mxu1  ;;  %v737_v8 = vpop.f32.mrf.mxu0 }
 0x214   : > { %v680_v5 = vpop.f32.mrf.mxu2 }
 0x215   : > { %v681_v7 = vadd.f32 %v680_v5, %v650_v4 }
 0x217   : > { %v714_v9 = vadd.f32 %v711_v6, %v681_v7 }
 0x219   : > { %v740_v10 = vadd.f32 %v737_v8, %v714_v9 }
 0x21b   : > { %v795_v11 = vsel %vm279_vm1, %v740_v10, 0.0  ;;  %v801_v13 = vmul.f32 %v740_v10, %v740_v10 }
 0x21c   : > { %796 = vadd.xlane.f32.xlu0 %v795_v11  ;;  %757 = vrot.lane.b32.xlu2 %v561_v57, %s967_s9 }
 0x21d   : > { %v802_v14 = vsel %vm279_vm1, %v801_v13, 0.0  ;;  %vm760_vm1 = vcmask 1043968  }
 0x21e   : > { %803 = vadd.xlane.f32.xlu1 %v802_v14 }
 0x230   : > { %790 = vrot.lane.b32.xlu0 %v740_v10, %s967_s9 }
 0x25b   : > { %v765_v25 = vpop.xlane.xlu0 %764 }
 0x25c   : > { %v766_v28 = vadd.f32 %v765_v25, %v762_v26 }
 0x25d   : > { %v772_v27 = vpop.xlane.xlu2 %771 }
 0x25e   : > { %v773_v29 = vadd.f32 %v772_v27, %v768_v22  ;;  %767 = vst.msk [vmem:[%s1234_s6] sm:$0xf] %vm747_vm7, %v766_v28 }
 0x260   : > { %774 = vst.msk [vmem:[%s1235_s7] sm:$0xf] %vm747_vm7, %v773_v29 }
 0x265   : > { %v776_v30 = vld [vmem:[%s1234_s6] sm:$0xf] }
 0x267   : > { %v782_v31 = vld [vmem:[%s1235_s7] sm:$0xf] }
 0x275   : > { %v779_v32 = vpop.xlane.xlu1 %778 }
 0x276   : > { %v780_v12 = vadd.f32 %v779_v32, %v776_v30 }
 0x277   : > { %v786_v33 = vpop.xlane.xlu2 %785 }
 0x278   : > { %v787_v34 = vadd.f32 %v786_v33, %v782_v31  ;;  %781 = vst.msk [vmem:[%s1234_s6] sm:$0xf] %vm747_vm7, %v780_v12 }
 0x27a   : > { %788 = vst.msk [vmem:[%s1235_s7] sm:$0xf] %vm747_vm7, %v787_v34 }
 0x27f   : > { %v758_v35 = vpop.permute.xlu2 %757  ;;  %v794_v21 = vld [vmem:[%s1234_s6] sm:$0xf] }
 0x280   : > { %761 = vst.msk [vmem:[%s1022_s11] sm:$0xf] %vm760_vm1, %v758_v35 }
 0x281   : > { %v800_v2 = vld [vmem:[%s1235_s7] sm:$0xf] }
 0x28f   : > { %v797_v24 = vpop.xlane.xlu0 %796 }
 0x290   : > { %v798_v36 = vadd.f32 %v797_v24, %v794_v21 }
 0x291   : > { %v804_v37 = vpop.xlane.xlu1 %803 }
 0x292   : > { %799 = vst.msk [vmem:[%s1234_s6] sm:$0xf] %vm747_vm7, %v798_v36  ;;  %v805_v38 = vadd.f32 %v804_v37, %v800_v2 }
 0x294   : > { %806 = vst.msk [vmem:[%s1235_s7] sm:$0xf] %vm747_vm7, %v805_v38 }
 0x2a2   : > { %v791_v39 = vpop.permute.xlu0 %790 }
 0x2a3   : > { %793 = vst.msk [vmem:[%s1022_s11 + $0x4] sm:$0xf] %vm760_vm1, %v791_v39 }
 0x2a4 PF: > { %s18_s24 = sadd.s32 1, %s950_s24  }
 0x2a5   : > { %p15_p5 = scmp.ge.s32.totalorder %s18_s24, 4  }
 0x2a7   :  { %17 = sbr.rel (!%p15_p5) target bundleno = 1 (0x1), region = 98 }

// kernel: _lambda_.11
= control target key start
LH: loop header
LB: loop body
LE: loop exit
PB: predicated region body
PF: predicated region fallthrough
CT: control target
= control target key end

     0   :  { %s799_s21 = smov 0   ;;  %s801_s22 = smov 0   ;;  %s947_s0 = inlined_call_operand.vmem [shape: f32[2,4,256], index: 0, kind: input, shape index: {}]   ;;  %s948_s1 = inlined_call_operand.vmem [shape: f32[4,1], index: 1, kind: input, shape index: {}]   ;;  %s949_s2 = inlined_call_operand.vmem [shape: f32[4,1], index: 2, kind: input, shape index: {}]   ;;  %s950_s3 = inlined_call_operand.vmem [shape: f32[16,4], index: 3, kind: input, shape index: {}]   ;;  %s951_s4 = inlined_call_operand.vmem [shape: f32[2,16,256], index: 4, kind: output, shape index: {0}]   ;;  %s952_s5 = inlined_call_operand.vmem [shape: f32[16,1], index: 5, kind: output, shape index: {1}]   ;;  %s953_s6 = inlined_call_operand.vmem [shape: f32[16,1], index: 6, kind: output, shape index: {2}]  }
   0x1   :  { %s803_s23 = smov 0  }
   0x2 LB: > { %s29_s24 = sadd.s32 1, %s749_s22  ;;  %p675_p0 = scmp.ge.s32.totalorder %s753_s23, 1  ;;  %s753_s23 = sphi %s803_s23, %s17_s23   ;;  %s749_s22 = sphi %s801_s22, %s955_s22   ;;  %s745_s21 = sphi %s799_s21, %s954_s21  }
   0x3   : > { %p31_p1 = scmp.ge.s32.totalorder %s29_s24, 2  ;;  %p228_p2 = scmp.lt.s32.totalorder %s753_s23, 3 }
   0x5   : > { %s957_s24 = smov (%p31_p1, %s29_s24), 0  ;;  %p229_p3 = pnand %p675_p0, %p228_p2 }
   0x6   : > { %p267_p4 = scmp.lt.s32.totalorder (!%p229_p3), %s745_s21, 1  ;;  %p286_p5 = scmp.eq.s32.totalorder (!%p229_p3), %s745_s21, 0 }
   0x7   : > { %232 = sbr.rel (%p229_p3) target bundleno = 509 (0x1fd), region = 36 }
   0xc   : > { %s959_s21 = smov (!%p267_p4, %s745_s21), 1  ;;  %291 = sbr.rel (!%p286_p5) target bundleno = 17 (0x11), region = 40  ;;  %vm292_vm0 = vcmask (%p286_p5), 7168   ;;  %v755_v0 = vmov (%p286_p5), 0.0  }
   0xd   : > { %s692_s25 = sshll.u32 %s959_s21, 3  ;;  %s693_s26 = sshll.u32 %s959_s21, 5  ;;  %293 = vst.msk [vmem:[%s952_s5] sm:$0xff] (%p286_p5), %vm292_vm0, %v755_v0 }
   0xe   : > { %s274_s29 = scalar_lea.vmem %s947_s0, %s692_s25  ;;  %s823_s8 = scalar_lea.vmem %s951_s4, %s693_s26  ;;  %294 = vst.msk [vmem:[%s952_s5 + $0x8] sm:$0xff] (%p286_p5), %vm292_vm0, %v755_v0 }
   0xf   : > { %295 = vst.msk [vmem:[%s953_s6] sm:$0xff] (%p286_p5), %vm292_vm0, %v755_v0 }
  0x10   : > { %296 = vst.msk [vmem:[%s953_s6 + $0x8] sm:$0xff] (%p286_p5), %vm292_vm0, %v755_v0 }
  0x11 PF: > { %v298_v1 = vld [vmem:[%s948_s1] sm:$0xf]  ;;  %v756_v2 = vmov 0   ;;  %v757_v4 = vmov 839922192  }
  0x12   : > { %730 = vset.pattern.permute.xlu0 %v756_v2  ;;  %v309_v3 = vld [vmem:[%s949_s2] sm:$0xf]  ;;  %v304_v5 = vunpack.c.l.s4 %v757_v4  ;;  %v758_v25 = vmov 683565275   ;;  %v759_v27 = vmov 2475754826  }
  0x13   : > { %301 = vperm.xlu0 %730, %v298_v1   ;;  %v297_v9 = vld [vmem:[%s274_s29] sm:$0xff]  ;;  %v760_v30 = vmov 2131351028   ;;  %v761_v33 = vmov 2102212464  }
  0x14   : > { %v305_v7 = vunpack.c.0.s8 %v304_v5  ;;  %v762_v36 = vmov 920167782   ;;  %v763_v39 = vmov 1326507024  }
  0x1b   : > { %312 = vperm.xlu0 %730, %v309_v3  }
  0x85   : > { %v302_v6 = vpop.permute.xlu0 %301 }
  0x86   : > { %v306_v8 = vperm.slane %v302_v6, %v305_v7 }
  0x88   : > { %v308_v11 = vmul.f32 %v306_v8, %v297_v9 }
  0x8d   : > { %v313_v10 = vpop.permute.xlu0 %312 }
  0x8e   : > { %v317_v12 = vperm.slane %v313_v10, %v305_v7 }
  0x90   : > { %v844_v13 = vadd.f32 %v317_v12, %v308_v11 }
  0x92   : > { %v323_v14 = vand.u32 2139095040, %v844_v13  ;;  %v320_v17 = vand.u32 2147483647, %v844_v13  ;;  %vm322_vm13 = vcmp.lt.s32.totalorder %v844_v13, 0 }
  0x94   : > { %v324_v15 = vshrl.u32 %v323_v14, 23  ;;  %v327_v19 = vand.u32 8388607, %v320_v17  ;;  %vm321_vm14 = vcmp.le.f32.partialorder %v320_v17, 0.7853982 }
  0x96   : > { %v681_v16 = vadd.s32 4294967169, %v324_v15  ;;  %v328_v23 = vor.u32 8388608, %v327_v19 }
  0x98   : > { %v330_v18 = vadd.s32 1, %v681_v16  ;;  %v861_v46 = vshll.u32 %v328_v23, 8 }
  0x9a   : > { %vm331_vm1 = vcmp.gt.s32.totalorder %v330_v18, 0  ;;  %v369_v55 = vand.u32 65535, %v861_v46  ;;  %v370_v56 = vshrl.u32 %v861_v46, 16 }
  0x9b   : > { %v332_v20 = vsel %vm331_vm1, %v330_v18, 0 }
  0x9c   : > { %v334_v21 = vand.u32 31, %v332_v20  ;;  %v852_v24 = vshrl.u32 %v332_v20, 5 }
  0x9e   : > { %v850_v22 = vsub.s32 32, %v334_v21  ;;  %v337_v26 = vshll.u32 %v758_v25, %v334_v21  ;;  %v340_v28 = vshll.u32 %v759_v27, %v334_v21  ;;  %v343_v32 = vshll.u32 %v760_v30, %v334_v21 }
  0x9f   : > { %v346_v35 = vshll.u32 %v761_v33, %v334_v21  ;;  %v349_v38 = vshll.u32 %v762_v36, %v334_v21  ;;  %vm352_vm2 = vcmp.lt.s32.totalorder %v852_v24, 1  ;;  %vm355_vm3 = vcmp.lt.s32.totalorder %v852_v24, 4 }
  0xa0   : > { %v338_v29 = vshrl.u32 %v759_v27, %v850_v22  ;;  %v341_v31 = vshrl.u32 %v760_v30, %v850_v22  ;;  %v344_v34 = vshrl.u32 %v761_v33, %v850_v22  ;;  %v347_v37 = vshrl.u32 %v762_v36, %v850_v22 }
  0xa1   : > { %v350_v40 = vshrl.u32 %v763_v39, %v850_v22  ;;  %vm354_vm4 = vcmp.lt.s32.totalorder %v852_v24, 3  ;;  %vm353_vm5 = vcmp.lt.s32.totalorder %v852_v24, 2  ;;  %v336_v20 = vshrl.u32 %v758_v25, %v850_v22 }
  0xa2   : > { %v339_v41 = vor.u32 %v338_v29, %v337_v26  ;;  %v342_v42 = vor.u32 %v341_v31, %v340_v28  ;;  %v345_v43 = vor.u32 %v344_v34, %v343_v32  ;;  %v348_v44 = vor.u32 %v347_v37, %v346_v35 }
  0xa3   : > { %v351_v45 = vor.u32 %v350_v40, %v349_v38 }
  0xa4   : > { %v360_v47 = vsel %vm352_vm2, %v339_v41, %v342_v42  ;;  %v364_v48 = vsel %vm352_vm2, %v342_v42, %v345_v43  ;;  %v361_v49 = vsel %vm355_vm3, %v348_v44, 920167782  ;;  %v357_v16 = vsel %vm355_vm3, %v345_v43, 2102212464 }
  0xa5   : > { %v365_v50 = vsel %vm355_vm3, %v351_v45, 1326507024  ;;  %v362_v51 = vsel %vm354_vm4, %v345_v43, %v361_v49  ;;  %v356_v29 = vsel %vm352_vm2, %v336_v20, %v339_v41  ;;  %v358_v30 = vsel %vm354_vm4, %v342_v42, %v357_v16 }
  0xa6   : > { %v366_v52 = vsel %vm354_vm4, %v348_v44, %v365_v50  ;;  %v363_v53 = vsel %vm353_vm5, %v360_v47, %v362_v51  ;;  %v359_v22 = vsel %vm353_vm5, %v356_v29, %v358_v30  ;;  %vm463_vm2 = vweird.f32 %v844_v13  ;;  %v475_v29 = vld [vmem:[%s950_s3] sm:$0xff] }
  0xa7   : > { %v367_v54 = vsel %vm353_vm5, %v364_v48, %v366_v52  ;;  %v393_v59 = vand.u32 65535, %v363_v53  ;;  %v394_v60 = vshrl.u32 %v363_v53, 16  ;;  %v413_v37 = vmul.u32 %v861_v46, %v359_v22 }
  0xa8   : > { %v371_v57 = vand.u32 65535, %v367_v54  ;;  %v372_v58 = vshrl.u32 %v367_v54, 16  ;;  %vm488_vm3 = vcmask 1043456   ;;  %vm481_vm4 = vcmask 31744  }
  0xa9   : > { %v396_v63 = vmul.u32 %v394_v60, %v369_v55  ;;  %v397_v0 = vmul.u32 %v393_v59, %v370_v56  ;;  %v395_v5 = vmul.u32 %v393_v59, %v369_v55  ;;  %v398_v9 = vmul.u32 %v394_v60, %v370_v56 }
  0xaa   : > { %v374_v61 = vmul.u32 %v372_v58, %v369_v55  ;;  %v375_v62 = vmul.u32 %v371_v57, %v370_v56  ;;  %v373_v1 = vmul.u32 %v371_v57, %v369_v55  ;;  %v376_v4 = vmul.u32 %v372_v58, %v370_v56 }
  0xab   : > { %v399_v6 = vshll.u32 %v396_v63, 16  ;;  %v401_v11 = vshll.u32 %v397_v0, 16  ;;  %v400_v27 = vshrl.u32 %v396_v63, 16  ;;  %v402_v33 = vshrl.u32 %v397_v0, 16 }
  0xac   : > { %v377_v3 = vshll.u32 %v374_v61, 16  ;;  %v379_v7 = vshll.u32 %v375_v62, 16  ;;  %v378_v21 = vshrl.u32 %v374_v61, 16  ;;  %v380_v31 = vshrl.u32 %v375_v62, 16 }
  0xad   : > { %vm403_vm7 = vc.u32 %v395_v5, %v399_v6  ;;  %v405_v12 = vadd.s32 %v399_v6, %v395_v5  ;;  %vm553_vm5 = vcmask 7168  }
  0xae   : > { %vm381_vm6 = vc.u32 %v373_v1, %v377_v3  ;;  %v383_v8 = vadd.s32 %v377_v3, %v373_v1  ;;  %v404_v15 = vsel %vm403_vm7, 1, %v756_v2 }
  0xaf   : > { %v382_v10 = vsel %vm381_vm6, 1, %v756_v2  ;;  %v406_v19 = vadd.s32 %v404_v15, %v398_v9  ;;  %vm407_vm9 = vc.u32 %v405_v12, %v401_v11  ;;  %v409_v36 = vadd.s32 %v405_v12, %v401_v11 }
  0xb0   : > { %v384_v14 = vadd.s32 %v382_v10, %v376_v4  ;;  %vm385_vm8 = vc.u32 %v383_v8, %v379_v7  ;;  %v408_v26 = vsel %vm407_vm9, 1, %v756_v2 }
  0xb1   : > { %v386_v18 = vsel %vm385_vm8, 1, %v756_v2  ;;  %v410_v28 = vadd.s32 %v408_v26, %v406_v19 }
  0xb2   : > { %v388_v23 = vadd.s32 %v386_v18, %v384_v14 }
  0xb3   : > { %v411_v34 = vadd.s32 %v410_v28, %v400_v27 }
  0xb4   : > { %v389_v32 = vadd.s32 %v388_v23, %v378_v21 }
  0xb5   : > { %v412_v25 = vadd.s32 %v411_v34, %v402_v33 }
  0xb6   : > { %v390_v35 = vadd.s32 %v389_v32, %v380_v31  ;;  %v476_v32 = vld [vmem:[%s950_s3 + $0x8] sm:$0xff] }
  0xb7   : > { %v416_v2 = vadd.s32 1, %v412_v25 }
  0xb8   : > { %vm415_vm10 = vc.u32 %v390_v35, %v409_v36  ;;  %v414_v24 = vadd.s32 %v409_v36, %v390_v35 }
  0xb9   : > { %v417_v38 = vsel %vm415_vm10, %v416_v2, %v412_v25 }
  0xba   : > { %v418_v39 = vadd.s32 %v417_v38, %v413_v37 }
  0xbc   : > { %v419_v40 = vadd.s32 536870912, %v418_v39 }
  0xbe   : > { %v420_v41 = vshrl.u32 %v419_v40, 30 }
  0xc0   : > { %v421_v43 = vshll.u32 %v420_v41, 30  ;;  %v444_v62 = vsub.s32 4, %v420_v41 }
  0xc2   : > { %v422_v42 = vsub.s32 %v418_v39, %v421_v43  ;;  %v445_v4 = vsel %vm322_vm13, %v444_v62, %v420_v41  ;;  %v543_v41 = vld [vmem:[%s952_s5] sm:$0xff] }
  0xc3   : > { %v447_v7 = vsel %vm321_vm14, 0, %v445_v4 }
  0xc4   : > { %vm423_vm11 = vcmp.lt.s32.totalorder %v422_v42, 0  ;;  %v424_v44 = vsub.s32 0, %v422_v42  ;;  %v464_v12 = vadd.s32 3, %v447_v7 }
  0xc6   : > { %v425_v45 = vsel %vm423_vm11, %v424_v44, %v422_v42  ;;  %v465_v18 = vand.u32 3, %v464_v12 }
  0xc7   : > { %v426_v47 = vclz %v425_v45 }
  0xc8   : > { %vm467_vm15 = vcmp.eq.s32.totalorder %v465_v18, 0  ;;  %vm470_vm0 = vcmp.eq.s32.totalorder %v465_v18, 2  ;;  %vm466_vm1 = vcmp.lt.s32.totalorder %v465_v18, 2 }
  0xc9   : > { %v682_v48 = vadd.s32 4294967294, %v426_v47 }
  0xcb   : > { %vm683_vm12 = vcmp.lt.s32.totalorder %v682_v48, 0 }
  0xcc   : > { %v429_v49 = vsel %vm683_vm12, 0, %v682_v48  ;;  %v544_v48 = vld [vmem:[%s952_s5 + $0x8] sm:$0xff] }
  0xcd   : > { %v430_v50 = vsub.s32 32, %v429_v49  ;;  %v434_v51 = vsub.s32 4294967266, %v429_v49  ;;  %v431_v52 = vshll.u32 %v422_v42, %v429_v49  ;;  %v556_v42 = vld [vmem:[%s953_s6] sm:$0xff] }
  0xcf   : > { %v432_v53 = vshrl.u32 %v414_v24, %v430_v50  ;;  %v435_v54 = vadd.s32 127, %v434_v51  ;;  %v557_v24 = vld [vmem:[%s953_s6 + $0x8] sm:$0xff] }
  0xd1   : > { %v433_v46 = vor.u32 %v432_v53, %v431_v52  ;;  %v436_v55 = vshll.u32 %v435_v54, 23 }
  0xd3   : > { %v437_v56 = vor.u32 4788187, %v436_v55  ;;  %v440_v58 = vcvt.s32.f32 %v433_v46 }
  0xd5   : > { %v438_v57 = vand.u32 2147483647, %v437_v56 }
  0xd7   : > { %v441_v59 = vmul.f32 %v440_v58, %v438_v57 }
  0xd9   : > { %v442_v60 = vxor.u32 2147483648, %v441_v59 }
  0xdb   : > { %v443_v61 = vsel %vm322_vm13, %v442_v60, %v441_v59 }
  0xdc   : > { %v446_v63 = vsel %vm321_vm14, %v844_v13, %v443_v61 }
  0xdd   : > { %v448_v0 = vmul.f32 %v446_v63, %v446_v63 }
  0xdf   : > { %v449_v1 = vmul.f32 -0.001358992, %v448_v0  ;;  %v456_v3 = vmul.f32 -0.00019511016, %v448_v0 }
  0xe1   : > { %v450_v5 = vadd.f32 0.041655596, %v449_v1  ;;  %v457_v6 = vadd.f32 0.008332121, %v456_v3 }
  0xe3   : > { %v451_v8 = vmul.f32 %v450_v5, %v448_v0  ;;  %v458_v9 = vmul.f32 %v457_v6, %v448_v0 }
  0xe5   : > { %v452_v10 = vadd.f32 -0.4999988, %v451_v8  ;;  %v459_v11 = vadd.f32 -0.16666654, %v458_v9 }
  0xe7   : > { %v453_v14 = vmul.f32 %v452_v10, %v448_v0  ;;  %v460_v15 = vmul.f32 %v459_v11, %v448_v0 }
  0xe9   : > { %v454_v16 = vadd.f32 1.0, %v453_v14  ;;  %v461_v17 = vadd.f32 1.0, %v460_v15 }
  0xeb   : > { %v462_v19 = vmul.f32 %v461_v17, %v446_v63  ;;  %v471_v20 = vxor.u32 2147483648, %v454_v16 }
  0xed   : > { %v468_v21 = vxor.u32 2147483648, %v462_v19  ;;  %v472_v26 = vsel %vm470_vm0, %v471_v20, %v462_v19 }
  0xef   : > { %v469_v23 = vsel %vm467_vm15, %v454_v16, %v468_v21 }
  0xf0   : > { %v473_v27 = vsel %vm466_vm1, %v469_v23, %v472_v26 }
  0xf1   : > { %v474_v28 = vsel %vm463_vm2, nan, %v473_v27 }
  0xf2   : > { %478 = vst [vmem:[#allocation1] ss:$2 sm:$0xff] %v474_v28 }
  0xf9   : > { %v479_v30 = vld.sshfl [vmem:[#allocation1] sm:$0xff pattern:$0x75316420]  ;;  %v480_v31 = vld.sshfl [vmem:[#allocation1 + $0x8] sm:$0xff pattern:$0x75316420] }
  0xfa   : > { %684 = vmatpush.msk.msra.mxu0 %vm488_vm3, %v479_v30  ;;  %695 = vmatpush.msk.msra.mxu2 %vm488_vm3, %v479_v30 }
  0xfb   : > { %687 = vmatpush.msk.msra.mxu1 %vm488_vm3, %v480_v31  ;;  %696 = vmatpush.msk.msra.mxu3 %vm488_vm3, %v480_v31 }
  0xfc   : > { %685 = vmatmul.msk.f32.vlgmr.msra.gmra.mxu0 %vm481_vm4, %v475_v29  ;;  %688 = vmatmul.msk.f32.vlgmr.msra.gmra.mxu1 %vm481_vm4, %v475_v29 }
  0xfd   : > { %686 = vmatmul.msk.f32.vlgmr.msra.gmra.mxu2 %vm481_vm4, %v476_v32  ;;  %689 = vmatmul.msk.f32.vlgmr.msra.gmra.mxu3 %vm481_vm4, %v476_v32 }
 0x179   : > { %v510_v13 = vpop.f32.mrf.mxu0  ;;  %v533_v33 = vpop.f32.mrf.mxu1 }
 0x17a   : > { %539 = vst [vmem:[%s823_s8] sm:$0xff] %v510_v13  ;;  %v558_v34 = vmul.f32 %v510_v13, %v510_v13  ;;  %v559_v35 = vmul.f32 %v533_v33, %v533_v33  ;;  %v545_v36 = vadd.f32 %v533_v33, %v510_v13 }
 0x17b   : > { %540 = vst [vmem:[%s823_s8 + $0x8] sm:$0xff] %v533_v33 }
 0x17c   : > { %546 = vadd.xlane.f32.xlu1 %v545_v36  ;;  %v562_v22 = vadd.f32 %v559_v35, %v558_v34 }
 0x17e   : > { %563 = vadd.xlane.f32.xlu2 %v562_v22 }
 0x180   : > { %v513_v25 = vpop.f32.mrf.mxu2  ;;  %v536_v2 = vpop.f32.mrf.mxu3 }
 0x181   : > { %541 = vst [vmem:[%s823_s8 + $0x10] sm:$0xff] %v513_v25  ;;  %v560_v37 = vmul.f32 %v513_v25, %v513_v25  ;;  %v561_v38 = vmul.f32 %v536_v2, %v536_v2  ;;  %v548_v39 = vadd.f32 %v536_v2, %v513_v25 }
 0x182   : > { %542 = vst [vmem:[%s823_s8 + $0x18] sm:$0xff] %v536_v2 }
 0x183   : > { %v565_v40 = vadd.f32 %v561_v38, %v560_v37 }
 0x184   : > { %549 = vadd.xlane.f32.xlu1 %v548_v39 }
 0x186   : > { %566 = vadd.xlane.f32.xlu2 %v565_v40 }
 0x1ef   : > { %v547_v43 = vpop.xlane.xlu1 %546 }
 0x1f0   : > { %v551_v44 = vadd.f32 %v547_v43, %v543_v41 }
 0x1f1   : > { %v564_v45 = vpop.xlane.xlu2 %563 }
 0x1f2   : > { %554 = vst.msk [vmem:[%s952_s5] sm:$0xff] %vm553_vm5, %v551_v44  ;;  %v568_v47 = vadd.f32 %v564_v45, %v556_v42 }
 0x1f4   : > { %570 = vst.msk [vmem:[%s953_s6] sm:$0xff] %vm553_vm5, %v568_v47 }
 0x1f7   : > { %v550_v49 = vpop.xlane.xlu1 %549 }
 0x1f8   : > { %v552_v50 = vadd.f32 %v550_v49, %v544_v48 }
 0x1f9   : > { %v567_v51 = vpop.xlane.xlu2 %566 }
 0x1fa   : > { %555 = vst.msk [vmem:[%s952_s5 + $0x8] sm:$0xff] %vm553_vm5, %v552_v50  ;;  %v569_v52 = vadd.f32 %v567_v51, %v557_v24 }
 0x1fc   : > { %571 = vst.msk [vmem:[%s953_s6 + $0x8] sm:$0xff] %vm553_vm5, %v569_v52 }
 0x1fd PF: > { %s17_s23 = sadd.s32 1, %s753_s23   ;;  %s954_s21 = smov %s749_s22 }
 0x1fe   : > { %p14_p6 = scmp.ge.s32.totalorder %s17_s23, 4   ;;  %s955_s22 = smov %s957_s24 }
 0x200   :  { %16 = sbr.rel (!%p14_p6) target bundleno = 2 (0x2), region = 86 }

// kernel: _lambda_.13
= control target key start
LH: loop header
LB: loop body
LE: loop exit
PB: predicated region body
PF: predicated region fallthrough
CT: control target
= control target key end

     0   :  { %s488_s21 = smov 0   ;;  %s532_s0 = inlined_call_operand.vmem [shape: f32[2,16,256], index: 0, kind: input, shape index: {}]   ;;  %s533_s1 = inlined_call_operand.vmem [shape: f32[2,16,64], index: 1, kind: input, shape index: {}]   ;;  %s534_s2 = inlined_call_operand.vmem [shape: f32[16,1], index: 2, kind: input, shape index: {}]   ;;  %s535_s3 = inlined_call_operand.vmem [shape: f32[16,1], index: 3, kind: input, shape index: {}]   ;;  %s536_s4 = inlined_call_operand.vmem [shape: f32[16,1], index: 4, kind: input, shape index: {}]   ;;  %s537_s5 = inlined_call_operand.vmem [shape: f32[16,1], index: 5, kind: input, shape index: {}]   ;;  %s538_s6 = inlined_call_operand.vmem [shape: f32[2,16,256], index: 6, kind: output, shape index: {}]  }
   0x1 LB: > { %s416_s22 = sadd.s32 4294967295, %s450_s21   ;;  %p420_p0 = scmp.ge.s32.totalorder %s450_s21, 1  ;;  %s450_s21 = sphi %s488_s21, %s16_s21  }
   0x2   : > { %p222_p1 = scmp.lt.s32.totalorder %s450_s21, 3 }
   0x4   : > { %p223_p2 = pnand %p420_p0, %p222_p1 }
   0x5   : > { %p257_p3 = scmp.lt.s32.totalorder (!%p223_p2), %s416_s22, 1 }
   0x6   : > { %226 = sbr.rel (%p223_p2) target bundleno = 150 (0x96), region = 44 }
   0xb   : > { %v292_v0 = vld [vmem:[%s535_s3] sm:$0xff]  ;;  %v452_v2 = vmov 0   ;;  %v293_v4 = vld [vmem:[%s535_s3 + $0x8] sm:$0xff]  ;;  %s540_s22 = smov (!%p257_p3, %s416_s22), 1  ;;  %vm346_vm0 = vcmask 523264  }
   0xc   : > { %v276_v1 = vld [vmem:[%s534_s2] sm:$0xff]  ;;  %442 = vset.pattern.permute.xlu1 %v452_v2  ;;  %441 = vset.pattern.permute.xlu0 %v452_v2  ;;  %v277_v5 = vld [vmem:[%s534_s2 + $0x8] sm:$0xff]  ;;  %s429_s15 = sshll.u32 %s540_s22, 5  ;;  %s430_s24 = sshll.u32 %s540_s22, 4 }
   0xd   : > { %296 = vperm.xlu1 %442, %v292_v0   ;;  %280 = vperm.xlu0 %441, %v276_v1   ;;  %v308_v3 = vld [vmem:[%s537_s5] sm:$0xff]  ;;  %v309_v6 = vld [vmem:[%s537_s5 + $0x8] sm:$0xff]  ;;  %s261_s18 = scalar_lea.vmem %s532_s0, %s429_s15  ;;  %s271_s23 = scalar_lea.vmem %s538_s6, %s429_s15 }
   0xe   : > { %443 = vset.pattern.permute.xlu2 %v452_v2  ;;  %v331_v7 = vld [vmem:[%s536_s4 + $0x8] sm:$0xff]  ;;  %v330_v8 = vld [vmem:[%s536_s4] sm:$0xff]  ;;  %v274_v20 = vld [vmem:[%s261_s18 + $0x10] sm:$0xff]  ;;  %s266_s27 = scalar_lea.vmem %s533_s1, %s430_s24 }
   0xf   : > { %312 = vperm.xlu2 %443, %v308_v3   ;;  %v272_v9 = vld [vmem:[%s261_s18] sm:$0xff]  ;;  %v273_v10 = vld [vmem:[%s261_s18 + $0x8] sm:$0xff]  ;;  %v275_v21 = vld [vmem:[%s261_s18 + $0x18] sm:$0xff] }
  0x10   : > { %v329_v31 = vld [vmem:[%s266_s27 + $0x8] sm:$0xff]  ;;  %v328_v32 = vld [vmem:[%s266_s27] sm:$0xff] }
  0x15   : > { %301 = vperm.xlu1 %442, %v293_v4   ;;  %285 = vperm.xlu0 %441, %v277_v5  }
  0x17   : > { %317 = vperm.xlu2 %443, %v309_v6  }
  0x1d   : > { %339 = vperm.xlu1 %442, %v331_v7   ;;  %334 = vperm.xlu0 %441, %v330_v8  }
  0x69   : > { %v313_v15 = vpop.permute.xlu2 %312 }
  0x71   : > { %v318_v28 = vpop.permute.xlu2 %317 }
  0x7f   : > { %v297_v11 = vpop.permute.xlu1 %296  ;;  %v281_v12 = vpop.permute.xlu0 %280 }
  0x80   : > { %v288_v13 = vmul.f32 %v281_v12, %v272_v9  ;;  %v289_v14 = vmul.f32 %v281_v12, %v273_v10 }
  0x82   : > { %v304_v16 = vadd.f32 %v297_v11, %v288_v13  ;;  %v305_v17 = vadd.f32 %v297_v11, %v289_v14 }
  0x84   : > { %v321_v18 = vadd.f32 %v313_v15, %v305_v17  ;;  %v320_v19 = vadd.f32 %v313_v15, %v304_v16 }
  0x86   : > { %325 = vst [vmem:[%s271_s23 + $0x8] sm:$0xff] %v321_v18 }
  0x87   : > { %v302_v22 = vpop.permute.xlu1 %301  ;;  %v286_v23 = vpop.permute.xlu0 %285  ;;  %324 = vst [vmem:[%s271_s23] sm:$0xff] %v320_v19 }
  0x88   : > { %v290_v24 = vmul.f32 %v286_v23, %v274_v20  ;;  %v291_v25 = vmul.f32 %v286_v23, %v275_v21 }
  0x8a   : > { %v306_v26 = vadd.f32 %v302_v22, %v290_v24  ;;  %v307_v27 = vadd.f32 %v302_v22, %v291_v25 }
  0x8c   : > { %v323_v29 = vadd.f32 %v318_v28, %v307_v27  ;;  %v322_v30 = vadd.f32 %v318_v28, %v306_v26 }
  0x8e   : > { %327 = vst [vmem:[%s271_s23 + $0x18] sm:$0xff] %v323_v29 }
  0x8f   : > { %v340_v33 = vpop.permute.xlu1 %339  ;;  %326 = vst [vmem:[%s271_s23 + $0x10] sm:$0xff] %v322_v30  ;;  %v335_v34 = vpop.permute.xlu0 %334 }
  0x90   : > { %v343_v35 = vmul.f32 %v340_v33, %v329_v31  ;;  %v342_v36 = vmul.f32 %v335_v34, %v328_v32 }
  0x92   : > { %v345_v37 = vadd.f32 %v343_v35, %v322_v30  ;;  %v344_v38 = vadd.f32 %v342_v36, %v320_v19 }
  0x94   : > { %348 = vst.msk [vmem:[%s271_s23 + $0x10] sm:$0xff] %vm346_vm0, %v345_v37 }
  0x95   : > { %347 = vst.msk [vmem:[%s271_s23] sm:$0xff] %vm346_vm0, %v344_v38 }
  0x96 PF: > { %s16_s21 = sadd.s32 1, %s450_s21  }
  0x97   : > { %p13_p4 = scmp.ge.s32.totalorder %s16_s21, 4  }
  0x99   :  { %15 = sbr.rel (!%p13_p4) target bundleno = 1 (0x1), region = 77 }

// kernel: _lambda_.17
= control target key start
LH: loop header
LB: loop body
LE: loop exit
PB: predicated region body
PF: predicated region fallthrough
CT: control target
= control target key end

     0   :  { %s519_s15 = smov 0   ;;  %s521_s16 = smov 0   ;;  %s567_s0 = inlined_call_operand.vmem [shape: f32[2,16,256], index: 0, kind: input, shape index: {}]   ;;  %s568_s1 = inlined_call_operand.vmem [shape: f32[2,16,256], index: 1, kind: input, shape index: {}]   ;;  %s569_s2 = inlined_call_operand.vmem [shape: f32[16,1], index: 2, kind: input, shape index: {}]   ;;  %s570_s3 = inlined_call_operand.vmem [shape: f32[16,1], index: 3, kind: input, shape index: {}]   ;;  %s571_s4 = inlined_call_operand.vmem [shape: f32[2,16,256], index: 4, kind: output, shape index: {}]  }
   0x1   :  { %s523_s17 = smov 0  }
   0x2 LB: > { %s26_s18 = sadd.s32 1, %s487_s16  ;;  %p430_p0 = scmp.ge.s32.totalorder %s491_s17, 1  ;;  %s491_s17 = sphi %s523_s17, %s14_s17   ;;  %s487_s16 = sphi %s521_s16, %s573_s16   ;;  %s483_s15 = sphi %s519_s15, %s572_s15  }
   0x3   : > { %p28_p1 = scmp.ge.s32.totalorder %s26_s18, 2  ;;  %p200_p2 = scmp.lt.s32.totalorder %s491_s17, 3 }
   0x5   : > { %s575_s18 = smov (%p28_p1, %s26_s18), 0  ;;  %p201_p3 = pnand %p430_p0, %p200_p2 }
   0x6   : > { %p244_p4 = scmp.lt.s32.totalorder (!%p201_p3), %s483_s15, 1 }
   0x7   : > { %204 = sbr.rel (%p201_p3) target bundleno = 145 (0x91), region = 36 }
   0xc   : > { %v293_v0 = vld [vmem:[%s570_s3] sm:$0xff]  ;;  %v493_v2 = vmov 0   ;;  %v294_v3 = vld [vmem:[%s570_s3 + $0x8] sm:$0xff]  ;;  %s577_s15 = smov (!%p244_p4, %s483_s15), 1 }
   0xd   : > { %v277_v1 = vld [vmem:[%s569_s2] sm:$0xff]  ;;  %468 = vset.pattern.permute.xlu1 %v493_v2  ;;  %467 = vset.pattern.permute.xlu0 %v493_v2  ;;  %v278_v4 = vld [vmem:[%s569_s2 + $0x8] sm:$0xff]  ;;  %s439_s27 = sshll.u32 %s577_s15, 5 }
   0xe   : > { %297 = vperm.xlu1 %468, %v293_v0   ;;  %281 = vperm.xlu0 %467, %v277_v1   ;;  %s251_s30 = scalar_lea.vmem %s567_s0, %s439_s27  ;;  %s261_s7 = scalar_lea.vmem %s568_s1, %s439_s27 }
   0xf   : > { %v273_v5 = vld [vmem:[%s251_s30] sm:$0xff]  ;;  %v274_v6 = vld [vmem:[%s251_s30 + $0x8] sm:$0xff]  ;;  %s271_s10 = scalar_lea.vmem %s571_s4, %s439_s27  ;;  %v275_v17 = vld [vmem:[%s251_s30 + $0x10] sm:$0xff] }
  0x10   : > { %v309_v11 = vld [vmem:[%s261_s7] sm:$0xff]  ;;  %v310_v12 = vld [vmem:[%s261_s7 + $0x8] sm:$0xff]  ;;  %v276_v18 = vld [vmem:[%s251_s30 + $0x18] sm:$0xff] }
  0x11   : > { %v311_v23 = vld [vmem:[%s261_s7 + $0x10] sm:$0xff]  ;;  %v312_v24 = vld [vmem:[%s261_s7 + $0x18] sm:$0xff] }
  0x16   : > { %302 = vperm.xlu1 %468, %v294_v3   ;;  %286 = vperm.xlu0 %467, %v278_v4  }
  0x80   : > { %v298_v7 = vpop.permute.xlu1 %297  ;;  %v282_v8 = vpop.permute.xlu0 %281 }
  0x81   : > { %v289_v9 = vmul.f32 %v282_v8, %v273_v5  ;;  %v290_v10 = vmul.f32 %v282_v8, %v274_v6 }
  0x83   : > { %v305_v13 = vadd.f32 %v298_v7, %v289_v9  ;;  %v306_v14 = vadd.f32 %v298_v7, %v290_v10 }
  0x85   : > { %v313_v15 = vadd.f32 %v309_v11, %v305_v13  ;;  %v314_v16 = vadd.f32 %v310_v12, %v306_v14 }
  0x87   : > { %317 = vst [vmem:[%s271_s10] sm:$0xff] %v313_v15 }
  0x88   : > { %318 = vst [vmem:[%s271_s10 + $0x8] sm:$0xff] %v314_v16  ;;  %v287_v19 = vpop.permute.xlu0 %286  ;;  %v303_v22 = vpop.permute.xlu1 %302 }
  0x89   : > { %v291_v20 = vmul.f32 %v287_v19, %v275_v17  ;;  %v292_v21 = vmul.f32 %v287_v19, %v276_v18 }
  0x8b   : > { %v307_v25 = vadd.f32 %v303_v22, %v291_v20  ;;  %v308_v26 = vadd.f32 %v303_v22, %v292_v21 }
  0x8d   : > { %v315_v27 = vadd.f32 %v311_v23, %v307_v25  ;;  %v316_v28 = vadd.f32 %v312_v24, %v308_v26 }
  0x8f   : > { %319 = vst [vmem:[%s271_s10 + $0x10] sm:$0xff] %v315_v27 }
  0x90   : > { %320 = vst [vmem:[%s271_s10 + $0x18] sm:$0xff] %v316_v28 }
  0x91 PF: > { %s14_s17 = sadd.s32 1, %s491_s17   ;;  %s572_s15 = smov %s487_s16 }
  0x92   : > { %p11_p5 = scmp.ge.s32.totalorder %s14_s17, 4   ;;  %s573_s16 = smov %s575_s18 }
  0x94   :  { %13 = sbr.rel (!%p11_p5) target bundleno = 2 (0x2), region = 69 }

// kernel: _lambda_.14
= control target key start
LH: loop header
LB: loop body
LE: loop exit
PB: predicated region body
PF: predicated region fallthrough
CT: control target
= control target key end

     0   :  { %s507_s15 = smov 0   ;;  %s509_s16 = smov 0   ;;  %s561_s0 = inlined_call_operand.vmem [shape: f32[2,16,256], index: 0, kind: input, shape index: {}]   ;;  %s562_s1 = inlined_call_operand.vmem [shape: f32[4,16], index: 1, kind: input, shape index: {}]   ;;  %s563_s2 = inlined_call_operand.vmem [shape: f32[2,4,256], index: 2, kind: output, shape index: {0}]   ;;  %s564_s3 = inlined_call_operand.vmem [shape: f32[4,1], index: 3, kind: output, shape index: {1}]   ;;  %s565_s4 = inlined_call_operand.vmem [shape: f32[4,1], index: 4, kind: output, shape index: {2}]  }
   0x1   :  { %s511_s17 = smov 0  }
   0x2 LB: > { %s27_s18 = sadd.s32 1, %s475_s16  ;;  %p419_p0 = scmp.ge.s32.totalorder %s479_s17, 1  ;;  %s479_s17 = sphi %s511_s17, %s15_s17   ;;  %s475_s16 = sphi %s509_s16, %s567_s16   ;;  %s471_s15 = sphi %s507_s15, %s566_s15  }
   0x3   : > { %p29_p1 = scmp.ge.s32.totalorder %s27_s18, 2  ;;  %p178_p2 = scmp.lt.s32.totalorder %s479_s17, 3 }
   0x5   : > { %s569_s18 = smov (%p29_p1, %s27_s18), 0  ;;  %p179_p3 = pnand %p419_p0, %p178_p2 }
   0x6   : > { %p213_p4 = scmp.lt.s32.totalorder (!%p179_p3), %s471_s15, 1  ;;  %p232_p5 = scmp.eq.s32.totalorder (!%p179_p3), %s471_s15, 0 }
   0x7   : > { %182 = sbr.rel (%p179_p3) target bundleno = 277 (0x115), region = 28 }
   0xc   : > { %s571_s15 = smov (!%p213_p4, %s471_s15), 1  ;;  %237 = sbr.rel (!%p232_p5) target bundleno = 17 (0x11), region = 32  ;;  %vm238_vm0 = vcmask (%p232_p5), 3072   ;;  %v481_v0 = vmov (%p232_p5), 0.0  }
   0xd   : > { %s429_s19 = sshll.u32 %s571_s15, 5  ;;  %s430_s20 = sshll.u32 %s571_s15, 3  ;;  %239 = vst.msk [vmem:[%s564_s3] sm:$0xf] (%p232_p5), %vm238_vm0, %v481_v0 }
   0xe   : > { %s220_s23 = scalar_lea.vmem %s561_s0, %s429_s19  ;;  %s230_s26 = scalar_lea.vmem %s563_s2, %s430_s20  ;;  %240 = vst.msk [vmem:[%s565_s4] sm:$0xf] (%p232_p5), %vm238_vm0, %v481_v0 }
  0x11 PF: > { %v244_v1 = vld [vmem:[%s220_s23 + $0x10] sm:$0xff]  ;;  %v245_v2 = vld [vmem:[%s220_s23 + $0x18] sm:$0xff]  ;;  %v242_v3 = vld [vmem:[%s220_s23] sm:$0xff]  ;;  %vm246_vm1 = vcmask 130048   ;;  %vm293_vm2 = vcmask 1043456   ;;  %vm304_vm3 = vcmask 3072  }
  0x12   : > { %264 = vmatpush.msra.mxu0 %v244_v1  ;;  %284 = vmatpush.msra.mxu1 %v245_v2  ;;  %v243_v4 = vld [vmem:[%s220_s23 + $0x8] sm:$0xff]  ;;  %v241_v5 = vld [vmem:[%s562_s1] sm:$0xf] }
  0x14   : > { %265 = vmatpush.msra.mxu0 %v242_v3  ;;  %285 = vmatpush.msra.mxu1 %v243_v4  ;;  %v297_v18 = vld [vmem:[%s564_s3] sm:$0xf] }
  0x15   : > { %425 = vmatmul.msk.f32.vlgmr.msra.gmra.mxu0 %vm246_vm1, %v241_v5  ;;  %426 = vmatmul.msk.f32.vlgmr.msra.gmra.mxu1 %vm246_vm1, %v241_v5  ;;  %v306_v21 = vld [vmem:[%s565_s4] sm:$0xf] }
  0x92   : > { %v267_v6 = vpop.f32.mrf.mxu0  ;;  %v287_v7 = vpop.f32.mrf.mxu1 }
  0x93   : > { %v292_v8 = vrot.slane %v287_v7, 4  ;;  %v298_v9 = vsel %vm293_vm2, %v267_v6, 0.0  ;;  %v299_v10 = vsel %vm293_vm2, %v287_v7, 0.0  ;;  %v307_v13 = vmul.f32 %v267_v6, %v267_v6 }
  0x94   : > { %v300_v12 = vadd.f32 %v299_v10, %v298_v9  ;;  %v308_v14 = vmul.f32 %v287_v7, %v287_v7 }
  0x95   : > { %v294_v11 = vsel %vm293_vm2, %v267_v6, %v292_v8  ;;  %v309_v15 = vsel %vm293_vm2, %v307_v13, 0.0 }
  0x96   : > { %296 = vst [vmem:[%s230_s26] sm:$0xff] %v294_v11  ;;  %301 = vadd.xlane.f32.xlu0 %v300_v12  ;;  %v310_v16 = vsel %vm293_vm2, %v308_v14, 0.0 }
  0x97   : > { %v311_v17 = vadd.f32 %v310_v16, %v309_v15 }
  0x9e   : > { %312 = vadd.xlane.f32.xlu0 %v311_v17 }
 0x109   : > { %v302_v19 = vpop.xlane.xlu0 %301 }
 0x10a   : > { %v303_v20 = vadd.f32 %v302_v19, %v297_v18 }
 0x10c   : > { %305 = vst.msk [vmem:[%s564_s3] sm:$0xf] %vm304_vm3, %v303_v20 }
 0x111   : > { %v313_v22 = vpop.xlane.xlu0 %312 }
 0x112   : > { %v314_v23 = vadd.f32 %v313_v22, %v306_v21 }
 0x114   : > { %315 = vst.msk [vmem:[%s565_s4] sm:$0xf] %vm304_vm3, %v314_v23 }
 0x115 PF: > { %s15_s17 = sadd.s32 1, %s479_s17   ;;  %s566_s15 = smov %s475_s16 }
 0x116   : > { %p12_p6 = scmp.ge.s32.totalorder %s15_s17, 4   ;;  %s567_s16 = smov %s569_s18 }
 0x118   :  { %14 = sbr.rel (!%p12_p6) target bundleno = 2 (0x2), region = 78 }

// kernel: _lambda_.15
= control target key start
LH: loop header
LB: loop body
LE: loop exit
PB: predicated region body
PF: predicated region fallthrough
CT: control target
= control target key end

     0   :  { %s1445_s24 = smov 0   ;;  %s1756_s0 = inlined_call_operand.vmem [shape: f32[2,4,256], index: 0, kind: input, shape index: {}]   ;;  %s1757_s1 = inlined_call_operand.vmem [shape: f32[4,1], index: 1, kind: input, shape index: {}]   ;;  %s1758_s2 = inlined_call_operand.vmem [shape: f32[4,1], index: 2, kind: input, shape index: {}]   ;;  %s1759_s3 = inlined_call_operand.vmem [shape: f32[9,4,4], index: 3, kind: input, shape index: {}]   ;;  %s1760_s4 = inlined_call_operand.vmem [shape: f32[9,256], index: 4, kind: input, shape index: {}]   ;;  %s1761_s5 = inlined_call_operand.vmem [shape: f32[2,4,256], index: 5, kind: output, shape index: {0}]   ;;  %s1762_s6 = inlined_call_operand.vmem [shape: f32[4,1], index: 6, kind: output, shape index: {1}]   ;;  %s1763_s7 = inlined_call_operand.vmem [shape: f32[4,1], index: 7, kind: output, shape index: {2}]  }
   0x1 LB: > { %s1283_s25 = sadd.s32 4294967295, %s1385_s24   ;;  %p1287_p0 = scmp.ge.s32.totalorder %s1385_s24, 1  ;;  %s1385_s24 = sphi %s1445_s24, %s18_s24  }
   0x2   : > { %p232_p1 = scmp.lt.s32.totalorder %s1385_s24, 3 }
   0x4   : > { %p233_p2 = pnand %p1287_p0, %p232_p1 }
   0x5   : > { %p264_p3 = scmp.lt.s32.totalorder (!%p233_p2), %s1283_s25, 1  ;;  %p1292_p4 = scmp.ne.s32.totalorder (!%p233_p2), %s1283_s25, 0 }
   0x6   : > { %236 = sbr.rel (%p233_p2) target bundleno = 688 (0x2b0), region = 40 }
   0xb   : > { %s265_s26 = scalar_select %p264_p3, %s1283_s25, 1 }
   0xc   : > { %277 = sbr.rel (%p1292_p4) target bundleno = 20 (0x14), region = 44 }
   0xd   : > { %s1350_s27 = sshll.u32 %s265_s26, 3 }
   0xe   : > { %s1456_s30 = scalar_lea.vmem %s1756_s0, %s1350_s27  ;;  %s1461_s10 = scalar_lea.vmem %s1761_s5, %s1350_s27 }
  0x11   : > { %vm278_vm0 = vcmask 3072   ;;  %v1387_v0 = vmov 0.0  }
  0x12   : > { %279 = vst.msk [vmem:[%s1762_s6] sm:$0xf] %vm278_vm0, %v1387_v0 }
  0x13   : > { %280 = vst.msk [vmem:[%s1763_s7] sm:$0xf] %vm278_vm0, %v1387_v0 }
  0x14 PF: > { %v284_v1 = vld [vmem:[%s1757_s1] sm:$0xf]  ;;  %v1388_v2 = vmov 0   ;;  %vm469_vm1 = vcmask 1043456   ;;  %s1389_s26 = smov 16   ;;  %s1390_s9 = smov 17  }
  0x15   : > { %1378 = vset.pattern.permute.xlu0 %v1388_v2  ;;  %v1296_v3 = vld [vmem:[%s1760_s4 + $0x1] ss:$8 sm:$0x3]  ;;  %v464_v6 = vld [vmem:[%s1760_s4] ss:$8 sm:$0x3] }
  0x16   : > { %287 = vperm.xlu0 %1378, %v284_v1   ;;  %v483_v4 = vperm.slane %v1296_v3, 0  ;;  %v484_v5 = vperm.slane %v1296_v3, 1  ;;  %v467_v8 = vperm.slane %v464_v6, 1  ;;  %v1300_v9 = vld [vmem:[%s1760_s4 + $0x5] ss:$8 sm:$0x3] }
  0x17   : > { %v295_v11 = vld [vmem:[%s1758_s2] sm:$0xf]  ;;  %v544_v12 = vperm.slane %v1300_v9, 1  ;;  %v466_v13 = vperm.slane %v464_v6, 0  ;;  %v543_v16 = vperm.slane %v1300_v9, 0  ;;  %s1391_s11 = smov 127  }
  0x18   : > { %v485_v7 = vrot.slane %v484_v5, 4  ;;  %v468_v14 = vrot.slane %v467_v8, 4  ;;  %v1301_v15 = vld [vmem:[%s1760_s4 + $0x6] ss:$8 sm:$0x3]  ;;  %s1392_s12 = smov 113  }
  0x19   : > { %v545_v17 = vrot.slane %v544_v12, 4  ;;  %v560_v19 = vperm.slane %v1301_v15, 1  ;;  %v1303_v20 = vld [vmem:[%s1760_s4 + $0x10] ss:$8 sm:$0x3]  ;;  %v559_v23 = vperm.slane %v1301_v15, 0 }
  0x1a   : > { %v486_v10 = vsel %vm469_vm1, %v483_v4, %v485_v7  ;;  %v470_v18 = vsel %vm469_vm1, %v466_v13, %v468_v14  ;;  %v592_v22 = vperm.slane %v1303_v20, 1  ;;  %v591_v25 = vperm.slane %v1303_v20, 0  ;;  %s1393_s13 = smov 111   ;;  %v1297_v29 = vld [vmem:[%s1760_s4 + $0x2] ss:$8 sm:$0x3] }
  0x1b   : > { %487 = vrot.lane.b32.xlu1 %v486_v10, %s1389_s26  ;;  %v546_v21 = vsel %vm469_vm1, %v543_v16, %v545_v17  ;;  %v561_v24 = vrot.slane %v560_v19, 4  ;;  %v500_v30 = vperm.slane %v1297_v29, 1  ;;  %v499_v31 = vperm.slane %v1297_v29, 0  ;;  %s1394_s16 = smov 15   ;;  %s1396_s19 = smov 1   ;;  %v283_v50 = vld [vmem:[%s1456_s30] sm:$0xff] }
  0x1c   : > { %v593_v26 = vrot.slane %v592_v22, 4  ;;  %v1395_v34 = vmov 0.0   ;;  %v1298_v35 = vld [vmem:[%s1760_s4 + $0x3] ss:$8 sm:$0x3]  ;;  %s1397_s22 = smov 112  }
  0x1d   : > { %v562_v27 = vsel %vm469_vm1, %v559_v23, %v561_v24  ;;  %v501_v32 = vrot.slane %v500_v30, 4  ;;  %281 = vst [vmem:[#allocation2] sm:$0xff] %v1395_v34  ;;  %v516_v36 = vperm.slane %v1298_v35, 1  ;;  %v515_v37 = vperm.slane %v1298_v35, 0 }
  0x1e   : > { %298 = vperm.xlu0 %1378, %v295_v11   ;;  %v594_v28 = vsel %vm469_vm1, %v591_v25, %v593_v26  ;;  %282 = vst [vmem:[#allocation2 + $0x8] sm:$0xff] %v1395_v34  ;;  %v1302_v40 = vld [vmem:[%s1760_s4 + $0x7] ss:$8 sm:$0x3]  ;;  %v1398_v45 = vmov 839922192  }
  0x1f   : > { %v502_v33 = vsel %vm469_vm1, %v499_v31, %v501_v32  ;;  %v517_v38 = vrot.slane %v516_v36, 4  ;;  %v576_v41 = vperm.slane %v1302_v40, 1  ;;  %v575_v42 = vperm.slane %v1302_v40, 0 }
  0x20   : > { %503 = vrot.lane.b32.xlu2 %v502_v33, %s1394_s16  ;;  %v290_v46 = vunpack.c.l.s4 %v1398_v45  ;;  %v1399_v3 = vmov 683565275   ;;  %v1400_v5 = vmov 2475754826   ;;  %v1401_v8 = vmov 2131351028  }
  0x21   : > { %v518_v39 = vsel %vm469_vm1, %v515_v37, %v517_v38  ;;  %v577_v43 = vrot.slane %v576_v41, 4  ;;  %v1402_v11 = vmov 2102212464   ;;  %v1403_v14 = vmov 920167782  }
  0x22   : > { %v291_v48 = vunpack.c.0.s8 %v290_v46  ;;  %v1404_v17 = vmov 1326507024  }
  0x23   : > { %471 = vrot.lane.b32.xlu1 %v470_v18, %s1390_s9  ;;  %v578_v44 = vsel %vm469_vm1, %v575_v42, %v577_v43 }
  0x26   : > { %547 = vrot.lane.b32.xlu0 %v546_v21, %s1391_s11 }
  0x28   : > { %519 = vrot.lane.b32.xlu2 %v518_v39, %s1396_s19 }
  0x2b   : > { %563 = vrot.lane.b32.xlu1 %v562_v27, %s1392_s12 }
  0x2e   : > { %595 = vrot.lane.b32.xlu0 %v594_v28, %s1393_s13 }
  0x30   : > { %579 = vrot.lane.b32.xlu2 %v578_v44, %s1397_s22 }
  0x88   : > { %v288_v47 = vpop.permute.xlu0 %287 }
  0x89   : > { %v292_v49 = vperm.slane %v288_v47, %v291_v48 }
  0x8b   : > { %v294_v52 = vmul.f32 %v292_v49, %v283_v50 }
  0x90   : > { %v299_v51 = vpop.permute.xlu0 %298 }
  0x91   : > { %v303_v53 = vperm.slane %v299_v51, %v291_v48 }
  0x93   : > { %v1517_v54 = vadd.f32 %v303_v53, %v294_v52 }
  0x95   : > { %v309_v55 = vand.u32 2139095040, %v1517_v54  ;;  %v306_v58 = vand.u32 2147483647, %v1517_v54  ;;  %vm308_vm14 = vcmp.lt.s32.totalorder %v1517_v54, 0 }
  0x97   : > { %v310_v56 = vshrl.u32 %v309_v55, 23  ;;  %v313_v60 = vand.u32 8388607, %v306_v58  ;;  %vm1598_vm15 = vcmp.le.f32.partialorder %v306_v58, 0.7853982 }
  0x99   : > { %v1293_v57 = vadd.s32 4294967169, %v310_v56  ;;  %v314_v0 = vor.u32 8388608, %v313_v60 }
  0x9b   : > { %v316_v59 = vadd.s32 1, %v1293_v57  ;;  %v1534_v24 = vshll.u32 %v314_v0, 8 }
  0x9d   : > { %vm317_vm2 = vcmp.gt.s32.totalorder %v316_v59, 0  ;;  %v355_v33 = vand.u32 65535, %v1534_v24  ;;  %v356_v34 = vshrl.u32 %v1534_v24, 16 }
  0x9e   : > { %v318_v61 = vsel %vm317_vm2, %v316_v59, 0 }
  0x9f   : > { %v320_v62 = vand.u32 31, %v318_v61  ;;  %v1525_v1 = vshrl.u32 %v318_v61, 5 }
  0xa1   : > { %v1523_v63 = vsub.s32 32, %v320_v62  ;;  %v323_v4 = vshll.u32 %v1399_v3, %v320_v62  ;;  %v326_v6 = vshll.u32 %v1400_v5, %v320_v62  ;;  %v329_v10 = vshll.u32 %v1401_v8, %v320_v62 }
  0xa2   : > { %v332_v13 = vshll.u32 %v1402_v11, %v320_v62  ;;  %v335_v16 = vshll.u32 %v1403_v14, %v320_v62  ;;  %vm338_vm3 = vcmp.lt.s32.totalorder %v1525_v1, 1  ;;  %vm341_vm4 = vcmp.lt.s32.totalorder %v1525_v1, 4 }
  0xa3   : > { %v324_v7 = vshrl.u32 %v1400_v5, %v1523_v63  ;;  %v327_v9 = vshrl.u32 %v1401_v8, %v1523_v63  ;;  %v330_v12 = vshrl.u32 %v1402_v11, %v1523_v63  ;;  %v333_v15 = vshrl.u32 %v1403_v14, %v1523_v63 }
  0xa4   : > { %v336_v18 = vshrl.u32 %v1404_v17, %v1523_v63  ;;  %vm340_vm5 = vcmp.lt.s32.totalorder %v1525_v1, 3  ;;  %vm339_vm6 = vcmp.lt.s32.totalorder %v1525_v1, 2  ;;  %v322_v61 = vshrl.u32 %v1399_v3, %v1523_v63 }
  0xa5   : > { %v325_v19 = vor.u32 %v324_v7, %v323_v4  ;;  %v328_v20 = vor.u32 %v327_v9, %v326_v6  ;;  %v331_v21 = vor.u32 %v330_v12, %v329_v10  ;;  %v334_v22 = vor.u32 %v333_v15, %v332_v13 }
  0xa6   : > { %v337_v23 = vor.u32 %v336_v18, %v335_v16  ;;  %v1572_v16 = vpop.permute.xlu1 %487 }
  0xa7   : > { %v346_v25 = vsel %vm338_vm3, %v325_v19, %v328_v20  ;;  %v350_v26 = vsel %vm338_vm3, %v328_v20, %v331_v21  ;;  %v347_v27 = vsel %vm341_vm4, %v334_v22, 920167782  ;;  %v343_v57 = vsel %vm341_vm4, %v331_v21, 2102212464 }
  0xa8   : > { %v351_v28 = vsel %vm341_vm4, %v337_v23, 1326507024  ;;  %v348_v29 = vsel %vm340_vm5, %v331_v21, %v347_v27  ;;  %v342_v7 = vsel %vm338_vm3, %v322_v61, %v325_v19  ;;  %v344_v8 = vsel %vm340_vm5, %v328_v20, %v343_v57  ;;  %v463_v20 = vld [vmem:[#allocation2 + $0xc] sm:$0xf] }
  0xa9   : > { %v352_v30 = vsel %vm340_vm5, %v334_v22, %v351_v28  ;;  %v349_v31 = vsel %vm339_vm6, %v346_v25, %v348_v29  ;;  %v345_v63 = vsel %vm339_vm6, %v342_v7, %v344_v8  ;;  %v489_v18 = vrot.slane %v1572_v16, 4 }
  0xaa   : > { %v353_v32 = vsel %vm339_vm6, %v350_v26, %v352_v30  ;;  %v379_v37 = vand.u32 65535, %v349_v31  ;;  %v380_v38 = vshrl.u32 %v349_v31, 16  ;;  %v399_v15 = vmul.u32 %v1534_v24, %v345_v63 }
  0xab   : > { %v357_v35 = vand.u32 65535, %v353_v32  ;;  %v358_v36 = vshrl.u32 %v353_v32, 16  ;;  %v495_v21 = vmul.f32 %v489_v18, %v463_v20  ;;  %v1583_v32 = vpop.permute.xlu2 %503  ;;  %vm490_vm3 = vcmask 130048  }
  0xac   : > { %v382_v41 = vmul.u32 %v380_v38, %v355_v33  ;;  %v383_v42 = vmul.u32 %v379_v37, %v356_v34  ;;  %v381_v46 = vmul.u32 %v379_v37, %v355_v33  ;;  %v384_v50 = vmul.u32 %v380_v38, %v356_v34 }
  0xad   : > { %v360_v39 = vmul.u32 %v358_v36, %v355_v33  ;;  %v361_v40 = vmul.u32 %v357_v35, %v356_v34  ;;  %v359_v43 = vmul.u32 %v357_v35, %v355_v33  ;;  %v362_v45 = vmul.u32 %v358_v36, %v356_v34  ;;  %611 = vst [vmem:[#allocation1 + $0x10] ss:$2 sm:$0xff] %v495_v21 }
  0xae   : > { %v385_v47 = vshll.u32 %v382_v41, 16  ;;  %v387_v52 = vshll.u32 %v383_v42, 16  ;;  %v386_v5 = vshrl.u32 %v382_v41, 16  ;;  %v388_v11 = vshrl.u32 %v383_v42, 16  ;;  %v1577_v25 = vpop.permute.xlu1 %471 }
  0xaf   : > { %v363_v44 = vshll.u32 %v360_v39, 16  ;;  %v365_v48 = vshll.u32 %v361_v40, 16  ;;  %v364_v62 = vshrl.u32 %v360_v39, 16  ;;  %v366_v9 = vshrl.u32 %v361_v40, 16 }
  0xb0   : > { %vm389_vm8 = vc.u32 %v381_v46, %v385_v47  ;;  %v391_v53 = vadd.s32 %v385_v47, %v381_v46  ;;  %v473_v26 = vrot.slane %v1577_v25, 4  ;;  %v505_v34 = vrot.slane %v1583_v32, 4 }
  0xb1   : > { %vm367_vm7 = vc.u32 %v359_v43, %v363_v44  ;;  %v369_v49 = vadd.s32 %v363_v44, %v359_v43  ;;  %v390_v56 = vsel %vm389_vm8, 1, %v1388_v2  ;;  %vm449_vm5 = vweird.f32 %v1517_v54 }
  0xb2   : > { %v368_v51 = vsel %vm367_vm7, 1, %v1388_v2  ;;  %v392_v60 = vadd.s32 %v390_v56, %v384_v50  ;;  %vm393_vm10 = vc.u32 %v391_v53, %v387_v52  ;;  %v395_v14 = vadd.s32 %v391_v53, %v387_v52 }
  0xb3   : > { %v370_v55 = vadd.s32 %v368_v51, %v362_v45  ;;  %vm371_vm9 = vc.u32 %v369_v49, %v365_v48  ;;  %v394_v4 = vsel %vm393_vm10, 1, %v1388_v2  ;;  %v479_v24 = vmul.f32 %v473_v26, %v463_v20  ;;  %v1589_v44 = vpop.permute.xlu2 %519 }
  0xb4   : > { %v372_v59 = vsel %vm371_vm9, 1, %v1388_v2  ;;  %v396_v6 = vadd.s32 %v394_v4, %v392_v60  ;;  %v614_v29 = vld.sshfl [vmem:[#allocation1 + $0x10] sm:$0xff pattern:$0x75316420]  ;;  %v511_v35 = vmul.f32 %v505_v34, %v463_v20  ;;  %v521_v45 = vrot.slane %v1589_v44, 4 }
  0xb5   : > { %v374_v0 = vadd.s32 %v372_v59, %v370_v55  ;;  %675 = vst [vmem:[#allocation1 + $0x10] ss:$2 sm:$0xff] %v479_v24  ;;  %619 = vrot.lane.b32.xlu0 %v614_v29, %s1397_s22  ;;  %vm474_vm6 = vcmask 138240   ;;  %v548_v24 = vpop.permute.xlu0 %547  ;;  %vm506_vm7 = vcmask 121856   ;;  %vm522_vm8 = vcmask 7168  }
  0xb6   : > { %v397_v12 = vadd.s32 %v396_v6, %v386_v5  ;;  %v527_v49 = vmul.f32 %v521_v45, %v463_v20  ;;  %v475_v29 = vsel %vm474_vm6, %v473_v26, %v1577_v25  ;;  %v1299_v25 = vld [vmem:[%s1760_s4 + $0x4] ss:$8 sm:$0x3]  ;;  %vm550_vm9 = vcmask 1039360  }
  0xb7   : > { %v375_v10 = vadd.s32 %v374_v0, %v364_v62  ;;  %vm566_vm10 = vcmask 924672  }
  0xb8   : > { %v398_v3 = vadd.s32 %v397_v12, %v388_v11 }
  0xb9   : > { %v376_v13 = vadd.s32 %v375_v10, %v366_v9 }
  0xba   : > { %v402_v2 = vadd.s32 1, %v398_v3 }
  0xbb   : > { %vm401_vm11 = vc.u32 %v376_v13, %v395_v14  ;;  %v400_v38 = vadd.s32 %v395_v14, %v376_v13 }
  0xbc   : > { %v403_v17 = vsel %vm401_vm11, %v402_v2, %v398_v3  ;;  %v678_v37 = vld.sshfl [vmem:[#allocation1 + $0x10] sm:$0xff pattern:$0x75316420]  ;;  %vm582_vm11 = vcmask 916480  }
  0xbd   : > { %v404_v19 = vadd.s32 %v403_v17, %v399_v15  ;;  %740 = vst [vmem:[#allocation1 + $0x10] ss:$2 sm:$0xff] %v511_v35  ;;  %683 = vrot.lane.b32.xlu0 %v678_v37, %s1393_s13 }
  0xbf   : > { %v405_v22 = vadd.s32 536870912, %v404_v19 }
  0xc1   : > { %v406_v23 = vshrl.u32 %v405_v22, 30 }
  0xc3   : > { %v407_v1 = vshll.u32 %v406_v23, 30  ;;  %v430_v59 = vsub.s32 4, %v406_v23 }
  0xc4   : > { %v743_v50 = vld.sshfl [vmem:[#allocation1 + $0x10] sm:$0xff pattern:$0x75316420] }
  0xc5   : > { %v408_v27 = vsub.s32 %v404_v19, %v407_v1  ;;  %748 = vrot.lane.b32.xlu0 %v743_v50, %s1392_s12  ;;  %807 = vst [vmem:[#allocation1 + $0x10] ss:$2 sm:$0xff] %v527_v49  ;;  %v431_v5 = vsel %vm308_vm14, %v430_v59, %v406_v23  ;;  %v491_v1 = vsel %vm490_vm3, %v489_v18, %v1572_v16 }
  0xc6   : > { %v433_v58 = vsel %vm1598_vm15, 0, %v431_v5  ;;  %v507_v16 = vsel %vm506_vm7, %v505_v34, %v1583_v32  ;;  %v533_v32 = vperm.slane %v1299_v25, 1  ;;  %v523_v34 = vsel %vm522_vm8, %v521_v45, %v1589_v44 }
  0xc7   : > { %vm409_vm12 = vcmp.lt.s32.totalorder %v408_v27, 0  ;;  %v410_v28 = vsub.s32 0, %v408_v27  ;;  %v450_v12 = vadd.s32 3, %v433_v58 }
  0xc9   : > { %v411_v30 = vsel %vm409_vm12, %v410_v28, %v408_v27  ;;  %v451_v2 = vand.u32 3, %v450_v12  ;;  %v549_v28 = vrot.slane %v548_v24, 4  ;;  %vm598_vm12 = vcmask 908288  }
  0xca   : > { %v412_v31 = vclz %v411_v30 }
  0xcb   : > { %vm453_vm0 = vcmp.eq.s32.totalorder %v451_v2, 0  ;;  %vm456_vm2 = vcmp.eq.s32.totalorder %v451_v2, 2  ;;  %vm452_vm4 = vcmp.lt.s32.totalorder %v451_v2, 2 }
  0xcc   : > { %v1294_v33 = vadd.s32 4294967294, %v412_v31  ;;  %v810_v61 = vld.sshfl [vmem:[#allocation1 + $0x10] sm:$0xff pattern:$0x75316420] }
  0xcd   : > { %815 = vrot.lane.b32.xlu0 %v810_v61, %s1391_s11  ;;  %v551_v61 = vsel %vm550_vm9, %v549_v28, %v548_v24 }
  0xce   : > { %vm1295_vm13 = vcmp.lt.s32.totalorder %v1294_v33, 0 }
  0xcf   : > { %v415_v36 = vsel %vm1295_vm13, 0, %v1294_v33  ;;  %vm623_vm13 = vcmask 31744  }
  0xd0   : > { %v416_v39 = vsub.s32 32, %v415_v36  ;;  %v420_v40 = vsub.s32 4294967266, %v415_v36  ;;  %v417_v41 = vshll.u32 %v408_v27, %v415_v36  ;;  %v564_v36 = vpop.permute.xlu1 %563 }
  0xd1   : > { %v565_v18 = vrot.slane %v564_v36, 4 }
  0xd2   : > { %v418_v42 = vshrl.u32 %v400_v38, %v416_v39  ;;  %v421_v43 = vadd.s32 127, %v420_v40  ;;  %v580_v40 = vpop.permute.xlu2 %579 }
  0xd4   : > { %v419_v46 = vor.u32 %v418_v42, %v417_v41  ;;  %v422_v47 = vshll.u32 %v421_v43, 23  ;;  %v581_v42 = vrot.slane %v580_v40, 4  ;;  %v532_v43 = vperm.slane %v1299_v25, 0 }
  0xd6   : > { %v423_v48 = vor.u32 4788187, %v422_v47  ;;  %v426_v52 = vcvt.s32.f32 %v419_v46  ;;  %v534_v46 = vrot.slane %v533_v32, 4 }
  0xd8   : > { %v424_v51 = vand.u32 2147483647, %v423_v48 }
  0xda   : > { %v427_v53 = vmul.f32 %v426_v52, %v424_v51  ;;  %v596_v51 = vpop.permute.xlu0 %595 }
  0xdb   : > { %v597_v44 = vrot.slane %v596_v51, 4 }
  0xdc   : > { %v428_v55 = vxor.u32 2147483648, %v427_v53 }
  0xde   : > { %v429_v57 = vsel %vm308_vm14, %v428_v55, %v427_v53  ;;  %v535_v53 = vsel %vm469_vm1, %v532_v43, %v534_v46  ;;  %v1333_v46 = vld [vmem:[%s1759_s3 + $0x18] sm:$0xf]  ;;  %vm1204_vm14 = vcmask 3072  }
  0xdf   : > { %v432_v60 = vsel %vm1598_vm15, %v1517_v54, %v429_v57 }
  0xe0   : > { %v434_v62 = vmul.f32 %v432_v60, %v432_v60 }
  0xe2   : > { %v435_v0 = vmul.f32 -0.001358992, %v434_v62  ;;  %v442_v4 = vmul.f32 -0.00019511016, %v434_v62 }
  0xe4   : > { %v436_v6 = vadd.f32 0.041655596, %v435_v0  ;;  %v443_v7 = vadd.f32 0.008332121, %v442_v4 }
  0xe6   : > { %v437_v8 = vmul.f32 %v436_v6, %v434_v62  ;;  %v444_v9 = vmul.f32 %v443_v7, %v434_v62  ;;  %v567_v6 = vsel %vm566_vm10, %v565_v18, %v564_v36 }
  0xe8   : > { %v438_v10 = vadd.f32 -0.4999988, %v437_v8  ;;  %v445_v11 = vadd.f32 -0.16666654, %v444_v9  ;;  %v583_v9 = vsel %vm582_vm11, %v581_v42, %v580_v40  ;;  %v1328_v40 = vld [vmem:[%s1759_s3 + $0x14] sm:$0xf] }
  0xea   : > { %v439_v13 = vmul.f32 %v438_v10, %v434_v62  ;;  %v446_v14 = vmul.f32 %v445_v11, %v434_v62 }
  0xec   : > { %v440_v63 = vadd.f32 1.0, %v439_v13  ;;  %v447_v3 = vadd.f32 1.0, %v446_v14  ;;  %v599_v13 = vsel %vm598_vm12, %v597_v44, %v596_v51  ;;  %v1338_v51 = vld [vmem:[%s1759_s3 + $0x1c] sm:$0xf] }
  0xee   : > { %v448_v15 = vmul.f32 %v447_v3, %v432_v60  ;;  %v457_v17 = vxor.u32 2147483648, %v440_v63 }
  0xf0   : > { %v454_v19 = vxor.u32 2147483648, %v448_v15  ;;  %v458_v21 = vsel %vm456_vm2, %v457_v17, %v448_v15 }
  0xf2   : > { %v455_v20 = vsel %vm453_vm0, %v440_v63, %v454_v19 }
  0xf3   : > { %v459_v22 = vsel %vm452_vm4, %v455_v20, %v458_v21  ;;  %v1304_v20 = vld [vmem:[%s1759_s3 + $0x4] sm:$0xf] }
  0xf4   : > { %v460_v23 = vsel %vm449_vm5, nan, %v459_v22 }
  0xf5   : > { %461 = vst [vmem:[#allocation2 + $0x4] sm:$0xff] %v460_v23  ;;  %v494_v27 = vmul.f32 %v491_v1, %v460_v23  ;;  %v478_v54 = vmul.f32 %v475_v29, %v460_v23  ;;  %v510_v26 = vmul.f32 %v507_v16, %v460_v23  ;;  %v526_v47 = vmul.f32 %v523_v34, %v460_v23 }
  0xf6   : > { %v537_v45 = vmul.f32 %v535_v53, %v460_v23 }
  0xf7   : > { %609 = vst [vmem:[#allocation1] ss:$2 sm:$0xff] %v494_v27  ;;  %v604_v27 = vld [vmem:[%s1759_s3] sm:$0xf] }
  0xfc   : > { %v539_v30 = vld [vmem:[#allocation2 + $0x8] sm:$0xf]  ;;  %v538_v60 = vld [vmem:[#allocation2] sm:$0xff] }
  0xfd   : > { %v555_v31 = vmul.f32 %v549_v28, %v539_v30  ;;  %v571_v37 = vmul.f32 %v565_v18, %v539_v30  ;;  %v587_v48 = vmul.f32 %v581_v42, %v539_v30  ;;  %v603_v55 = vmul.f32 %v597_v44, %v539_v30  ;;  %v1313_v30 = vld [vmem:[%s1759_s3 + $0x8] sm:$0xf]  ;;  %v1323_v18 = vld [vmem:[%s1759_s3 + $0x10] sm:$0xf] }
  0xfe   : > { %v612_v33 = vld.sshfl [vmem:[#allocation1] sm:$0xff pattern:$0x75316420]  ;;  %v613_v35 = vld.sshfl [vmem:[#allocation1 + $0x8] sm:$0xff pattern:$0x75316420]  ;;  %v554_v62 = vmul.f32 %v551_v61, %v538_v60  ;;  %v570_v7 = vmul.f32 %v567_v6, %v538_v60  ;;  %v586_v10 = vmul.f32 %v583_v9, %v538_v60  ;;  %v602_v14 = vmul.f32 %v599_v13, %v538_v60 }
  0xff   : > { %673 = vst [vmem:[#allocation1] ss:$2 sm:$0xff] %v478_v54  ;;  %617 = vrot.lane.b32.xlu2 %v613_v35, %s1397_s22  ;;  %615 = vrot.lane.b32.xlu1 %v612_v33, %s1397_s22  ;;  %v1318_v35 = vld [vmem:[%s1759_s3 + $0xc] sm:$0xf] }
 0x100   : > { %929 = vst [vmem:[#allocation1 + $0x10] ss:$2 sm:$0xff] %v555_v31 }
 0x106   : > { %v677_v38 = vld.sshfl [vmem:[#allocation1 + $0x8] sm:$0xff pattern:$0x75316420]  ;;  %v676_v39 = vld.sshfl [vmem:[#allocation1] sm:$0xff pattern:$0x75316420] }
 0x107   : > { %v932_v41 = vld.sshfl [vmem:[#allocation1 + $0x10] sm:$0xff pattern:$0x75316420]  ;;  %681 = vrot.lane.b32.xlu2 %v677_v38, %s1393_s13  ;;  %679 = vrot.lane.b32.xlu1 %v676_v39, %s1393_s13  ;;  %738 = vst [vmem:[#allocation1] ss:$2 sm:$0xff] %v510_v26 }
 0x108   : > { %937 = vrot.lane.b32.xlu0 %v932_v41, %s1396_s19  ;;  %996 = vst [vmem:[#allocation1 + $0x10] ss:$2 sm:$0xff] %v571_v37 }
 0x10e   : > { %v742_v49 = vld.sshfl [vmem:[#allocation1 + $0x8] sm:$0xff pattern:$0x75316420]  ;;  %v741_v50 = vld.sshfl [vmem:[#allocation1] sm:$0xff pattern:$0x75316420] }
 0x10f   : > { %v999_v52 = vld.sshfl [vmem:[#allocation1 + $0x10] sm:$0xff pattern:$0x75316420]  ;;  %746 = vrot.lane.b32.xlu2 %v742_v49, %s1392_s12  ;;  %744 = vrot.lane.b32.xlu1 %v741_v50, %s1392_s12  ;;  %805 = vst [vmem:[#allocation1] ss:$2 sm:$0xff] %v526_v47 }
 0x110   : > { %1004 = vrot.lane.b32.xlu0 %v999_v52, %s1394_s16  ;;  %1063 = vst [vmem:[#allocation1 + $0x10] ss:$2 sm:$0xff] %v587_v48 }
 0x116   : > { %v809_v56 = vld.sshfl [vmem:[#allocation1 + $0x8] sm:$0xff pattern:$0x75316420]  ;;  %v808_v57 = vld.sshfl [vmem:[#allocation1] sm:$0xff pattern:$0x75316420] }
 0x117   : > { %v1066_v59 = vld.sshfl [vmem:[#allocation1 + $0x10] sm:$0xff pattern:$0x75316420]  ;;  %813 = vrot.lane.b32.xlu2 %v809_v56, %s1391_s11  ;;  %811 = vrot.lane.b32.xlu1 %v808_v57, %s1391_s11  ;;  %871 = vst [vmem:[#allocation1] ss:$2 sm:$0xff] %v537_v45 }
 0x118   : > { %1071 = vrot.lane.b32.xlu0 %v1066_v59, %s1389_s26  ;;  %1130 = vst [vmem:[#allocation1 + $0x10] ss:$2 sm:$0xff] %v603_v55  ;;  %v1343_v55 = vld [vmem:[%s1759_s3 + $0x20] sm:$0xf] }
 0x11e   : > { %v1641_v0 = vld.sshfl [vmem:[#allocation1] sm:$0xff pattern:$0x75316420]  ;;  %v873_v4 = vld.sshfl [vmem:[#allocation1 + $0x8] sm:$0xff pattern:$0x75316420] }
 0x11f   : > { %v1133_v5 = vld.sshfl [vmem:[#allocation1 + $0x10] sm:$0xff pattern:$0x75316420]  ;;  %927 = vst [vmem:[#allocation1] ss:$2 sm:$0xff] %v554_v62 }
 0x120   : > { %1138 = vrot.lane.b32.xlu0 %v1133_v5, %s1390_s9 }
 0x126   : > { %v931_v58 = vld.sshfl [vmem:[#allocation1 + $0x8] sm:$0xff pattern:$0x75316420]  ;;  %v930_v8 = vld.sshfl [vmem:[#allocation1] sm:$0xff pattern:$0x75316420] }
 0x127   : > { %935 = vrot.lane.b32.xlu2 %v931_v58, %s1396_s19  ;;  %933 = vrot.lane.b32.xlu1 %v930_v8, %s1396_s19  ;;  %994 = vst [vmem:[#allocation1] ss:$2 sm:$0xff] %v570_v7  ;;  %v620_v17 = vpop.permute.xlu0 %619 }
 0x12e   : > { %v998_v11 = vld.sshfl [vmem:[#allocation1 + $0x8] sm:$0xff pattern:$0x75316420]  ;;  %v997_v12 = vld.sshfl [vmem:[#allocation1] sm:$0xff pattern:$0x75316420] }
 0x12f   : > { %1002 = vrot.lane.b32.xlu2 %v998_v11, %s1394_s16  ;;  %1000 = vrot.lane.b32.xlu1 %v997_v12, %s1394_s16  ;;  %1061 = vst [vmem:[#allocation1] ss:$2 sm:$0xff] %v586_v10  ;;  %v684_v22 = vpop.permute.xlu0 %683 }
 0x136   : > { %v1065_v63 = vld.sshfl [vmem:[#allocation1 + $0x8] sm:$0xff pattern:$0x75316420]  ;;  %v1064_v3 = vld.sshfl [vmem:[#allocation1] sm:$0xff pattern:$0x75316420] }
 0x137   : > { %1069 = vrot.lane.b32.xlu2 %v1065_v63, %s1389_s26  ;;  %1067 = vrot.lane.b32.xlu1 %v1064_v3, %s1389_s26  ;;  %1128 = vst [vmem:[#allocation1] ss:$2 sm:$0xff] %v602_v14  ;;  %v749_v24 = vpop.permute.xlu0 %748 }
 0x13e   : > { %v1132_v2 = vld.sshfl [vmem:[#allocation1 + $0x8] sm:$0xff pattern:$0x75316420]  ;;  %v1131_v15 = vld.sshfl [vmem:[#allocation1] sm:$0xff pattern:$0x75316420] }
 0x13f   : > { %1136 = vrot.lane.b32.xlu2 %v1132_v2, %s1390_s9  ;;  %1134 = vrot.lane.b32.xlu1 %v1131_v15, %s1390_s9  ;;  %v816_v54 = vpop.permute.xlu0 %815 }
 0x159   : > { %v618_v19 = vpop.permute.xlu2 %617 }
 0x15a   : > { %v622_v21 = vsel %vm582_vm11, %v618_v19, %v620_v17 }
 0x15b   : > { %1307 = vmatpush.msk.msra.mxu1 %vm469_vm1, %v622_v21 }
 0x15c   : > { %1308 = vmatmul.msk.f32.vlgmr.msra.gmra.mxu1 %vm623_vm13, %v1304_v20 }
 0x161   : > { %v682_v23 = vpop.permute.xlu2 %681 }
 0x162   : > { %v686_v1 = vsel %vm598_vm12, %v682_v23, %v684_v22 }
 0x163   : > { %1311 = vmatpush.msk.msra.mxu3 %vm469_vm1, %v686_v1 }
 0x164   : > { %1312 = vmatmul.msk.f32.vlgmr.msra.gmra.mxu3 %vm623_vm13, %v604_v27 }
 0x169   : > { %v747_v28 = vpop.permute.xlu2 %746 }
 0x16a   : > { %v751_v29 = vsel %vm566_vm10, %v747_v28, %v749_v24 }
 0x16b   : > { %1316 = vmatpush.msk.msrb.mxu1 %vm469_vm1, %v751_v29 }
 0x16c   : > { %1317 = vmatmul.msk.f32.vlgmr.msrb.gmra.mxu1 %vm623_vm13, %v1313_v30 }
 0x16d   : > { %1326 = vmatpush.msk.msra.mxu1 %vm469_vm1, %v873_v4 }
 0x171   : > { %v616_v31 = vpop.permute.xlu1 %615  ;;  %v814_v33 = vpop.permute.xlu2 %813 }
 0x172   : > { %v621_v36 = vsel %vm582_vm11, %v616_v31, %v618_v19  ;;  %v818_v16 = vsel %vm550_vm9, %v814_v33, %v816_v54 }
 0x173   : > { %1305 = vmatpush.msk.msra.mxu0 %vm469_vm1, %v621_v36  ;;  %1321 = vmatpush.msk.msrb.mxu3 %vm469_vm1, %v818_v16 }
 0x174   : > { %1306 = vmatmul.msk.f32.vlgmr.msra.gmra.mxu0 %vm623_vm13, %v1304_v20  ;;  %1322 = vmatmul.msk.f32.vlgmr.msrb.gmra.mxu3 %vm623_vm13, %v1318_v35 }
 0x175   : > { %1327 = vmatmul.msk.f32.vlgmr.msra.gmra.mxu1 %vm623_vm13, %v1323_v18 }
 0x179   : > { %v680_v25 = vpop.permute.xlu1 %679 }
 0x17a   : > { %v938_v26 = vpop.permute.xlu0 %937  ;;  %v685_v37 = vsel %vm598_vm12, %v680_v25, %v682_v23 }
 0x17b   : > { %1309 = vmatpush.msk.msra.mxu2 %vm469_vm1, %v685_v37 }
 0x17c   : > { %1310 = vmatmul.msk.f32.vlgmr.msra.gmra.mxu2 %vm623_vm13, %v604_v27 }
 0x181   : > { %v745_v38 = vpop.permute.xlu1 %744  ;;  %v936_v39 = vpop.permute.xlu2 %935 }
 0x182   : > { %v940_v41 = vsel %vm522_vm8, %v936_v39, %v938_v26  ;;  %v750_v32 = vsel %vm566_vm10, %v745_v38, %v747_v28  ;;  %v1005_v34 = vpop.permute.xlu0 %1004 }
 0x183   : > { %1314 = vmatpush.msk.msrb.mxu0 %vm469_vm1, %v750_v32  ;;  %1331 = vmatpush.msk.msra.mxu3 %vm469_vm1, %v940_v41 }
 0x184   : > { %1332 = vmatmul.msk.f32.vlgmr.msra.gmra.mxu3 %vm623_vm13, %v1328_v40  ;;  %1315 = vmatmul.msk.f32.vlgmr.msrb.gmra.mxu0 %vm623_vm13, %v1313_v30 }
 0x185   : > { %1324 = vmatpush.msk.msra.mxu0 %vm469_vm1, %v1641_v0 }
 0x189   : > { %v812_v42 = vpop.permute.xlu1 %811  ;;  %v1003_v43 = vpop.permute.xlu2 %1002 }
 0x18a   : > { %v1007_v47 = vsel %vm506_vm7, %v1003_v43, %v1005_v34  ;;  %v817_v48 = vsel %vm550_vm9, %v812_v42, %v814_v33  ;;  %v1072_v49 = vpop.permute.xlu0 %1071 }
 0x18b   : > { %1319 = vmatpush.msk.msrb.mxu2 %vm469_vm1, %v817_v48  ;;  %1336 = vmatpush.msk.msrb.mxu1 %vm469_vm1, %v1007_v47  ;;  %v1206_v47 = vld [vmem:[%s1763_s7] sm:$0xf] }
 0x18c   : > { %1320 = vmatmul.msk.f32.vlgmr.msrb.gmra.mxu2 %vm623_vm13, %v1318_v35  ;;  %1337 = vmatmul.msk.f32.vlgmr.msrb.gmra.mxu1 %vm623_vm13, %v1333_v46 }
 0x18d   : > { %1325 = vmatmul.msk.f32.vlgmr.msra.gmra.mxu0 %vm623_vm13, %v1323_v18 }
 0x191   : > { %v1070_v50 = vpop.permute.xlu2 %1069 }
 0x192   : > { %v1074_v52 = vsel %vm490_vm3, %v1070_v50, %v1072_v49  ;;  %v1139_v53 = vpop.permute.xlu0 %1138 }
 0x193   : > { %1341 = vmatpush.msk.msrb.mxu3 %vm469_vm1, %v1074_v52 }
 0x194   : > { %1342 = vmatmul.msk.f32.vlgmr.msrb.gmra.mxu3 %vm623_vm13, %v1338_v51 }
 0x199   : > { %v934_v44 = vpop.permute.xlu1 %933  ;;  %v1137_v45 = vpop.permute.xlu2 %1136 }
 0x19a   : > { %v939_v56 = vsel %vm522_vm8, %v934_v44, %v936_v39  ;;  %v1141_v57 = vsel %vm474_vm6, %v1137_v45, %v1139_v53 }
 0x19b   : > { %1329 = vmatpush.msk.msra.mxu2 %vm469_vm1, %v939_v56  ;;  %1346 = vmatpush.msk.msra.mxu1 %vm469_vm1, %v1141_v57 }
 0x19c   : > { %1330 = vmatmul.msk.f32.vlgmr.msra.gmra.mxu2 %vm623_vm13, %v1328_v40  ;;  %1347 = vmatmul.msk.f32.vlgmr.msra.gmra.mxu1 %vm623_vm13, %v1343_v55 }
 0x1a1   : > { %v1001_v59 = vpop.permute.xlu1 %1000 }
 0x1a2   : > { %v1006_v60 = vsel %vm506_vm7, %v1001_v59, %v1003_v43  ;;  %v1197_v43 = vld [vmem:[%s1762_s6] sm:$0xf] }
 0x1a3   : > { %1334 = vmatpush.msk.msrb.mxu0 %vm469_vm1, %v1006_v60 }
 0x1a4   : > { %1335 = vmatmul.msk.f32.vlgmr.msrb.gmra.mxu0 %vm623_vm13, %v1333_v46 }
 0x1a9   : > { %v1068_v61 = vpop.permute.xlu1 %1067 }
 0x1aa   : > { %v1073_v62 = vsel %vm490_vm3, %v1068_v61, %v1070_v50 }
 0x1ab   : > { %1339 = vmatpush.msk.msrb.mxu2 %vm469_vm1, %v1073_v62 }
 0x1ac   : > { %1340 = vmatmul.msk.f32.vlgmr.msrb.gmra.mxu2 %vm623_vm13, %v1338_v51 }
 0x1b1   : > { %v1135_v0 = vpop.permute.xlu1 %1134 }
 0x1b2   : > { %v1140_v4 = vsel %vm474_vm6, %v1135_v0, %v1137_v45 }
 0x1b3   : > { %1344 = vmatpush.msk.msra.mxu0 %vm469_vm1, %v1140_v4 }
 0x1b4   : > { %1345 = vmatmul.msk.f32.vlgmr.msra.gmra.mxu0 %vm623_vm13, %v1343_v55 }
 0x1d9   : > { %v668_v5 = vpop.f32.mrf.mxu1 }
 0x1e7   : > { %v731_v6 = vpop.f32.mrf.mxu3 }
 0x1e8   : > { %v732_v8 = vadd.f32 %v731_v6, %v668_v5 }
 0x1e9   : > { %v796_v58 = vpop.f32.mrf.mxu1 }
 0x1ea   : > { %v800_v11 = vadd.f32 %v796_v58, %v732_v8 }
 0x1f1   : > { %v648_v7 = vpop.f32.mrf.mxu0 }
 0x1f2   : > { %v918_v13 = vpop.f32.mrf.mxu1 }
 0x1f7   : > { %v863_v9 = vpop.f32.mrf.mxu3 }
 0x1f8   : > { %v867_v14 = vadd.f32 %v863_v9, %v800_v11 }
 0x1fa   : > { %v922_v2 = vadd.f32 %v918_v13, %v867_v14 }
 0x1ff   : > { %v711_v10 = vpop.f32.mrf.mxu2 }
 0x200   : > { %v712_v63 = vadd.f32 %v711_v10, %v648_v7 }
 0x201   : > { %v776_v12 = vpop.f32.mrf.mxu0 }
 0x202   : > { %v799_v17 = vadd.f32 %v776_v12, %v712_v63 }
 0x207   : > { %v985_v3 = vpop.f32.mrf.mxu3 }
 0x208   : > { %v989_v21 = vadd.f32 %v985_v3, %v922_v2 }
 0x209   : > { %v1052_v20 = vpop.f32.mrf.mxu1 }
 0x20a   : > { %v898_v19 = vpop.f32.mrf.mxu0  ;;  %v1056_v23 = vadd.f32 %v1052_v20, %v989_v21 }
 0x20f   : > { %v843_v15 = vpop.f32.mrf.mxu2 }
 0x210   : > { %v866_v22 = vadd.f32 %v843_v15, %v799_v17 }
 0x212   : > { %v921_v24 = vadd.f32 %v898_v19, %v866_v22 }
 0x217   : > { %v1119_v27 = vpop.f32.mrf.mxu3 }
 0x218   : > { %v1123_v30 = vadd.f32 %v1119_v27, %v1056_v23 }
 0x219   : > { %v1186_v54 = vpop.f32.mrf.mxu1 }
 0x21a   : > { %v1190_v33 = vadd.f32 %v1186_v54, %v1123_v30 }
 0x21c   : > { %v1193_v18 = vrot.slane %v1190_v33, 4  ;;  %v1208_v26 = vmul.f32 %v1190_v33, %v1190_v33  ;;  %v1199_v39 = vsel %vm469_vm1, %v1190_v33, 0.0 }
 0x21e   : > { %v1210_v34 = vsel %vm469_vm1, %v1208_v26, 0.0 }
 0x21f   : > { %v965_v1 = vpop.f32.mrf.mxu2 }
 0x220   : > { %v988_v29 = vadd.f32 %v965_v1, %v921_v24 }
 0x221   : > { %v1032_v28 = vpop.f32.mrf.mxu0 }
 0x222   : > { %v1055_v31 = vadd.f32 %v1032_v28, %v988_v29 }
 0x22f   : > { %v1099_v35 = vpop.f32.mrf.mxu2 }
 0x230   : > { %v1122_v36 = vadd.f32 %v1099_v35, %v1055_v31 }
 0x231   : > { %v1166_v16 = vpop.f32.mrf.mxu0 }
 0x232   : > { %v1189_v25 = vadd.f32 %v1166_v16, %v1122_v36 }
 0x234   : > { %v1194_v37 = vsel %vm469_vm1, %v1189_v25, %v1193_v18  ;;  %v1198_v38 = vsel %vm469_vm1, %v1189_v25, 0.0  ;;  %v1207_v40 = vmul.f32 %v1189_v25, %v1189_v25 }
 0x235   : > { %1196 = vst [vmem:[%s1461_s10] sm:$0xff] %v1194_v37  ;;  %v1200_v41 = vadd.f32 %v1199_v39, %v1198_v38 }
 0x236   : > { %v1209_v32 = vsel %vm469_vm1, %v1207_v40, 0.0 }
 0x237   : > { %1201 = vadd.xlane.f32.xlu1 %v1200_v41  ;;  %v1211_v42 = vadd.f32 %v1210_v34, %v1209_v32 }
 0x239   : > { %1212 = vadd.xlane.f32.xlu2 %v1211_v42 }
 0x2aa   : > { %v1202_v46 = vpop.xlane.xlu1 %1201 }
 0x2ab   : > { %v1203_v48 = vadd.f32 %v1202_v46, %v1197_v43 }
 0x2ac   : > { %v1213_v49 = vpop.xlane.xlu2 %1212 }
 0x2ad   : > { %1205 = vst.msk [vmem:[%s1762_s6] sm:$0xf] %vm1204_vm14, %v1203_v48  ;;  %v1214_v50 = vadd.f32 %v1213_v49, %v1206_v47 }
 0x2af   : > { %1215 = vst.msk [vmem:[%s1763_s7] sm:$0xf] %vm1204_vm14, %v1214_v50 }
 0x2b0 PF: > { %s18_s24 = sadd.s32 1, %s1385_s24  }
 0x2b1   : > { %p15_p5 = scmp.ge.s32.totalorder %s18_s24, 4  }
 0x2b3   :  { %17 = sbr.rel (!%p15_p5) target bundleno = 1 (0x1), region = 114 }

</bundles_post_ra>
